<compile_context>
chip_gen: v5e
topology: v5e:2x2
jax: 0.10.0
libtpu: 0.0.40
codegen_flags: <defaults>
</compile_context>

<pallas_src>
import numpy as np
import jax
import jax.numpy as jnp
from jax.experimental import pallas as pl
from jax.experimental.pallas import tpu as pltpu


# ---------------------------------------------------------------------------
# Kernels
# ---------------------------------------------------------------------------

def aux_head_fused_kernel(x_ref, wp_ref, b1_ref, w2_ref, b2_ref,
                          wfc_ref, bfc_ref, out_ref):
    """Small/medium-C path: pool ⊗ conv1 folded into one weight -> 3 MXU matmuls.

      x_ref  : (TN, 64*C)  activation tile (ReLU applied in-kernel)   compute dtype
      wp_ref : (64*C, 512) kron(pool mask, conv1 weight · BN1 scale)  compute dtype
      b1_ref : (1, 512)    BN1 bias tiled over the 4 pool windows     f32
      w2_ref : (512, 768)  conv2 2x2 im2col weight · BN2 scale        compute dtype
      b2_ref : (1, 768)    BN2 bias                                   f32
      wfc_ref: (768, NCp)  classifier weight, lane-padded             compute dtype
      bfc_ref: (1, NCp)    classifier bias, lane-padded               f32
      out_ref: (TN, NCp)   logits                                     f32
    """
    cdt = wp_ref.dtype
    xr = jnp.maximum(x_ref[...], 0.0)                                  # ReLU (keeps dtype)
    h = jnp.dot(xr, wp_ref[...], preferred_element_type=jnp.float32)   # (TN, 512)
    h = jnp.maximum(h + b1_ref[...], 0.0)                              # BN1 bias + ReLU (f32)
    g = jnp.dot(h.astype(cdt), w2_ref[...],
                preferred_element_type=jnp.float32)                    # single K=512 conv2
    g = jnp.maximum(g + b2_ref[...], 0.0)                              # BN2 bias + ReLU (f32)
    out_ref[...] = (jnp.dot(g.astype(cdt), wfc_ref[...],
                            preferred_element_type=jnp.float32) + bfc_ref[...])


def aux_head_wide_kernel(x_ref, pmask_ref, w1_ref, b1_ref, w2_ref, b2_ref,
                         wfc_ref, bfc_ref, out_ref):
    """Wide-C path: 1x1 conv first (one big lane-dense matmul over all 64 positions),
    then AvgPool(5,3) as ONE batched mask matmul on the MXU (single pass over t3).

      x_ref    : (TN, 64, C)   pmask_ref: (4, 64)      w1_ref: (C, 128)
      b1_ref   : (1, 128)      w2_ref   : (512, 768)   b2_ref: (1, 768)
      wfc_ref  : (768, NCp)    bfc_ref  : (1, NCp)     out_ref: (TN, NCp) f32
    """
    tn, s, c = x_ref.shape
    nj = w1_ref.shape[1]                                               # 128
    cdt = w1_ref.dtype

    xr = jnp.maximum(x_ref[...], 0.0)                                  # (TN, 64, C)
    t = jnp.dot(xr.reshape(tn * s, c), w1_ref[...],
                preferred_element_type=jnp.float32)                    # (TN*64, 128)
    t3 = t.reshape(tn, s, nj).astype(cdt)                              # (TN, 64, 128)

    # AvgPool(5,3): pooled[n,k,j] = sum_s mask[k,s] * t3[n,s,j] -> batched MXU matmul
    # (reads t3 once; reduction off the VPU/XLU slots).
    pm_b = jnp.broadcast_to(pmask_ref[...].astype(cdt)[None], (tn, 4, s))
    pooled = jnp.einsum('nks,nsj->nkj', pm_b, t3,
                        preferred_element_type=jnp.float32)            # (TN, 4, 128)

    b1 = b1_ref[...]
    # Conv2d(128,768,2): 4 static K=128 slabs (keeps lane layout; no relayout copy).
    g = None
    for k in range(4):
        hk = jnp.maximum(pooled[:, k, :] + b1, 0.0)                    # BN1 bias + ReLU
        gk = jnp.dot(hk.astype(cdt), w2_ref[k * nj:(k + 1) * nj, :],
                     preferred_element_type=jnp.float32)               # (TN, 768)
        g = gk if g is None else g + gk
    g = jnp.maximum(g + b2_ref[...], 0.0)                              # BN2 bias + ReLU

    out_ref[...] = (jnp.dot(g.astype(cdt), wfc_ref[...],
                            preferred_element_type=jnp.float32) + bfc_ref[...])


# ---------------------------------------------------------------------------
# Tiling / VMEM helpers
# ---------------------------------------------------------------------------

def _vmem_budget_bytes():
    """Scoped-VMEM request: never the full physical VMEM (v7x TC only has 64 MiB)."""
    phys = 64 * 1024 * 1024          # conservative fallback (v7x)
    try:
        phys = int(pltpu.get_tpu_info().vmem_capacity_bytes)
    except Exception:
        pass
    return min(64 * 1024 * 1024, int(phys * 3 // 4))


def _pick_batch_tile(n_pad, c, ncp, itemsize, budget, batch_tile_cap, fused):
    """Largest batch tile (multiple of 8, dividing n_pad) that fits the VMEM budget,
    capped so the grid has >= 2 steps (feeds both v7x TensorCores)."""
    if fused:
        per_row = (3 * 64 * c * itemsize            # x tile x2 buffers + ReLU'd staging
                   + (512 + 768) * 4                # h, g f32 temporaries
                   + 3 * ncp * 4)                   # out tile x2 buffers + staging
        fixed = 2 * (64 * c * 512 + 512 * 768 + 768 * ncp) * itemsize
    else:
        per_row = (3 * 64 * c * itemsize            # x tile x2 buffers + ReLU'd staging
                   + 64 * 128 * (4 + itemsize)      # t (f32) + t3 (compute dtype)
                   + (4 * 128 + 512 + 768) * 4      # pooled / hk / g temporaries
                   + 3 * ncp * 4)
        fixed = 2 * (c * 128 + 512 * 768 + 768 * ncp) * itemsize
    fixed += 4 * (512 + 768 + ncp + 4 * 64) * 2 + (4 << 20)   # biases/mask + scratch margin

    avail = budget - fixed
    tn = min(int(batch_tile_cap), int(avail // per_row))
    tn = max(8, (tn // 8) * 8)
    if n_pad >= 16:                                  # >= 2 grid steps -> v7x megacore
        tn = min(tn, max(8, (n_pad // 2) // 8 * 8))
    tn = min(tn, n_pad)
    while n_pad % tn:                                # exact grid (tn, n_pad multiples of 8)
        tn -= 8
    return max(tn, 8)


# ---------------------------------------------------------------------------
# Wrappers
# ---------------------------------------------------------------------------

def auxiliary_head_cifar(x_nsc, kparams, *, batch_tile=256):
    """x_nsc: (N, 64, C) activation, spatial (h*8+w) on sublanes, channels lane-dense.
    Supply it already in the compute dtype (bf16) to avoid any extra HBM pass.
    Returns (N, num_classes) float32 logits."""
    N, S, C = x_nsc.shape
    assert S == 64 and C == kparams["C"]
    cdt = kparams["w2s"].dtype
    itemsize = jnp.dtype(cdt).itemsize
    nc = kparams["num_classes"]
    ncp = kparams["wfc_p"].shape[1]
    fused = kparams["fused"]

    x_nsc = x_nsc.astype(cdt)                        # no-op when producer supplies cdt

    budget = _vmem_budget_bytes()
    n_pad = max(8, ((N + 7) // 8) * 8)
    tn = _pick_batch_tile(n_pad, C, ncp, itemsize, budget, batch_tile, fused)
    grid = (n_pad // tn,)
    resident = pl.Buffered(buffer_count=1)           # single-buffer constant-index blocks

    if fused:
        x_in = x_nsc.reshape(N, 64 * C)              # free: merges minor contiguous dims
        if n_pad != N:
            x_in = jnp.pad(x_in, ((0, n_pad - N), (0, 0)))   # at most 7 rows
        inputs = (x_in, kparams["wp"], kparams["b1x4"], kparams["w2s"],
                  kparams["b2"], kparams["wfc_p"], kparams["bfc_p"])
        x_spec = pl.BlockSpec((tn, 64 * C), lambda i: (i, 0))
        kern = aux_head_fused_kernel
        flops = 2 * n_pad * (64 * C * 512 + 512 * 768 + 768 * ncp)
    else:
        x_in = x_nsc
        if n_pad != N:
            x_in = jnp.pad(x_in, ((0, n_pad - N), (0, 0), (0, 0)))
        inputs = (x_in, kparams["pmask"], kparams["w1s"], kparams["b1"],
                  kparams["w2s"], kparams["b2"], kparams["wfc_p"], kparams["bfc_p"])
        x_spec = pl.BlockSpec((tn, 64, C), lambda i: (i, 0, 0))
        kern = aux_head_wide_kernel
        flops = 2 * n_pad * (64 * C * 128 + 4 * 64 * 128 + 512 * 768 + 768 * ncp)

    in_specs = [x_spec] + [
        pl.BlockSpec(a.shape, lambda i, nd=a.ndim: (0,) * nd, pipeline_mode=resident)
        for a in inputs[1:]
    ]
    wbytes = sum(int(np.prod(a.shape)) * jnp.dtype(a.dtype).itemsize for a in inputs[1:])
    bytes_accessed = int(x_in.size) * itemsize + n_pad * ncp * 4 + wbytes

    out = pl.pallas_call(
        kern,
        out_shape=jax.ShapeDtypeStruct((n_pad, ncp), jnp.float32),
        grid=grid,
        in_specs=in_specs,
        out_specs=pl.BlockSpec((tn, ncp), lambda i: (i, 0)),
        compiler_params=pltpu.CompilerParams(
            dimension_semantics=("parallel",),
            vmem_limit_bytes=budget,
            allow_input_fusion=[True] + [False] * (len(inputs) - 1)),
        cost_estimate=pl.CostEstimate(flops=int(flops), transcendentals=0,
                                      bytes_accessed=int(bytes_accessed)),
    )(*inputs)

    return out[:N, :nc]


def auxiliary_head_cifar_nchw(x_nchw, kparams, *, batch_tile=256):
    """Convenience entry for PyTorch-style NCHW inputs."""
    N, C, H, W = x_nchw.shape
    assert (H, W) == (8, 8), "AuxiliaryHeadCIFAR assumes 8x8 input"
    cdt = kparams["w2s"].dtype
    # TODO(synk): upstream producers should emit (N,64,C) bf16 activations directly;
    # this transpose+cast is kept only for NCHW callers (allow_input_fusion lets XLA
    # fuse it into the kernel's input read where possible).
    x_nsc = jnp.transpose(x_nchw, (0, 2, 3, 1)).reshape(N, H * W, C).astype(cdt)
    return auxiliary_head_cifar(x_nsc, kparams, batch_tile=batch_tile)


# ---------------------------------------------------------------------------
# Parameter packing / reference
# ---------------------------------------------------------------------------

def make_pool_mask():
    """AvgPool2d(5, stride=3) on 8x8 -> 2x2 output; mask[k, h*8+w], k = oh*2+ow."""
    mask = np.zeros((4, 64), np.float32)
    for oh in range(2):
        for ow in range(2):
            k = oh * 2 + ow
            for h in range(3 * oh, 3 * oh + 5):
                for w in range(3 * ow, 3 * ow + 5):
                    mask[k, h * 8 + w] = 1.0 / 25.0
    return jnp.asarray(mask)


def init_torch_params(key, C, num_classes, eps=1e-5):
    """Random parameters mirroring the PyTorch module's tensors (eval-mode BN)."""
    ks = jax.random.split(key, 12)
    w1 = jax.random.normal(ks[0], (128, C), jnp.float32) * 0.2          # Conv2d(C,128,1)
    g1 = 1.0 + 0.1 * jax.random.normal(ks[1], (128,), jnp.float32)
    be1 = 0.1 * jax.random.normal(ks[2], (128,), jnp.float32)
    m1 = 0.1 * jax.random.normal(ks[3], (128,), jnp.float32)
    v1 = jax.random.uniform(ks[4], (128,), jnp.float32, 0.5, 1.5)
    w2 = jax.random.normal(ks[5], (768, 128, 2, 2), jnp.float32) * 0.05  # Conv2d(128,768,2)
    g2 = 1.0 + 0.1 * jax.random.normal(ks[6], (768,), jnp.float32)
    be2 = 0.1 * jax.random.normal(ks[7], (768,), jnp.float32)
    m2 = 0.1 * jax.random.normal(ks[8], (768,), jnp.float32)
    v2 = jax.random.uniform(ks[9], (768,), jnp.float32, 0.5, 1.5)
    wfc = jax.random.normal(ks[10], (num_classes, 768), jnp.float32) * 0.05
    bfc = 0.1 * jax.random.normal(ks[11], (num_classes,), jnp.float32)
    return dict(w1=w1, g1=g1, be1=be1, m1=m1, v1=v1,
                w2=w2, g2=g2, be2=be2, m2=m2, v2=v2,
                wfc=wfc, bfc=bfc, eps=eps)


def pack_kernel_params(p, compute_dtype=jnp.bfloat16, fuse_pool_conv1=None):
    """Fold eval-mode BN scales into conv weights; pick the kernel path; lane-pad fc."""
    eps = p["eps"]
    s1 = p["g1"] / jnp.sqrt(p["v1"] + eps)
    b1 = p["be1"] - p["m1"] * s1
    s2 = p["g2"] / jnp.sqrt(p["v2"] + eps)
    b2 = p["be2"] - p["m2"] * s2
    C = p["w1"].shape[1]

    w1s = p["w1"].T * s1[None, :]                              # (C, 128) f32
    w2_cat = jnp.transpose(p["w2"], (2, 3, 1, 0)).reshape(4 * 128, 768)  # row=(kh*2+kw)*128+c
    w2s = (w2_cat * s2[None, :]).astype(compute_dtype)

    nc = p["wfc"].shape[0]
    ncp = max(128, ((nc + 127) // 128) * 128)                  # lane-dense classifier width
    wfc_p = jnp.zeros((768, ncp), jnp.float32).at[:, :nc].set(p["wfc"].T).astype(compute_dtype)
    bfc_p = jnp.zeros((1, ncp), jnp.float32).at[0, :nc].set(p["bfc"])

    pmask = make_pool_mask()                                   # (4, 64) f32
    if fuse_pool_conv1 is None:
        fuse_pool_conv1 = C <= 128                             # small-C regime

    out = dict(num_classes=nc, C=C, fused=bool(fuse_pool_conv1),
               w2s=w2s, b2=b2.reshape(1, 768).astype(jnp.float32),
               wfc_p=wfc_p, bfc_p=bfc_p)
    if fuse_pool_conv1:
        # wp[s*C + c, k*128 + j] = pool_mask[k, s] * w1[j, c] * s1[j]
        wp = (pmask.T[:, None, :, None] * w1s[None, :, None, :]).reshape(64 * C, 4 * 128)
        out["wp"] = wp.astype(compute_dtype)
        out["b1x4"] = jnp.tile(b1, 4).reshape(1, 512).astype(jnp.float32)
    else:
        out["pmask"] = pmask
        out["w1s"] = w1s.astype(compute_dtype)
        out["b1"] = b1.reshape(1, 128).astype(jnp.float32)
    return out


def reference_forward(x, p):
    """Pure-JAX replica of the PyTorch head (eval-mode BN) for verification."""
    eps = p["eps"]
    xr = jnp.maximum(x, 0.0)
    rows = []
    for oh in (0, 1):
        cols = []
        for ow in (0, 1):
            win = xr[:, :, 3 * oh:3 * oh + 5, 3 * ow:3 * ow + 5]
            cols.append(jnp.mean(win, axis=(2, 3)))
        rows.append(jnp.stack(cols, axis=-1))
    pooled = jnp.stack(rows, axis=-2)                            # (N, C, 2, 2)
    h = jnp.einsum('nchw,oc->nohw', pooled, p["w1"])             # conv1 1x1
    h = ((h - p["m1"][None, :, None, None])
         / jnp.sqrt(p["v1"] + eps)[None, :, None, None]
         * p["g1"][None, :, None, None] + p["be1"][None, :, None, None])
    h = jnp.maximum(h, 0.0)
    g = jnp.einsum('nchw,ochw->no', h, p["w2"])                  # conv2 2x2 (valid)
    g = ((g - p["m2"][None, :]) / jnp.sqrt(p["v2"] + eps)[None, :]
         * p["g2"][None, :] + p["be2"][None, :])
    g = jnp.maximum(g, 0.0)
    return g @ p["wfc"].T + p["bfc"][None, :]


if __name__ == "__main__":
    N, C, num_classes = 16, 32, 10
    key = jax.random.PRNGKey(0)
    kx, kp = jax.random.split(key)
    x = jax.random.normal(kx, (N, C, 8, 8), jnp.float32)

    torch_like = init_torch_params(kp, C, num_classes)
    ref = jax.block_until_ready(reference_forward(x, torch_like))

    # Fused (pool ⊗ conv1) path — the default for C <= 128.
    kp_f32 = pack_kernel_params(torch_like, compute_dtype=jnp.float32)
    out_f32 = jax.block_until_ready(auxiliary_head_cifar_nchw(x, kp_f32))
    assert out_f32.shape == (N, num_classes)
    np.testing.assert_allclose(np.asarray(out_f32), np.asarray(ref), rtol=5e-3, atol=5e-3)

    kp_bf16 = pack_kernel_params(torch_like, compute_dtype=jnp.bfloat16)
    out_bf16 = jax.block_until_ready(auxiliary_head_cifar_nchw(x, kp_bf16))
    np.testing.assert_allclose(np.asarray(out_bf16), np.asarray(ref), rtol=5e-2, atol=5e-2)

    # Wide-C path (conv1-first + MXU mask pooling), forced on the same small inputs.
    kp_f32_w = pack_kernel_params(torch_like, compute_dtype=jnp.float32, fuse_pool_conv1=False)
    out_f32_w = jax.block_until_ready(auxiliary_head_cifar_nchw(x, kp_f32_w))
    np.testing.assert_allclose(np.asarray(out_f32_w), np.asarray(ref), rtol=5e-3, atol=5e-3)

    kp_bf16_w = pack_kernel_params(torch_like, compute_dtype=jnp.bfloat16, fuse_pool_conv1=False)
    out_bf16_w = jax.block_until_ready(auxiliary_head_cifar_nchw(x, kp_bf16_w))
    np.testing.assert_allclose(np.asarray(out_bf16_w), np.asarray(ref), rtol=5e-2, atol=5e-2)

    print("KERNEL_OK")
</pallas_src>

<mosaic_0001>
module attributes {stable_mosaic.version = 11 : i64} {
  func.func @aux_head_fused_kernel(%arg0: i32, %arg1: memref<8x2048xf32, #tpu.memory_space<vmem>>, %arg2: memref<2048x512xf32, #tpu.memory_space<vmem>>, %arg3: memref<1x512xf32, #tpu.memory_space<vmem>>, %arg4: memref<512x768xf32, #tpu.memory_space<vmem>>, %arg5: memref<1x768xf32, #tpu.memory_space<vmem>>, %arg6: memref<768x128xf32, #tpu.memory_space<vmem>>, %arg7: memref<1x128xf32, #tpu.memory_space<vmem>>, %arg8: memref<8x128xf32, #tpu.memory_space<vmem>>) attributes {dimension_semantics = [#tpu.dimension_semantics<parallel>], iteration_bounds = array<i64: 2>, scalar_prefetch = 0 : i64, scratch_operands = 0 : i64, tpu.core_type = #tpu.core_type<tc>, window_params = [{transform_indices = @transform_0, window_bounds = array<i64: 8, 2048>}, {pipeline_mode = #tpu.pipeline_mode<synchronous>, transform_indices = @transform_1, window_bounds = array<i64: 2048, 512>}, {pipeline_mode = #tpu.pipeline_mode<synchronous>, transform_indices = @transform_2, window_bounds = array<i64: 1, 512>}, {pipeline_mode = #tpu.pipeline_mode<synchronous>, transform_indices = @transform_3, window_bounds = array<i64: 512, 768>}, {pipeline_mode = #tpu.pipeline_mode<synchronous>, transform_indices = @transform_4, window_bounds = array<i64: 1, 768>}, {pipeline_mode = #tpu.pipeline_mode<synchronous>, transform_indices = @transform_5, window_bounds = array<i64: 768, 128>}, {pipeline_mode = #tpu.pipeline_mode<synchronous>, transform_indices = @transform_6, window_bounds = array<i64: 1, 128>}, {transform_indices = @transform_7, window_bounds = array<i64: 8, 128>}]} {
    %c0 = arith.constant 0 : index
    %c0_0 = arith.constant 0 : index
    %0 = vector.load %arg1[%c0, %c0_0] : memref<8x2048xf32, #tpu.memory_space<vmem>>, vector<8x2048xf32>
    %cst = arith.constant 0.000000e+00 : f32
    %1 = vector.broadcast %cst : f32 to vector<8x2048xf32>
    %2 = arith.maximumf %0, %1 : vector<8x2048xf32>
    %c0_1 = arith.constant 0 : index
    %c0_2 = arith.constant 0 : index
    %3 = vector.load %arg2[%c0_1, %c0_2] : memref<2048x512xf32, #tpu.memory_space<vmem>>, vector<2048x512xf32>
    %cst_3 = arith.constant dense<0.000000e+00> : vector<8x512xf32>
    %4 = tpu.matmul %2, %3, %cst_3 {dimension_numbers = #tpu.dot_dimension_numbers<[1], [0], [0], [1], [0, 0, 1, 1], [], []>} : vector<8x2048xf32>, vector<2048x512xf32>, vector<8x512xf32> -> vector<8x512xf32>
    %c0_4 = arith.constant 0 : index
    %c0_5 = arith.constant 0 : index
    %5 = vector.load %arg3[%c0_4, %c0_5] : memref<1x512xf32, #tpu.memory_space<vmem>>, vector<1x512xf32>
    %6 = vector.broadcast %5 : vector<1x512xf32> to vector<8x512xf32>
    %7 = arith.addf %4, %6 : vector<8x512xf32>
    %cst_6 = arith.constant 0.000000e+00 : f32
    %8 = vector.broadcast %cst_6 : f32 to vector<8x512xf32>
    %9 = arith.maximumf %7, %8 : vector<8x512xf32>
    %c0_7 = arith.constant 0 : index
    %c0_8 = arith.constant 0 : index
    %10 = vector.load %arg4[%c0_7, %c0_8] : memref<512x768xf32, #tpu.memory_space<vmem>>, vector<512x768xf32>
    %cst_9 = arith.constant dense<0.000000e+00> : vector<8x768xf32>
    %11 = tpu.matmul %9, %10, %cst_9 {dimension_numbers = #tpu.dot_dimension_numbers<[1], [0], [0], [1], [0, 0, 1, 1], [], []>} : vector<8x512xf32>, vector<512x768xf32>, vector<8x768xf32> -> vector<8x768xf32>
    %c0_10 = arith.constant 0 : index
    %c0_11 = arith.constant 0 : index
    %12 = vector.load %arg5[%c0_10, %c0_11] : memref<1x768xf32, #tpu.memory_space<vmem>>, vector<1x768xf32>
    %13 = vector.broadcast %12 : vector<1x768xf32> to vector<8x768xf32>
    %14 = arith.addf %11, %13 : vector<8x768xf32>
    %cst_12 = arith.constant 0.000000e+00 : f32
    %15 = vector.broadcast %cst_12 : f32 to vector<8x768xf32>
    %16 = arith.maximumf %14, %15 : vector<8x768xf32>
    %c0_13 = arith.constant 0 : index
    %c0_14 = arith.constant 0 : index
    %17 = vector.load %arg6[%c0_13, %c0_14] : memref<768x128xf32, #tpu.memory_space<vmem>>, vector<768x128xf32>
    %cst_15 = arith.constant dense<0.000000e+00> : vector<8x128xf32>
    %18 = tpu.matmul %16, %17, %cst_15 {dimension_numbers = #tpu.dot_dimension_numbers<[1], [0], [0], [1], [0, 0, 1, 1], [], []>} : vector<8x768xf32>, vector<768x128xf32>, vector<8x128xf32> -> vector<8x128xf32>
    %c0_16 = arith.constant 0 : index
    %c0_17 = arith.constant 0 : index
    %19 = vector.load %arg7[%c0_16, %c0_17] : memref<1x128xf32, #tpu.memory_space<vmem>>, vector<1x128xf32>
    %20 = vector.broadcast %19 : vector<1x128xf32> to vector<8x128xf32>
    %21 = arith.addf %18, %20 : vector<8x128xf32>
    %c0_18 = arith.constant 0 : index
    %c0_19 = arith.constant 0 : index
    %22 = vector.load %arg8[%c0_18, %c0_19] : memref<8x128xf32, #tpu.memory_space<vmem>>, vector<8x128xf32>
    tpu.vector_store %arg8[%c0_18, %c0_19], %21 {strides = array<i32>} : memref<8x128xf32, #tpu.memory_space<vmem>>, vector<8x128xf32>,
    return
  }
  func.func @transform_0(%arg0: i32) -> (i32, i32) {
    %c0_i32 = arith.constant 0 : i32
    %c0_i32_0 = arith.constant 0 : i32
    return %arg0, %c0_i32 : i32, i32
  }
  func.func @transform_1(%arg0: i32) -> (i32, i32) {
    %c0_i32 = arith.constant 0 : i32
    %c0_i32_0 = arith.constant 0 : i32
    %c0_i32_1 = arith.constant 0 : i32
    return %c0_i32, %c0_i32_0 : i32, i32
  }
  func.func @transform_2(%arg0: i32) -> (i32, i32) {
    %c0_i32 = arith.constant 0 : i32
    %c0_i32_0 = arith.constant 0 : i32
    %c0_i32_1 = arith.constant 0 : i32
    return %c0_i32, %c0_i32_0 : i32, i32
  }
  func.func @transform_3(%arg0: i32) -> (i32, i32) {
    %c0_i32 = arith.constant 0 : i32
    %c0_i32_0 = arith.constant 0 : i32
    %c0_i32_1 = arith.constant 0 : i32
    return %c0_i32, %c0_i32_0 : i32, i32
  }
  func.func @transform_4(%arg0: i32) -> (i32, i32) {
    %c0_i32 = arith.constant 0 : i32
    %c0_i32_0 = arith.constant 0 : i32
    %c0_i32_1 = arith.constant 0 : i32
    return %c0_i32, %c0_i32_0 : i32, i32
  }
  func.func @transform_5(%arg0: i32) -> (i32, i32) {
    %c0_i32 = arith.constant 0 : i32
    %c0_i32_0 = arith.constant 0 : i32
    %c0_i32_1 = arith.constant 0 : i32
    return %c0_i32, %c0_i32_0 : i32, i32
  }
  func.func @transform_6(%arg0: i32) -> (i32, i32) {
    %c0_i32 = arith.constant 0 : i32
    %c0_i32_0 = arith.constant 0 : i32
    %c0_i32_1 = arith.constant 0 : i32
    return %c0_i32, %c0_i32_0 : i32, i32
  }
  func.func @transform_7(%arg0: i32) -> (i32, i32) {
    %c0_i32 = arith.constant 0 : i32
    %c0_i32_0 = arith.constant 0 : i32
    return %arg0, %c0_i32 : i32, i32
  }
}

</mosaic_0001>

<bundles_post_ra>
// kernel: tpu_custom_call.1
= control target key start
LH: loop header
LB: loop body
LE: loop exit
PB: predicated region body
PF: predicated region fallthrough
CT: control target
= control target key end

     0   :  { %s4908_s0 = inlined_call_operand.hbm [shape: f32[16,2048], index: 0, kind: input, shape index: {}]   ;;  %s4909_s1 = inlined_call_operand.hbm [shape: f32[2048,512], index: 1, kind: input, shape index: {}]   ;;  %s4910_s2 = inlined_call_operand.hbm [shape: f32[1,512], index: 2, kind: input, shape index: {}]   ;;  %s4911_s3 = inlined_call_operand.hbm [shape: f32[512,768], index: 3, kind: input, shape index: {}]   ;;  %s4912_s4 = inlined_call_operand.hbm [shape: f32[1,768], index: 4, kind: input, shape index: {}]   ;;  %s4913_s5 = inlined_call_operand.hbm [shape: f32[768,128], index: 5, kind: input, shape index: {}]   ;;  %s4914_s6 = inlined_call_operand.hbm [shape: f32[1,128], index: 6, kind: input, shape index: {}]   ;;  %s4915_s7 = inlined_call_operand.hbm [shape: f32[16,128], index: 7, kind: output, shape index: {}]  }
   0x1   :  { %4916 = sst [smem:[#allocation20_spill]] %s4909_s1 }
   0x2   :  { %4917 = sst [smem:[#allocation21_spill]] %s4910_s2 }
   0x3   :  { %12 = vsyncpa [#allocation3], 0 }
   0x4   :  { %14 = vsyncpa [#allocation3 + $0x1], 0 }
   0x5   :  { %15 = vsyncpa [#allocation6], 0 }
   0x6   :  { %16 = vsyncpa [#allocation9], 0 }
   0x7   :  { %17 = vsyncpa [#allocation12], 0 }
   0x8   :  { %18 = vsyncpa [#allocation4], 0 }
   0x9   :  { %20 = vsyncpa [#allocation4 + $0x1], 0  ;;  %s4470_s24 = smov 0   ;;  %s4472_s25 = smov 0  }
   0xa   :  { %s4474_s26 = smov 0   ;;  %s4476_s27 = smov 0  }
   0xb LB: > { %s4918_s1 = sld [smem:[#allocation20_spill]]  ;;  %s4494_s8 = sadd.s32 4294967295, %s4416_s27   ;;  %s4416_s27 = sphi %s4476_s27, %s4931_s27   ;;  %s4412_s26 = sphi %s4474_s26, %s4930_s26   ;;  %s4408_s25 = sphi %s4472_s25, %s4929_s25   ;;  %s4404_s24 = sphi %s4470_s24, %s4928_s24  }
   0xc   : > { %p3989_p0 = scmp.ge.s32.totalorder %s4416_s27, 1  ;;  %p47_p1 = scmp.eq.s32.totalorder %s4494_s8, 0 }
   0xd   : > { %p209_p2 = scmp.lt.s32.totalorder %s4416_s27, 3  ;;  %s4418_s10 = smov [#allocation5]  }
   0xe   : > { %s222_s11 = sshll.u32 %s4418_s10, 4  ;;  %s246_s14 = sshll.u32 %s4911_s3, 4  ;;  %s223_s11 = int_to_ptr.vmem [resolvable:$true] %s222_s11  ;;  %s247_s14 = int_to_ptr.hbm [resolvable:$true] %s246_s14 }
   0xf   : > { %p4499_p3 = pnand %p3989_p0, %p209_p2  ;;  %s4419_s16 = smov [#allocation8]  }
  0x10   : > { %s248_s17 = sshll.u32 %s4419_s16, 4  ;;  %s4420_s18 = smov 512   ;;  %s249_s17 = int_to_ptr.vmem [resolvable:$true] %s248_s17 }
  0x11   : > { %s220_s30 = sshll.u32 %s4918_s1, 4  ;;  %p4042_p4 = pneg %p4499_p3  ;;  %s221_s30 = int_to_ptr.hbm [resolvable:$true] %s220_s30 }
  0x12   : > { %s4421_s19 = smov 32   ;;  %s4422_s20 = smov 768  }
  0x13   : > { %p4511_p6 = pnand %p4042_p4, %p47_p1  ;;  %s4423_s21 = smov 48  }
  0x14   : > { %s272_s28 = sshll.u32 %s4913_s5, 4  ;;  %s4424_s29 = smov [#allocation11]   ;;  %s273_s28 = int_to_ptr.hbm [resolvable:$true] %s272_s28 }
  0x15   : > { %4045 = dma.hbm_to_vmem [thread:$0]  (!%p4511_p6), %s221_s30, 131072, %s223_s11, [#allocation6], %s4420_s18, %s4420_s18, %s4421_s19  }
  0x16   : > { %4051 = dma.hbm_to_vmem [thread:$0]  (!%p4511_p6), %s247_s14, 49152, %s249_s17, [#allocation9], %s4422_s20, %s4422_s20, %s4423_s21  }
  0x17   : > { %s274_s10 = sshll.u32 %s4424_s29, 4  ;;  %s4921_s2 = sld [smem:[#allocation21_spill]]  ;;  %s275_s10 = int_to_ptr.vmem [resolvable:$true] %s274_s10 }
  0x18   : > { %s4425_s30 = smov 128   ;;  %s4426_s11 = smov 8  }
  0x19   : > { %4057 = dma.hbm_to_vmem [thread:$0]  (!%p4511_p6), %s273_s28, 12288, %s275_s10, [#allocation12], %s4425_s30, %s4425_s30, %s4426_s11  }
  0x1a   : > { %s4427_s14 = smov [#allocation7]   ;;  %s261_s20 = sshll.u32 %s4912_s4, 4  ;;  %s262_s20 = int_to_ptr.hbm [resolvable:$true] %s261_s20 }
  0x1b   : > { %s237_s17 = sshll.u32 %s4427_s14, 4  ;;  %s287_s23 = sshll.u32 %s4914_s6, 4  ;;  %s238_s17 = int_to_ptr.vmem [resolvable:$true] %s237_s17  ;;  %s288_s23 = int_to_ptr.hbm [resolvable:$true] %s287_s23 }
  0x1c   : > { %s4428_s28 = smov [#allocation10]   ;;  %s4429_s10 = smov [#allocation13]  }
  0x1d   : > { %s235_s16 = sshll.u32 %s4921_s2, 4  ;;  %s263_s29 = sshll.u32 %s4428_s28, 4  ;;  %s236_s16 = int_to_ptr.hbm [resolvable:$true] %s235_s16  ;;  %s264_s29 = int_to_ptr.vmem [resolvable:$true] %s263_s29 }
  0x1e   : > { %4048 = dma.hbm_to_vmem [thread:$0]  (!%p4511_p6), %s236_s16, 64, %s238_s17, [#allocation6]  }
  0x1f   : > { %4054 = dma.hbm_to_vmem [thread:$0]  (!%p4511_p6), %s262_s20, 96, %s264_s29, [#allocation9]  }
  0x20   : > { %s289_s12 = sshll.u32 %s4429_s10, 4  ;;  %s3988_s13 = sadd.s32 4294967294, %s4416_s27   ;;  %s290_s12 = int_to_ptr.vmem [resolvable:$true] %s289_s12 }
  0x21   : > { %4060 = dma.hbm_to_vmem [thread:$0]  (!%p4511_p6), %s288_s23, 16, %s290_s12, [#allocation12]  }
  0x22   : > { %s4541_s16 = sadd.s32 1, %s4416_s27   ;;  %s33_s11 = sadd.s32 1, %s4412_s26 }
  0x23   : > { %s30_s30 = ssub.s32 %s4416_s27, %s4541_s16  ;;  %p40_p8 = scmp.ne.s32.totalorder %s4412_s26, %s4408_s25 }
  0x24   : > { %p31_p7 = scmp.eq.s32.totalorder %s30_s30, 0  ;;  %p41_p9 = scmp.eq.s32.totalorder %s4416_s27, 0 }
  0x25   : > { %p46_p10 = scmp.ne.s32.totalorder %s4408_s25, %s4404_s24  ;;  %p196_p13 = scmp.eq.s32.totalorder %s4494_s8, 1 }
  0x26   : > { %s4552_s14 = scalar_select %p31_p7, %s4412_s26, %s33_s11  }
  0x27   : > { %p4554_p11 = por %p41_p9, %p40_p8  ;;  %p4560_p12 = por %p47_p1, %p46_p10 }
  0x28   : > { %p202_p0 = scmp.eq.s32.totalorder %s3988_s13, 1  ;;  %p4075_p2 = scmp.lt.s32.totalorder %s4416_s27, 2 }
  0x29   : > { %s300_s18 = sand.u32 1, %s4412_s26   ;;  %p4567_p4 = por %p196_p13, %p40_p8 }
  0x2a   : > { %p4571_p6 = por %p202_p0, %p46_p10  ;;  %s3997_s21 = sshll.u32 %s300_s18, 7 }
  0x2b   : > { %s4013_s22 = sshll.u32 %s4416_s27, 7  ;;  %s304_s10 = scalar_lea.vmem [#allocation2], %s3997_s21 }
  0x2c   : > { %s309_s29 = scalar_lea.hbm %s4908_s0, %s4013_s22  ;;  %s313_s12 = sshll.u32 %s304_s10, 4  ;;  %s314_s12 = int_to_ptr.vmem [resolvable:$true] %s313_s12 }
  0x2d   : > { %s311_s30 = sshll.u32 %s309_s29, 4  ;;  %p4581_p7 = pnand %p4075_p2, %p4554_p11  ;;  %s312_s30 = int_to_ptr.hbm [resolvable:$true] %s311_s30 }
  0x2e   : > { %s301_s11 = scalar_lea.sflag [#allocation3], %s300_s18  ;;  %s4308_s1 = sshra.s32 %s312_s30, 4  ;;  %s4309_s1 = int_to_ptr.hbm [resolvable:$true] %s4308_s1 }
  0x2f   : > { %s4310_s2 = scalar_lea.hbm %s4309_s1, 128  ;;  %p4312_p9 = pneg %p4581_p7 }
  0x30   : > { %p4311_p8 = scmp.ne.s32.totalorder %s4309_s1, %s4310_s2  ;;  %s4315_s23 = scalar_lea.hbm %s4908_s0, 256 }
  0x31   : > { %p4316_p11 = scmp.lt.s32.totalorder %s4309_s1, %s4908_s0  ;;  %p4317_p0 = scmp.lt.s32.totalorder %s4315_s23, %s4310_s2 }
  0x32   : > { %p4313_p10 = pnand %p4312_p9, %p4311_p8 }
  0x33   : > { %p4318_p2 = por %p4317_p0, %p4316_p11 }
  0x34   : > { %p4314_p13 = pneg %p4313_p10 }
  0x36   : > { %p4319_p5 = pnand %p4318_p2, %p4314_p13 }
  0x38   : > { %4322 = shalt.err (!%p4319_p5)
}
  0x39   : > { %4064 = dma.hbm_to_vmem [thread:$0]  (!%p4581_p7), %s312_s30, 2048, %s314_s12, %s301_s11  }
  0x3a   : > { %322 = sbr.rel (%p4499_p3) target bundleno = 1500 (0x5dc), region = 48  ;;  %s4598_s18 = sand.u32 (!%p4499_p3), 1, %s4408_s25  }
  0x3b   : > { %s4001_s29 = sshll.u32 (!%p4499_p3), %s4598_s18, 7  ;;  %s325_s10 = scalar_lea.sflag (!%p4499_p3), [#allocation3], %s4598_s18 }
  0x3c   : > { %s4602_s21 = scalar_lea.vmem (!%p4499_p3), [#allocation2], %s4001_s29 }
  0x3f   : > { %4383 = dma.done.wait (%p4560_p12), %s325_s10, 2048  }
  0x40   : > { %4385 = vsyncadd (%p4560_p12), %s325_s10, 4294965248 }
  0x41   : > { %4387 = dma.done.wait (%p47_p1), [#allocation6], 131136  }
  0x42   : > { %4389 = vsyncadd (%p47_p1), [#allocation6], 4294836160 }
  0x43   : > { %4391 = dma.done.wait (%p47_p1), [#allocation9], 49248  }
  0x44   : > { %4393 = vsyncadd (%p47_p1), [#allocation9], 4294918048 }
  0x45   : > { %4395 = dma.done.wait (%p47_p1), [#allocation12], 12304  }
  0x46   : > { %4397 = vsyncadd (%p47_p1), [#allocation12], 4294954992  ;;  %v482_v0 = vld [vmem:[#allocation5 + $0x1e0] sm:$0xff]  ;;  %s4008_s1 = sshll.u32 %s4598_s18, 3  ;;  %s4010_s2 = sshll.u32 %s4494_s8, 3 }
  0x47   : > { %v546_v1 = vld [vmem:[#allocation5 + $0x3e0] sm:$0xff]  ;;  %1456 = vmatpush.msra.mxu0 %v482_v0  ;;  %s3856_s12 = scalar_lea.hbm %s4915_s7, %s4010_s2  ;;  %s389_s30 = scalar_lea.vmem [#allocation14], %s4008_s1 }
  0x48   : > { %v610_v2 = vld [vmem:[#allocation5 + $0x5e0] sm:$0xff]  ;;  %1476 = vmatpush.msra.mxu1 %v546_v1  ;;  %s3858_s13 = sshll.u32 %s389_s30, 4  ;;  %s3860_s11 = sshll.u32 %s3856_s12, 4  ;;  %s3859_s13 = int_to_ptr.vmem [resolvable:$true] %s3858_s13  ;;  %s3861_s11 = int_to_ptr.hbm [resolvable:$true] %s3860_s11 }
  0x49   : > { %v478_v3 = vld [vmem:[#allocation5 + $0x1c0] sm:$0xff]  ;;  %1496 = vmatpush.msra.mxu2 %v610_v2  ;;  %s3846_s8 = scalar_lea.sflag [#allocation4], %s4598_s18  ;;  %s4352_s22 = sshra.s32 %s3861_s11, 4  ;;  %s4353_s22 = int_to_ptr.hbm [resolvable:$true] %s4352_s22 }
  0x4a   : > { %v542_v4 = vld [vmem:[#allocation5 + $0x3c0] sm:$0xff]  ;;  %1457 = vmatpush.msra.mxu0 %v478_v3  ;;  %s4354_s23 = scalar_lea.hbm %s4353_s22, 8  ;;  %s4358_s29 = scalar_lea.hbm %s4915_s7, 16 }
  0x4b   : > { %v606_v5 = vld [vmem:[#allocation5 + $0x5c0] sm:$0xff]  ;;  %1477 = vmatpush.msra.mxu1 %v542_v4  ;;  %p4355_p1 = scmp.ne.s32.totalorder %s4353_s22, %s4354_s23  ;;  %p4359_p12 = scmp.lt.s32.totalorder %s4353_s22, %s4915_s7 }
  0x4c   : > { %v674_v6 = vld [vmem:[#allocation5 + $0x7e0] sm:$0xff]  ;;  %1497 = vmatpush.msra.mxu2 %v606_v5  ;;  %p4360_p7 = scmp.lt.s32.totalorder %s4358_s29, %s4354_s23 }
  0x4d   : > { %v474_v7 = vld [vmem:[#allocation5 + $0x1a0] sm:$0xff]  ;;  %1516 = vmatpush.msra.mxu3 %v674_v6  ;;  %p4356_p3 = pnand %p4355_p1, %p4567_p4 }
  0x4e   : > { %v538_v8 = vld [vmem:[#allocation5 + $0x3a0] sm:$0xff]  ;;  %1458 = vmatpush.msra.mxu0 %v474_v7  ;;  %p4361_p8 = por %p4360_p7, %p4359_p12 }
  0x4f   : > { %v602_v9 = vld [vmem:[#allocation5 + $0x5a0] sm:$0xff]  ;;  %1478 = vmatpush.msra.mxu1 %v538_v8  ;;  %p4357_p5 = pneg %p4356_p3 }
  0x50   : > { %v670_v10 = vld [vmem:[#allocation5 + $0x7c0] sm:$0xff]  ;;  %1498 = vmatpush.msra.mxu2 %v602_v9 }
  0x51   : > { %v470_v11 = vld [vmem:[#allocation5 + $0x180] sm:$0xff]  ;;  %1517 = vmatpush.msra.mxu3 %v670_v10  ;;  %p4362_p9 = pnand %p4361_p8, %p4357_p5 }
  0x52   : > { %v534_v12 = vld [vmem:[#allocation5 + $0x380] sm:$0xff]  ;;  %1459 = vmatpush.msra.mxu0 %v470_v11 }
  0x53   : > { %v598_v13 = vld [vmem:[#allocation5 + $0x580] sm:$0xff]  ;;  %1479 = vmatpush.msra.mxu1 %v534_v12 }
  0x54   : > { %v666_v14 = vld [vmem:[#allocation5 + $0x7a0] sm:$0xff]  ;;  %1499 = vmatpush.msra.mxu2 %v598_v13 }
  0x55   : > { %v466_v15 = vld [vmem:[#allocation5 + $0x160] sm:$0xff]  ;;  %1518 = vmatpush.msra.mxu3 %v666_v14 }
  0x56   : > { %v530_v16 = vld [vmem:[#allocation5 + $0x360] sm:$0xff]  ;;  %1460 = vmatpush.msra.mxu0 %v466_v15 }
  0x57   : > { %v594_v17 = vld [vmem:[#allocation5 + $0x560] sm:$0xff]  ;;  %1480 = vmatpush.msra.mxu1 %v530_v16 }
  0x58   : > { %v662_v18 = vld [vmem:[#allocation5 + $0x780] sm:$0xff]  ;;  %1500 = vmatpush.msra.mxu2 %v594_v17 }
  0x59   : > { %v462_v19 = vld [vmem:[#allocation5 + $0x140] sm:$0xff]  ;;  %1519 = vmatpush.msra.mxu3 %v662_v18 }
  0x5a   : > { %v526_v20 = vld [vmem:[#allocation5 + $0x340] sm:$0xff]  ;;  %1461 = vmatpush.msra.mxu0 %v462_v19 }
  0x5b   : > { %v590_v21 = vld [vmem:[#allocation5 + $0x540] sm:$0xff]  ;;  %1481 = vmatpush.msra.mxu1 %v526_v20 }
  0x5c   : > { %v658_v22 = vld [vmem:[#allocation5 + $0x760] sm:$0xff]  ;;  %1501 = vmatpush.msra.mxu2 %v590_v21 }
  0x5d   : > { %v458_v23 = vld [vmem:[#allocation5 + $0x120] sm:$0xff]  ;;  %1520 = vmatpush.msra.mxu3 %v658_v22 }
  0x5e   : > { %v522_v24 = vld [vmem:[#allocation5 + $0x320] sm:$0xff]  ;;  %1462 = vmatpush.msra.mxu0 %v458_v23 }
  0x5f   : > { %v586_v25 = vld [vmem:[#allocation5 + $0x520] sm:$0xff]  ;;  %1482 = vmatpush.msra.mxu1 %v522_v24 }
  0x60   : > { %v654_v26 = vld [vmem:[#allocation5 + $0x740] sm:$0xff]  ;;  %1502 = vmatpush.msra.mxu2 %v586_v25 }
  0x61   : > { %v454_v27 = vld [vmem:[#allocation5 + $0x100] sm:$0xff]  ;;  %1521 = vmatpush.msra.mxu3 %v654_v26 }
  0x62   : > { %v518_v28 = vld [vmem:[#allocation5 + $0x300] sm:$0xff]  ;;  %1463 = vmatpush.msra.mxu0 %v454_v27 }
  0x63   : > { %v582_v29 = vld [vmem:[#allocation5 + $0x500] sm:$0xff]  ;;  %1483 = vmatpush.msra.mxu1 %v518_v28 }
  0x64   : > { %v650_v30 = vld [vmem:[#allocation5 + $0x720] sm:$0xff]  ;;  %1503 = vmatpush.msra.mxu2 %v582_v29 }
  0x65   : > { %v450_v31 = vld [vmem:[#allocation5 + $0xe0] sm:$0xff]  ;;  %1522 = vmatpush.msra.mxu3 %v650_v30 }
  0x66   : > { %v514_v32 = vld [vmem:[#allocation5 + $0x2e0] sm:$0xff]  ;;  %1464 = vmatpush.msra.mxu0 %v450_v31 }
  0x67   : > { %v578_v33 = vld [vmem:[#allocation5 + $0x4e0] sm:$0xff]  ;;  %1484 = vmatpush.msra.mxu1 %v514_v32 }
  0x68   : > { %v646_v34 = vld [vmem:[#allocation5 + $0x700] sm:$0xff]  ;;  %1504 = vmatpush.msra.mxu2 %v578_v33 }
  0x69   : > { %v446_v35 = vld [vmem:[#allocation5 + $0xc0] sm:$0xff]  ;;  %1523 = vmatpush.msra.mxu3 %v646_v34 }
  0x6a   : > { %v510_v36 = vld [vmem:[#allocation5 + $0x2c0] sm:$0xff]  ;;  %1465 = vmatpush.msra.mxu0 %v446_v35 }
  0x6b   : > { %v574_v37 = vld [vmem:[#allocation5 + $0x4c0] sm:$0xff]  ;;  %1485 = vmatpush.msra.mxu1 %v510_v36 }
  0x6c   : > { %v642_v38 = vld [vmem:[#allocation5 + $0x6e0] sm:$0xff]  ;;  %1505 = vmatpush.msra.mxu2 %v574_v37 }
  0x6d   : > { %v442_v39 = vld [vmem:[#allocation5 + $0xa0] sm:$0xff]  ;;  %1524 = vmatpush.msra.mxu3 %v642_v38 }
  0x6e   : > { %v506_v40 = vld [vmem:[#allocation5 + $0x2a0] sm:$0xff]  ;;  %1466 = vmatpush.msra.mxu0 %v442_v39 }
  0x6f   : > { %v570_v41 = vld [vmem:[#allocation5 + $0x4a0] sm:$0xff]  ;;  %1486 = vmatpush.msra.mxu1 %v506_v40 }
  0x70   : > { %v638_v42 = vld [vmem:[#allocation5 + $0x6c0] sm:$0xff]  ;;  %1506 = vmatpush.msra.mxu2 %v570_v41 }
  0x71   : > { %v438_v43 = vld [vmem:[#allocation5 + $0x80] sm:$0xff]  ;;  %1525 = vmatpush.msra.mxu3 %v638_v42 }
  0x72   : > { %v502_v44 = vld [vmem:[#allocation5 + $0x280] sm:$0xff]  ;;  %1467 = vmatpush.msra.mxu0 %v438_v43 }
  0x73   : > { %v566_v45 = vld [vmem:[#allocation5 + $0x480] sm:$0xff]  ;;  %1487 = vmatpush.msra.mxu1 %v502_v44 }
  0x74   : > { %v634_v46 = vld [vmem:[#allocation5 + $0x6a0] sm:$0xff]  ;;  %1507 = vmatpush.msra.mxu2 %v566_v45 }
  0x75   : > { %v434_v47 = vld [vmem:[#allocation5 + $0x60] sm:$0xff]  ;;  %1526 = vmatpush.msra.mxu3 %v634_v46 }
  0x76   : > { %v498_v48 = vld [vmem:[#allocation5 + $0x260] sm:$0xff]  ;;  %1468 = vmatpush.msra.mxu0 %v434_v47 }
  0x77   : > { %v562_v49 = vld [vmem:[#allocation5 + $0x460] sm:$0xff]  ;;  %1488 = vmatpush.msra.mxu1 %v498_v48 }
  0x78   : > { %v630_v50 = vld [vmem:[#allocation5 + $0x680] sm:$0xff]  ;;  %1508 = vmatpush.msra.mxu2 %v562_v49 }
  0x79   : > { %v430_v51 = vld [vmem:[#allocation5 + $0x40] sm:$0xff]  ;;  %1527 = vmatpush.msra.mxu3 %v630_v50 }
  0x7a   : > { %v494_v52 = vld [vmem:[#allocation5 + $0x240] sm:$0xff]  ;;  %1469 = vmatpush.msra.mxu0 %v430_v51 }
  0x7b   : > { %v558_v53 = vld [vmem:[#allocation5 + $0x440] sm:$0xff]  ;;  %1489 = vmatpush.msra.mxu1 %v494_v52 }
  0x7c   : > { %v626_v54 = vld [vmem:[#allocation5 + $0x660] sm:$0xff]  ;;  %1509 = vmatpush.msra.mxu2 %v558_v53 }
  0x7d   : > { %v426_v55 = vld [vmem:[#allocation5 + $0x20] sm:$0xff]  ;;  %1528 = vmatpush.msra.mxu3 %v626_v54 }
  0x7e   : > { %v490_v56 = vld [vmem:[#allocation5 + $0x220] sm:$0xff]  ;;  %1470 = vmatpush.msra.mxu0 %v426_v55 }
  0x7f   : > { %v554_v57 = vld [vmem:[#allocation5 + $0x420] sm:$0xff]  ;;  %1490 = vmatpush.msra.mxu1 %v490_v56 }
  0x80   : > { %v622_v58 = vld [vmem:[#allocation5 + $0x640] sm:$0xff]  ;;  %1510 = vmatpush.msra.mxu2 %v554_v57 }
  0x81   : > { %v422_v59 = vld [vmem:[#allocation5] sm:$0xff]  ;;  %1529 = vmatpush.msra.mxu3 %v622_v58  ;;  %v391_v58 = vld [vmem:[%s4602_s21 + $0x8] sm:$0xff] }
  0x82   : > { %v486_v60 = vld [vmem:[#allocation5 + $0x200] sm:$0xff]  ;;  %1471 = vmatpush.msra.mxu0 %v422_v59 }
  0x83   : > { %v550_v61 = vld [vmem:[#allocation5 + $0x400] sm:$0xff]  ;;  %1491 = vmatpush.msra.mxu1 %v486_v60 }
  0x84   : > { %v618_v62 = vld [vmem:[#allocation5 + $0x620] sm:$0xff]  ;;  %1511 = vmatpush.msra.mxu2 %v550_v61  ;;  %v392_v61 = vld [vmem:[%s4602_s21 + $0x10] sm:$0xff] }
  0x85   : > { %v738_v63 = vld [vmem:[#allocation5 + $0x9e0] sm:$0xff]  ;;  %1530 = vmatpush.msra.mxu3 %v618_v62 }
  0x86   : > { %v802_v0 = vld [vmem:[#allocation5 + $0xbe0] sm:$0xff]  ;;  %1536 = vmatpush.msrb.mxu0 %v738_v63 }
  0x87   : > { %v866_v1 = vld [vmem:[#allocation5 + $0xde0] sm:$0xff]  ;;  %1556 = vmatpush.msrb.mxu1 %v802_v0 }
  0x88   : > { %v614_v2 = vld [vmem:[#allocation5 + $0x600] sm:$0xff]  ;;  %1576 = vmatpush.msrb.mxu2 %v866_v1 }
  0x89   : > { %v734_v3 = vld [vmem:[#allocation5 + $0x9c0] sm:$0xff]  ;;  %1531 = vmatpush.msra.mxu3 %v614_v2 }
  0x8a   : > { %v798_v4 = vld [vmem:[#allocation5 + $0xbc0] sm:$0xff]  ;;  %1537 = vmatpush.msrb.mxu0 %v734_v3  ;;  %v4625_v3 = vmax.f32 %v391_v58, 0.0 }
  0x8b   : > { %v862_v5 = vld [vmem:[#allocation5 + $0xdc0] sm:$0xff]  ;;  %1557 = vmatpush.msrb.mxu1 %v798_v4  ;;  %v4627_v4 = vmax.f32 %v392_v61, 0.0 }
  0x8c   : > { %v930_v6 = vld [vmem:[#allocation5 + $0xfe0] sm:$0xff]  ;;  %1577 = vmatpush.msrb.mxu2 %v862_v5  ;;  %v393_v5 = vld [vmem:[%s4602_s21 + $0x18] sm:$0xff]  ;;  %1492 = vmatmul.f32.vlgmr.msra.gmra.mxu1 %v4625_v3 }
  0x8d   : > { %v730_v7 = vld [vmem:[#allocation5 + $0x9a0] sm:$0xff]  ;;  %1596 = vmatpush.msrb.mxu3 %v930_v6  ;;  %1512 = vmatmul.f32.vlgmr.msra.gmra.mxu2 %v4627_v4 }
  0x8e   : > { %v794_v8 = vld [vmem:[#allocation5 + $0xba0] sm:$0xff]  ;;  %1538 = vmatpush.msrb.mxu0 %v730_v7 }
  0x8f   : > { %v858_v9 = vld [vmem:[#allocation5 + $0xda0] sm:$0xff]  ;;  %1558 = vmatpush.msrb.mxu1 %v794_v8 }
  0x90   : > { %v926_v10 = vld [vmem:[#allocation5 + $0xfc0] sm:$0xff]  ;;  %1578 = vmatpush.msrb.mxu2 %v858_v9 }
  0x91   : > { %v726_v11 = vld [vmem:[#allocation5 + $0x980] sm:$0xff]  ;;  %1597 = vmatpush.msrb.mxu3 %v926_v10  ;;  %v4632_v10 = vmax.f32 %v393_v5, 0.0 }
  0x92   : > { %v790_v12 = vld [vmem:[#allocation5 + $0xb80] sm:$0xff]  ;;  %1539 = vmatpush.msrb.mxu0 %v726_v11 }
  0x93   : > { %v854_v13 = vld [vmem:[#allocation5 + $0xd80] sm:$0xff]  ;;  %1559 = vmatpush.msrb.mxu1 %v790_v12  ;;  %1532 = vmatmul.f32.vlgmr.msra.gmra.mxu3 %v4632_v10 }
  0x94   : > { %v922_v14 = vld [vmem:[#allocation5 + $0xfa0] sm:$0xff]  ;;  %1579 = vmatpush.msrb.mxu2 %v854_v13 }
  0x95   : > { %v722_v15 = vld [vmem:[#allocation5 + $0x960] sm:$0xff]  ;;  %1598 = vmatpush.msrb.mxu3 %v922_v14 }
  0x96   : > { %v786_v16 = vld [vmem:[#allocation5 + $0xb60] sm:$0xff]  ;;  %1540 = vmatpush.msrb.mxu0 %v722_v15 }
  0x97   : > { %v850_v17 = vld [vmem:[#allocation5 + $0xd60] sm:$0xff]  ;;  %1560 = vmatpush.msrb.mxu1 %v786_v16 }
  0x98   : > { %v918_v18 = vld [vmem:[#allocation5 + $0xf80] sm:$0xff]  ;;  %1580 = vmatpush.msrb.mxu2 %v850_v17  ;;  %v396_v17 = vld [vmem:[%s4602_s21 + $0x30] sm:$0xff] }
  0x99   : > { %v718_v19 = vld [vmem:[#allocation5 + $0x940] sm:$0xff]  ;;  %1599 = vmatpush.msrb.mxu3 %v918_v18 }
  0x9a   : > { %v782_v20 = vld [vmem:[#allocation5 + $0xb40] sm:$0xff]  ;;  %1541 = vmatpush.msrb.mxu0 %v718_v19 }
  0x9b   : > { %v846_v21 = vld [vmem:[#allocation5 + $0xd40] sm:$0xff]  ;;  %1561 = vmatpush.msrb.mxu1 %v782_v20 }
  0x9c   : > { %v914_v22 = vld [vmem:[#allocation5 + $0xf60] sm:$0xff]  ;;  %1581 = vmatpush.msrb.mxu2 %v846_v21 }
  0x9d   : > { %v714_v23 = vld [vmem:[#allocation5 + $0x920] sm:$0xff]  ;;  %1600 = vmatpush.msrb.mxu3 %v914_v22 }
  0x9e   : > { %v778_v24 = vld [vmem:[#allocation5 + $0xb20] sm:$0xff]  ;;  %1542 = vmatpush.msrb.mxu0 %v714_v23 }
  0x9f   : > { %v842_v25 = vld [vmem:[#allocation5 + $0xd20] sm:$0xff]  ;;  %1562 = vmatpush.msrb.mxu1 %v778_v24 }
  0xa0   : > { %v910_v26 = vld [vmem:[#allocation5 + $0xf40] sm:$0xff]  ;;  %1582 = vmatpush.msrb.mxu2 %v842_v25  ;;  %v4638_v25 = vmax.f32 %v396_v17, 0.0 }
  0xa1   : > { %v710_v27 = vld [vmem:[#allocation5 + $0x900] sm:$0xff]  ;;  %1601 = vmatpush.msrb.mxu3 %v910_v26  ;;  %v397_v26 = vld [vmem:[%s4602_s21 + $0x38] sm:$0xff] }
  0xa2   : > { %v774_v28 = vld [vmem:[#allocation5 + $0xb00] sm:$0xff]  ;;  %1543 = vmatpush.msrb.mxu0 %v710_v27 }
  0xa3   : > { %v838_v29 = vld [vmem:[#allocation5 + $0xd00] sm:$0xff]  ;;  %1563 = vmatpush.msrb.mxu1 %v774_v28 }
  0xa4   : > { %v906_v30 = vld [vmem:[#allocation5 + $0xf20] sm:$0xff]  ;;  %1583 = vmatpush.msrb.mxu2 %v838_v29 }
  0xa5   : > { %v706_v31 = vld [vmem:[#allocation5 + $0x8e0] sm:$0xff]  ;;  %1602 = vmatpush.msrb.mxu3 %v906_v30 }
  0xa6   : > { %v770_v32 = vld [vmem:[#allocation5 + $0xae0] sm:$0xff]  ;;  %1544 = vmatpush.msrb.mxu0 %v706_v31  ;;  %v395_v31 = vld [vmem:[%s4602_s21 + $0x28] sm:$0xff] }
  0xa7   : > { %v834_v33 = vld [vmem:[#allocation5 + $0xce0] sm:$0xff]  ;;  %1564 = vmatpush.msrb.mxu1 %v770_v32 }
  0xa8   : > { %v902_v34 = vld [vmem:[#allocation5 + $0xf00] sm:$0xff]  ;;  %1584 = vmatpush.msrb.mxu2 %v834_v33  ;;  %v4644_v33 = vmax.f32 %v397_v26, 0.0 }
  0xa9   : > { %v702_v35 = vld [vmem:[#allocation5 + $0x8c0] sm:$0xff]  ;;  %1603 = vmatpush.msrb.mxu3 %v902_v34 }
  0xaa   : > { %v766_v36 = vld [vmem:[#allocation5 + $0xac0] sm:$0xff]  ;;  %1545 = vmatpush.msrb.mxu0 %v702_v35 }
  0xab   : > { %v830_v37 = vld [vmem:[#allocation5 + $0xcc0] sm:$0xff]  ;;  %1565 = vmatpush.msrb.mxu1 %v766_v36 }
  0xac   : > { %v898_v38 = vld [vmem:[#allocation5 + $0xee0] sm:$0xff]  ;;  %1585 = vmatpush.msrb.mxu2 %v830_v37  ;;  %v4647_v37 = vmax.f32 %v395_v31, 0.0 }
  0xad   : > { %v698_v39 = vld [vmem:[#allocation5 + $0x8a0] sm:$0xff]  ;;  %1604 = vmatpush.msrb.mxu3 %v898_v38 }
  0xae   : > { %v762_v40 = vld [vmem:[#allocation5 + $0xaa0] sm:$0xff]  ;;  %1546 = vmatpush.msrb.mxu0 %v698_v39 }
  0xaf   : > { %v826_v41 = vld [vmem:[#allocation5 + $0xca0] sm:$0xff]  ;;  %1566 = vmatpush.msrb.mxu1 %v762_v40 }
  0xb0   : > { %v894_v42 = vld [vmem:[#allocation5 + $0xec0] sm:$0xff]  ;;  %1586 = vmatpush.msrb.mxu2 %v826_v41 }
  0xb1   : > { %v694_v43 = vld [vmem:[#allocation5 + $0x880] sm:$0xff]  ;;  %1605 = vmatpush.msrb.mxu3 %v894_v42 }
  0xb2   : > { %v758_v44 = vld [vmem:[#allocation5 + $0xa80] sm:$0xff]  ;;  %1547 = vmatpush.msrb.mxu0 %v694_v43 }
  0xb3   : > { %v822_v45 = vld [vmem:[#allocation5 + $0xc80] sm:$0xff]  ;;  %1567 = vmatpush.msrb.mxu1 %v758_v44 }
  0xb4   : > { %v890_v46 = vld [vmem:[#allocation5 + $0xea0] sm:$0xff]  ;;  %1587 = vmatpush.msrb.mxu2 %v822_v45 }
  0xb5   : > { %v690_v47 = vld [vmem:[#allocation5 + $0x860] sm:$0xff]  ;;  %1606 = vmatpush.msrb.mxu3 %v890_v46 }
  0xb6   : > { %v754_v48 = vld [vmem:[#allocation5 + $0xa60] sm:$0xff]  ;;  %1548 = vmatpush.msrb.mxu0 %v690_v47 }
  0xb7   : > { %v818_v49 = vld [vmem:[#allocation5 + $0xc60] sm:$0xff]  ;;  %1568 = vmatpush.msrb.mxu1 %v754_v48 }
  0xb8   : > { %v886_v50 = vld [vmem:[#allocation5 + $0xe80] sm:$0xff]  ;;  %1588 = vmatpush.msrb.mxu2 %v818_v49 }
  0xb9   : > { %v686_v51 = vld [vmem:[#allocation5 + $0x840] sm:$0xff]  ;;  %1607 = vmatpush.msrb.mxu3 %v886_v50 }
  0xba   : > { %v750_v52 = vld [vmem:[#allocation5 + $0xa40] sm:$0xff]  ;;  %1549 = vmatpush.msrb.mxu0 %v686_v51 }
  0xbb   : > { %v814_v53 = vld [vmem:[#allocation5 + $0xc40] sm:$0xff]  ;;  %1569 = vmatpush.msrb.mxu1 %v750_v52 }
  0xbc   : > { %v882_v54 = vld [vmem:[#allocation5 + $0xe60] sm:$0xff]  ;;  %1589 = vmatpush.msrb.mxu2 %v814_v53 }
  0xbd   : > { %v682_v55 = vld [vmem:[#allocation5 + $0x820] sm:$0xff]  ;;  %1608 = vmatpush.msrb.mxu3 %v882_v54 }
  0xbe   : > { %v746_v56 = vld [vmem:[#allocation5 + $0xa20] sm:$0xff]  ;;  %1550 = vmatpush.msrb.mxu0 %v682_v55 }
  0xbf   : > { %v390_v57 = vld [vmem:[%s4602_s21] sm:$0xff]  ;;  %1570 = vmatpush.msrb.mxu1 %v746_v56 }
  0xc0   : > { %v810_v59 = vld [vmem:[#allocation5 + $0xc20] sm:$0xff]  ;;  %v4623_v2 = vmax.f32 %v390_v57, 0.0 }
  0xc1   : > { %v878_v60 = vld [vmem:[#allocation5 + $0xe40] sm:$0xff]  ;;  %1590 = vmatpush.msrb.mxu2 %v810_v59 }
  0xc2   : > { %v678_v62 = vld [vmem:[#allocation5 + $0x800] sm:$0xff]  ;;  %1609 = vmatpush.msrb.mxu3 %v878_v60  ;;  %1472 = vmatmul.f32.vlgmr.msra.gmra.mxu0 %v4623_v2 }
  0xc3   : > { %v742_v63 = vld [vmem:[#allocation5 + $0xa00] sm:$0xff]  ;;  %1551 = vmatpush.msrb.mxu0 %v678_v62 }
  0xc4   : > { %v806_v0 = vld [vmem:[#allocation5 + $0xc00] sm:$0xff]  ;;  %1571 = vmatpush.msrb.mxu1 %v742_v63 }
  0xc5   : > { %v874_v1 = vld [vmem:[#allocation5 + $0xe20] sm:$0xff]  ;;  %1591 = vmatpush.msrb.mxu2 %v806_v0  ;;  %1572 = vmatmul.f32.vlgmr.msrb.gmra.mxu1 %v4647_v37 }
  0xc6   : > { %v994_v6 = vld [vmem:[#allocation5 + $0x11e0] sm:$0xff]  ;;  %1610 = vmatpush.msrb.mxu3 %v874_v1  ;;  %1592 = vmatmul.f32.vlgmr.msrb.gmra.mxu2 %v4638_v25 }
  0xc7   : > { %v1058_v7 = vld [vmem:[#allocation5 + $0x13e0] sm:$0xff]  ;;  %1616 = vmatpush.msra.mxu0 %v994_v6 }
  0xc8   : > { %v1122_v8 = vld [vmem:[#allocation5 + $0x15e0] sm:$0xff]  ;;  %1636 = vmatpush.msra.mxu1 %v1058_v7 }
  0xc9   : > { %v870_v9 = vld [vmem:[#allocation5 + $0xe00] sm:$0xff]  ;;  %1656 = vmatpush.msra.mxu2 %v1122_v8 }
  0xca   : > { %v990_v11 = vld [vmem:[#allocation5 + $0x11c0] sm:$0xff]  ;;  %1611 = vmatpush.msrb.mxu3 %v870_v9 }
  0xcb   : > { %v1054_v12 = vld [vmem:[#allocation5 + $0x13c0] sm:$0xff]  ;;  %1617 = vmatpush.msra.mxu0 %v990_v11  ;;  %1612 = vmatmul.f32.vlgmr.msrb.gmra.mxu3 %v4644_v33 }
  0xcc   : > { %v1118_v13 = vld [vmem:[#allocation5 + $0x15c0] sm:$0xff]  ;;  %1637 = vmatpush.msra.mxu1 %v1054_v12 }
  0xcd   : > { %v1186_v14 = vld [vmem:[#allocation5 + $0x17e0] sm:$0xff]  ;;  %1657 = vmatpush.msra.mxu2 %v1118_v13 }
  0xce   : > { %v986_v15 = vld [vmem:[#allocation5 + $0x11a0] sm:$0xff]  ;;  %1676 = vmatpush.msra.mxu3 %v1186_v14  ;;  %v400_v14 = vld [vmem:[%s4602_s21 + $0x50] sm:$0xff] }
  0xcf   : > { %v1050_v16 = vld [vmem:[#allocation5 + $0x13a0] sm:$0xff]  ;;  %1618 = vmatpush.msra.mxu0 %v986_v15 }
  0xd0   : > { %v1114_v18 = vld [vmem:[#allocation5 + $0x15a0] sm:$0xff]  ;;  %1638 = vmatpush.msra.mxu1 %v1050_v16 }
  0xd1   : > { %v1182_v19 = vld [vmem:[#allocation5 + $0x17c0] sm:$0xff]  ;;  %1658 = vmatpush.msra.mxu2 %v1114_v18 }
  0xd2   : > { %v982_v20 = vld [vmem:[#allocation5 + $0x1180] sm:$0xff]  ;;  %1677 = vmatpush.msra.mxu3 %v1182_v19 }
  0xd3   : > { %v1046_v21 = vld [vmem:[#allocation5 + $0x1380] sm:$0xff]  ;;  %1619 = vmatpush.msra.mxu0 %v982_v20 }
  0xd4   : > { %v394_v22 = vld [vmem:[%s4602_s21 + $0x20] sm:$0xff]  ;;  %1639 = vmatpush.msra.mxu1 %v1046_v21 }
  0xd5   : > { %v1110_v23 = vld [vmem:[#allocation5 + $0x1580] sm:$0xff]  ;;  %v4641_v30 = vmax.f32 %v394_v22, 0.0  ;;  %v4656_v22 = vmax.f32 %v400_v14, 0.0 }
  0xd6   : > { %v1178_v24 = vld [vmem:[#allocation5 + $0x17a0] sm:$0xff]  ;;  %1659 = vmatpush.msra.mxu2 %v1110_v23  ;;  %v399_v23 = vld [vmem:[%s4602_s21 + $0x48] sm:$0xff] }
  0xd7   : > { %v978_v27 = vld [vmem:[#allocation5 + $0x1160] sm:$0xff]  ;;  %1678 = vmatpush.msra.mxu3 %v1178_v24  ;;  %1552 = vmatmul.f32.vlgmr.msrb.gmra.mxu0 %v4641_v30  ;;  %v401_v24 = vld [vmem:[%s4602_s21 + $0x58] sm:$0xff]  ;;  %v4660_v31 = vmax.f32 %v399_v23, 0.0 }
  0xd8   : > { %v1042_v28 = vld [vmem:[#allocation5 + $0x1360] sm:$0xff]  ;;  %1620 = vmatpush.msra.mxu0 %v978_v27 }
  0xd9   : > { %v1106_v29 = vld [vmem:[#allocation5 + $0x1560] sm:$0xff]  ;;  %1640 = vmatpush.msra.mxu1 %v1042_v28 }
  0xda   : > { %v1174_v32 = vld [vmem:[#allocation5 + $0x1780] sm:$0xff]  ;;  %1660 = vmatpush.msra.mxu2 %v1106_v29 }
  0xdb   : > { %v974_v34 = vld [vmem:[#allocation5 + $0x1140] sm:$0xff]  ;;  %1679 = vmatpush.msra.mxu3 %v1174_v32  ;;  %v4662_v32 = vmax.f32 %v401_v24, 0.0 }
  0xdc   : > { %v1038_v35 = vld [vmem:[#allocation5 + $0x1340] sm:$0xff]  ;;  %1621 = vmatpush.msra.mxu0 %v974_v34 }
  0xdd   : > { %v1102_v36 = vld [vmem:[#allocation5 + $0x1540] sm:$0xff]  ;;  %1641 = vmatpush.msra.mxu1 %v1038_v35 }
  0xde   : > { %v1170_v38 = vld [vmem:[#allocation5 + $0x1760] sm:$0xff]  ;;  %1661 = vmatpush.msra.mxu2 %v1102_v36 }
  0xdf   : > { %v970_v39 = vld [vmem:[#allocation5 + $0x1120] sm:$0xff]  ;;  %1680 = vmatpush.msra.mxu3 %v1170_v38 }
  0xe0   : > { %v1034_v40 = vld [vmem:[#allocation5 + $0x1320] sm:$0xff]  ;;  %1622 = vmatpush.msra.mxu0 %v970_v39 }
  0xe1   : > { %v1098_v41 = vld [vmem:[#allocation5 + $0x1520] sm:$0xff]  ;;  %1642 = vmatpush.msra.mxu1 %v1034_v40 }
  0xe2   : > { %v1166_v42 = vld [vmem:[#allocation5 + $0x1740] sm:$0xff]  ;;  %1662 = vmatpush.msra.mxu2 %v1098_v41 }
  0xe3   : > { %v966_v43 = vld [vmem:[#allocation5 + $0x1100] sm:$0xff]  ;;  %1681 = vmatpush.msra.mxu3 %v1166_v42 }
  0xe4   : > { %v1030_v44 = vld [vmem:[#allocation5 + $0x1300] sm:$0xff]  ;;  %1623 = vmatpush.msra.mxu0 %v966_v43 }
  0xe5   : > { %v1094_v45 = vld [vmem:[#allocation5 + $0x1500] sm:$0xff]  ;;  %1643 = vmatpush.msra.mxu1 %v1030_v44 }
  0xe6   : > { %v1162_v46 = vld [vmem:[#allocation5 + $0x1720] sm:$0xff]  ;;  %1663 = vmatpush.msra.mxu2 %v1094_v45 }
  0xe7   : > { %v962_v47 = vld [vmem:[#allocation5 + $0x10e0] sm:$0xff]  ;;  %1682 = vmatpush.msra.mxu3 %v1162_v46 }
  0xe8   : > { %v1026_v48 = vld [vmem:[#allocation5 + $0x12e0] sm:$0xff]  ;;  %1624 = vmatpush.msra.mxu0 %v962_v47 }
  0xe9   : > { %v1090_v49 = vld [vmem:[#allocation5 + $0x14e0] sm:$0xff]  ;;  %1644 = vmatpush.msra.mxu1 %v1026_v48 }
  0xea   : > { %v1158_v50 = vld [vmem:[#allocation5 + $0x1700] sm:$0xff]  ;;  %1664 = vmatpush.msra.mxu2 %v1090_v49 }
  0xeb   : > { %v958_v51 = vld [vmem:[#allocation5 + $0x10c0] sm:$0xff]  ;;  %1683 = vmatpush.msra.mxu3 %v1158_v50 }
  0xec   : > { %v1022_v52 = vld [vmem:[#allocation5 + $0x12c0] sm:$0xff]  ;;  %1625 = vmatpush.msra.mxu0 %v958_v51 }
  0xed   : > { %v1086_v53 = vld [vmem:[#allocation5 + $0x14c0] sm:$0xff]  ;;  %1645 = vmatpush.msra.mxu1 %v1022_v52 }
  0xee   : > { %v1154_v54 = vld [vmem:[#allocation5 + $0x16e0] sm:$0xff]  ;;  %1665 = vmatpush.msra.mxu2 %v1086_v53 }
  0xef   : > { %v954_v55 = vld [vmem:[#allocation5 + $0x10a0] sm:$0xff]  ;;  %1684 = vmatpush.msra.mxu3 %v1154_v54 }
  0xf0   : > { %v1018_v56 = vld [vmem:[#allocation5 + $0x12a0] sm:$0xff]  ;;  %1626 = vmatpush.msra.mxu0 %v954_v55 }
  0xf1   : > { %v1082_v57 = vld [vmem:[#allocation5 + $0x14a0] sm:$0xff]  ;;  %1646 = vmatpush.msra.mxu1 %v1018_v56 }
  0xf2   : > { %v1150_v58 = vld [vmem:[#allocation5 + $0x16c0] sm:$0xff]  ;;  %1666 = vmatpush.msra.mxu2 %v1082_v57 }
  0xf3   : > { %v950_v59 = vld [vmem:[#allocation5 + $0x1080] sm:$0xff]  ;;  %1685 = vmatpush.msra.mxu3 %v1150_v58 }
  0xf4   : > { %v1014_v60 = vld [vmem:[#allocation5 + $0x1280] sm:$0xff]  ;;  %1627 = vmatpush.msra.mxu0 %v950_v59 }
  0xf5   : > { %v1078_v61 = vld [vmem:[#allocation5 + $0x1480] sm:$0xff]  ;;  %1647 = vmatpush.msra.mxu1 %v1014_v60 }
  0xf6   : > { %v1146_v62 = vld [vmem:[#allocation5 + $0x16a0] sm:$0xff]  ;;  %1667 = vmatpush.msra.mxu2 %v1078_v61 }
  0xf7   : > { %v946_v63 = vld [vmem:[#allocation5 + $0x1060] sm:$0xff]  ;;  %1686 = vmatpush.msra.mxu3 %v1146_v62 }
  0xf8   : > { %v1010_v0 = vld [vmem:[#allocation5 + $0x1260] sm:$0xff]  ;;  %1628 = vmatpush.msra.mxu0 %v946_v63 }
  0xf9   : > { %v1074_v1 = vld [vmem:[#allocation5 + $0x1460] sm:$0xff]  ;;  %1648 = vmatpush.msra.mxu1 %v1010_v0 }
  0xfa   : > { %v1142_v5 = vld [vmem:[#allocation5 + $0x1680] sm:$0xff]  ;;  %1668 = vmatpush.msra.mxu2 %v1074_v1 }
  0xfb   : > { %v942_v6 = vld [vmem:[#allocation5 + $0x1040] sm:$0xff]  ;;  %1687 = vmatpush.msra.mxu3 %v1142_v5 }
  0xfc   : > { %v1006_v7 = vld [vmem:[#allocation5 + $0x1240] sm:$0xff]  ;;  %1629 = vmatpush.msra.mxu0 %v942_v6 }
  0xfd   : > { %v1070_v8 = vld [vmem:[#allocation5 + $0x1440] sm:$0xff]  ;;  %1649 = vmatpush.msra.mxu1 %v1006_v7 }
  0xfe   : > { %v1138_v9 = vld [vmem:[#allocation5 + $0x1660] sm:$0xff]  ;;  %1669 = vmatpush.msra.mxu2 %v1070_v8 }
  0xff   : > { %v938_v11 = vld [vmem:[#allocation5 + $0x1020] sm:$0xff]  ;;  %1688 = vmatpush.msra.mxu3 %v1138_v9 }
 0x100   : > { %v1002_v12 = vld [vmem:[#allocation5 + $0x1220] sm:$0xff]  ;;  %1630 = vmatpush.msra.mxu0 %v938_v11 }
 0x101   : > { %v398_v13 = vld [vmem:[%s4602_s21 + $0x40] sm:$0xff]  ;;  %1650 = vmatpush.msra.mxu1 %v1002_v12 }
 0x102   : > { %v1066_v15 = vld [vmem:[#allocation5 + $0x1420] sm:$0xff]  ;;  %v4654_v21 = vmax.f32 %v398_v13, 0.0 }
 0x103   : > { %v1134_v16 = vld [vmem:[#allocation5 + $0x1640] sm:$0xff]  ;;  %1670 = vmatpush.msra.mxu2 %v1066_v15 }
 0x104   : > { %v934_v17 = vld [vmem:[#allocation5 + $0x1000] sm:$0xff]  ;;  %1689 = vmatpush.msra.mxu3 %v1134_v16 }
 0x105   : > { %v998_v18 = vld [vmem:[#allocation5 + $0x1200] sm:$0xff]  ;;  %1631 = vmatpush.msra.mxu0 %v934_v17 }
 0x106   : > { %v1062_v19 = vld [vmem:[#allocation5 + $0x1400] sm:$0xff]  ;;  %1651 = vmatpush.msra.mxu1 %v998_v18  ;;  %1632 = vmatmul.f32.vlgmr.msra.gmra.mxu0 %v4654_v21 }
 0x107   : > { %v1130_v20 = vld [vmem:[#allocation5 + $0x1620] sm:$0xff]  ;;  %1671 = vmatpush.msra.mxu2 %v1062_v19  ;;  %1652 = vmatmul.f32.vlgmr.msra.gmra.mxu1 %v4660_v31 }
 0x108   : > { %v1250_v26 = vld [vmem:[#allocation5 + $0x19e0] sm:$0xff]  ;;  %1690 = vmatpush.msra.mxu3 %v1130_v20  ;;  %1672 = vmatmul.f32.vlgmr.msra.gmra.mxu2 %v4656_v22 }
 0x109   : > { %v1314_v27 = vld [vmem:[#allocation5 + $0x1be0] sm:$0xff]  ;;  %1696 = vmatpush.msrb.mxu0 %v1250_v26 }
 0x10a   : > { %v1378_v28 = vld [vmem:[#allocation5 + $0x1de0] sm:$0xff]  ;;  %1716 = vmatpush.msrb.mxu1 %v1314_v27 }
 0x10b   : > { %v1126_v29 = vld [vmem:[#allocation5 + $0x1600] sm:$0xff]  ;;  %1736 = vmatpush.msrb.mxu2 %v1378_v28 }
 0x10c   : > { %v1246_v34 = vld [vmem:[#allocation5 + $0x19c0] sm:$0xff]  ;;  %1691 = vmatpush.msra.mxu3 %v1126_v29 }
 0x10d   : > { %v1310_v35 = vld [vmem:[#allocation5 + $0x1bc0] sm:$0xff]  ;;  %1692 = vmatmul.f32.vlgmr.msra.gmra.mxu3 %v4662_v32  ;;  %1697 = vmatpush.msrb.mxu0 %v1246_v34 }
 0x10e   : > { %v1374_v36 = vld [vmem:[#allocation5 + $0x1dc0] sm:$0xff]  ;;  %1717 = vmatpush.msrb.mxu1 %v1310_v35 }
 0x10f   : > { %v1442_v38 = vld [vmem:[#allocation5 + $0x1fe0] sm:$0xff]  ;;  %1737 = vmatpush.msrb.mxu2 %v1374_v36 }
 0x110   : > { %v1242_v39 = vld [vmem:[#allocation5 + $0x19a0] sm:$0xff]  ;;  %1756 = vmatpush.msrb.mxu3 %v1442_v38  ;;  %v404_v38 = vld [vmem:[%s4602_s21 + $0x70] sm:$0xff] }
 0x111   : > { %v1306_v40 = vld [vmem:[#allocation5 + $0x1ba0] sm:$0xff]  ;;  %1698 = vmatpush.msrb.mxu0 %v1242_v39 }
 0x112   : > { %v1370_v41 = vld [vmem:[#allocation5 + $0x1da0] sm:$0xff]  ;;  %1718 = vmatpush.msrb.mxu1 %v1306_v40 }
 0x113   : > { %v1438_v42 = vld [vmem:[#allocation5 + $0x1fc0] sm:$0xff]  ;;  %1738 = vmatpush.msrb.mxu2 %v1370_v41 }
 0x114   : > { %v1238_v43 = vld [vmem:[#allocation5 + $0x1980] sm:$0xff]  ;;  %1757 = vmatpush.msrb.mxu3 %v1438_v42 }
 0x115   : > { %v1302_v44 = vld [vmem:[#allocation5 + $0x1b80] sm:$0xff]  ;;  %1699 = vmatpush.msrb.mxu0 %v1238_v43 }
 0x116   : > { %v1366_v45 = vld [vmem:[#allocation5 + $0x1d80] sm:$0xff]  ;;  %1719 = vmatpush.msrb.mxu1 %v1302_v44 }
 0x117   : > { %v1434_v46 = vld [vmem:[#allocation5 + $0x1fa0] sm:$0xff]  ;;  %1739 = vmatpush.msrb.mxu2 %v1366_v45 }
 0x118   : > { %v1234_v47 = vld [vmem:[#allocation5 + $0x1960] sm:$0xff]  ;;  %1758 = vmatpush.msrb.mxu3 %v1434_v46  ;;  %v4672_v46 = vmax.f32 %v404_v38, 0.0  ;;  %v643_v38 = vld [vmem:[#allocation5 + $0x6e8] sm:$0xff] }
 0x119   : > { %v1298_v48 = vld [vmem:[#allocation5 + $0x1b60] sm:$0xff]  ;;  %1700 = vmatpush.msrb.mxu0 %v1234_v47  ;;  %v403_v47 = vld [vmem:[%s4602_s21 + $0x68] sm:$0xff] }
 0x11a   : > { %v1362_v49 = vld [vmem:[#allocation5 + $0x1d60] sm:$0xff]  ;;  %1720 = vmatpush.msrb.mxu1 %v1298_v48  ;;  %v405_v48 = vld [vmem:[%s4602_s21 + $0x78] sm:$0xff] }
 0x11b   : > { %v1430_v50 = vld [vmem:[#allocation5 + $0x1f80] sm:$0xff]  ;;  %1740 = vmatpush.msrb.mxu2 %v1362_v49  ;;  %v483_v49 = vld [vmem:[#allocation5 + $0x1e8] sm:$0xff] }
 0x11c   : > { %v1230_v51 = vld [vmem:[#allocation5 + $0x1940] sm:$0xff]  ;;  %1759 = vmatpush.msrb.mxu3 %v1430_v50  ;;  %v547_v50 = vld [vmem:[#allocation5 + $0x3e8] sm:$0xff] }
 0x11d   : > { %v1294_v52 = vld [vmem:[#allocation5 + $0x1b40] sm:$0xff]  ;;  %1701 = vmatpush.msrb.mxu0 %v1230_v51  ;;  %v611_v51 = vld [vmem:[#allocation5 + $0x5e8] sm:$0xff] }
 0x11e   : > { %v1358_v53 = vld [vmem:[#allocation5 + $0x1d40] sm:$0xff]  ;;  %1721 = vmatpush.msrb.mxu1 %v1294_v52 }
 0x11f   : > { %v1426_v54 = vld [vmem:[#allocation5 + $0x1f60] sm:$0xff]  ;;  %1741 = vmatpush.msrb.mxu2 %v1358_v53  ;;  %v4676_v53 = vmax.f32 %v403_v47, 0.0  ;;  %v567_v47 = vld [vmem:[#allocation5 + $0x488] sm:$0xff] }
 0x120   : > { %v1226_v55 = vld [vmem:[#allocation5 + $0x1920] sm:$0xff]  ;;  %1760 = vmatpush.msrb.mxu3 %v1426_v54  ;;  %v4678_v54 = vmax.f32 %v405_v48, 0.0  ;;  %v635_v48 = vld [vmem:[#allocation5 + $0x6a8] sm:$0xff] }
 0x121   : > { %v1290_v56 = vld [vmem:[#allocation5 + $0x1b20] sm:$0xff]  ;;  %1702 = vmatpush.msrb.mxu0 %v1226_v55  ;;  %v479_v55 = vld [vmem:[#allocation5 + $0x1c8] sm:$0xff] }
 0x122   : > { %v1354_v57 = vld [vmem:[#allocation5 + $0x1d20] sm:$0xff]  ;;  %1722 = vmatpush.msrb.mxu1 %v1290_v56  ;;  %v543_v56 = vld [vmem:[#allocation5 + $0x3c8] sm:$0xff] }
 0x123   : > { %v1422_v58 = vld [vmem:[#allocation5 + $0x1f40] sm:$0xff]  ;;  %1742 = vmatpush.msrb.mxu2 %v1354_v57  ;;  %v607_v57 = vld [vmem:[#allocation5 + $0x5c8] sm:$0xff] }
 0x124   : > { %v1222_v59 = vld [vmem:[#allocation5 + $0x1900] sm:$0xff]  ;;  %1761 = vmatpush.msrb.mxu3 %v1422_v58  ;;  %v675_v58 = vld [vmem:[#allocation5 + $0x7e8] sm:$0xff] }
 0x125   : > { %v1286_v60 = vld [vmem:[#allocation5 + $0x1b00] sm:$0xff]  ;;  %1703 = vmatpush.msrb.mxu0 %v1222_v59  ;;  %v475_v59 = vld [vmem:[#allocation5 + $0x1a8] sm:$0xff] }
 0x126   : > { %v1350_v61 = vld [vmem:[#allocation5 + $0x1d00] sm:$0xff]  ;;  %1723 = vmatpush.msrb.mxu1 %v1286_v60  ;;  %v539_v60 = vld [vmem:[#allocation5 + $0x3a8] sm:$0xff] }
 0x127   : > { %v1418_v62 = vld [vmem:[#allocation5 + $0x1f20] sm:$0xff]  ;;  %1743 = vmatpush.msrb.mxu2 %v1350_v61  ;;  %v603_v61 = vld [vmem:[#allocation5 + $0x5a8] sm:$0xff] }
 0x128   : > { %v1218_v63 = vld [vmem:[#allocation5 + $0x18e0] sm:$0xff]  ;;  %1762 = vmatpush.msrb.mxu3 %v1418_v62  ;;  %v671_v62 = vld [vmem:[#allocation5 + $0x7c8] sm:$0xff] }
 0x129   : > { %v1282_v0 = vld [vmem:[#allocation5 + $0x1ae0] sm:$0xff]  ;;  %1704 = vmatpush.msrb.mxu0 %v1218_v63  ;;  %v471_v63 = vld [vmem:[#allocation5 + $0x188] sm:$0xff] }
 0x12a   : > { %v1346_v1 = vld [vmem:[#allocation5 + $0x1ce0] sm:$0xff]  ;;  %1724 = vmatpush.msrb.mxu1 %v1282_v0  ;;  %v535_v0 = vld [vmem:[#allocation5 + $0x388] sm:$0xff] }
 0x12b   : > { %v1414_v5 = vld [vmem:[#allocation5 + $0x1f00] sm:$0xff]  ;;  %1744 = vmatpush.msrb.mxu2 %v1346_v1  ;;  %v599_v1 = vld [vmem:[#allocation5 + $0x588] sm:$0xff] }
 0x12c   : > { %v1214_v6 = vld [vmem:[#allocation5 + $0x18c0] sm:$0xff]  ;;  %1763 = vmatpush.msrb.mxu3 %v1414_v5  ;;  %v667_v5 = vld [vmem:[#allocation5 + $0x7a8] sm:$0xff] }
 0x12d   : > { %v1278_v7 = vld [vmem:[#allocation5 + $0x1ac0] sm:$0xff]  ;;  %1705 = vmatpush.msrb.mxu0 %v1214_v6  ;;  %v467_v6 = vld [vmem:[#allocation5 + $0x168] sm:$0xff] }
 0x12e   : > { %v1342_v8 = vld [vmem:[#allocation5 + $0x1cc0] sm:$0xff]  ;;  %1725 = vmatpush.msrb.mxu1 %v1278_v7  ;;  %v531_v7 = vld [vmem:[#allocation5 + $0x368] sm:$0xff] }
 0x12f   : > { %v1410_v9 = vld [vmem:[#allocation5 + $0x1ee0] sm:$0xff]  ;;  %1745 = vmatpush.msrb.mxu2 %v1342_v8  ;;  %v595_v8 = vld [vmem:[#allocation5 + $0x568] sm:$0xff] }
 0x130   : > { %v1210_v11 = vld [vmem:[#allocation5 + $0x18a0] sm:$0xff]  ;;  %1764 = vmatpush.msrb.mxu3 %v1410_v9  ;;  %v663_v9 = vld [vmem:[#allocation5 + $0x788] sm:$0xff] }
 0x131   : > { %v1274_v12 = vld [vmem:[#allocation5 + $0x1aa0] sm:$0xff]  ;;  %1706 = vmatpush.msrb.mxu0 %v1210_v11  ;;  %v463_v11 = vld [vmem:[#allocation5 + $0x148] sm:$0xff] }
 0x132   : > { %v1338_v13 = vld [vmem:[#allocation5 + $0x1ca0] sm:$0xff]  ;;  %1726 = vmatpush.msrb.mxu1 %v1274_v12  ;;  %v527_v12 = vld [vmem:[#allocation5 + $0x348] sm:$0xff] }
 0x133   : > { %v1406_v14 = vld [vmem:[#allocation5 + $0x1ec0] sm:$0xff]  ;;  %1746 = vmatpush.msrb.mxu2 %v1338_v13  ;;  %v591_v13 = vld [vmem:[#allocation5 + $0x548] sm:$0xff] }
 0x134   : > { %v1206_v15 = vld [vmem:[#allocation5 + $0x1880] sm:$0xff]  ;;  %1765 = vmatpush.msrb.mxu3 %v1406_v14  ;;  %v659_v14 = vld [vmem:[#allocation5 + $0x768] sm:$0xff] }
 0x135   : > { %v1270_v16 = vld [vmem:[#allocation5 + $0x1a80] sm:$0xff]  ;;  %1707 = vmatpush.msrb.mxu0 %v1206_v15  ;;  %v459_v15 = vld [vmem:[#allocation5 + $0x128] sm:$0xff] }
 0x136   : > { %v1334_v17 = vld [vmem:[#allocation5 + $0x1c80] sm:$0xff]  ;;  %1727 = vmatpush.msrb.mxu1 %v1270_v16  ;;  %v523_v16 = vld [vmem:[#allocation5 + $0x328] sm:$0xff] }
 0x137   : > { %v1402_v18 = vld [vmem:[#allocation5 + $0x1ea0] sm:$0xff]  ;;  %1747 = vmatpush.msrb.mxu2 %v1334_v17  ;;  %v587_v17 = vld [vmem:[#allocation5 + $0x528] sm:$0xff] }
 0x138   : > { %v1202_v19 = vld [vmem:[#allocation5 + $0x1860] sm:$0xff]  ;;  %1766 = vmatpush.msrb.mxu3 %v1402_v18  ;;  %v655_v18 = vld [vmem:[#allocation5 + $0x748] sm:$0xff] }
 0x139   : > { %v1266_v20 = vld [vmem:[#allocation5 + $0x1a60] sm:$0xff]  ;;  %1708 = vmatpush.msrb.mxu0 %v1202_v19  ;;  %v455_v19 = vld [vmem:[#allocation5 + $0x108] sm:$0xff] }
 0x13a   : > { %v1330_v23 = vld [vmem:[#allocation5 + $0x1c60] sm:$0xff]  ;;  %1728 = vmatpush.msrb.mxu1 %v1266_v20  ;;  %v519_v20 = vld [vmem:[#allocation5 + $0x308] sm:$0xff] }
 0x13b   : > { %v1398_v24 = vld [vmem:[#allocation5 + $0x1e80] sm:$0xff]  ;;  %1748 = vmatpush.msrb.mxu2 %v1330_v23  ;;  %v583_v23 = vld [vmem:[#allocation5 + $0x508] sm:$0xff] }
 0x13c   : > { %v1198_v26 = vld [vmem:[#allocation5 + $0x1840] sm:$0xff]  ;;  %1767 = vmatpush.msrb.mxu3 %v1398_v24  ;;  %v651_v24 = vld [vmem:[#allocation5 + $0x728] sm:$0xff] }
 0x13d   : > { %v1262_v27 = vld [vmem:[#allocation5 + $0x1a40] sm:$0xff]  ;;  %1709 = vmatpush.msrb.mxu0 %v1198_v26  ;;  %v451_v26 = vld [vmem:[#allocation5 + $0xe8] sm:$0xff] }
 0x13e   : > { %v1326_v28 = vld [vmem:[#allocation5 + $0x1c40] sm:$0xff]  ;;  %1729 = vmatpush.msrb.mxu1 %v1262_v27  ;;  %v515_v27 = vld [vmem:[#allocation5 + $0x2e8] sm:$0xff] }
 0x13f   : > { %v1394_v29 = vld [vmem:[#allocation5 + $0x1e60] sm:$0xff]  ;;  %1749 = vmatpush.msrb.mxu2 %v1326_v28  ;;  %v579_v28 = vld [vmem:[#allocation5 + $0x4e8] sm:$0xff] }
 0x140   : > { %v1194_v34 = vld [vmem:[#allocation5 + $0x1820] sm:$0xff]  ;;  %1768 = vmatpush.msrb.mxu3 %v1394_v29  ;;  %v647_v29 = vld [vmem:[#allocation5 + $0x708] sm:$0xff] }
 0x141   : > { %v1258_v35 = vld [vmem:[#allocation5 + $0x1a20] sm:$0xff]  ;;  %1710 = vmatpush.msrb.mxu0 %v1194_v34  ;;  %v447_v34 = vld [vmem:[#allocation5 + $0xc8] sm:$0xff] }
 0x142   : > { %v402_v36 = vld [vmem:[%s4602_s21 + $0x60] sm:$0xff]  ;;  %1730 = vmatpush.msrb.mxu1 %v1258_v35  ;;  %v511_v35 = vld [vmem:[#allocation5 + $0x2c8] sm:$0xff] }
 0x143   : > { %v1322_v39 = vld [vmem:[#allocation5 + $0x1c20] sm:$0xff]  ;;  %v4670_v45 = vmax.f32 %v402_v36, 0.0  ;;  %v575_v36 = vld [vmem:[#allocation5 + $0x4c8] sm:$0xff] }
 0x144   : > { %v1390_v40 = vld [vmem:[#allocation5 + $0x1e40] sm:$0xff]  ;;  %1750 = vmatpush.msrb.mxu2 %v1322_v39  ;;  %v443_v39 = vld [vmem:[#allocation5 + $0xa8] sm:$0xff] }
 0x145   : > { %v1190_v41 = vld [vmem:[#allocation5 + $0x1800] sm:$0xff]  ;;  %1769 = vmatpush.msrb.mxu3 %v1390_v40  ;;  %v507_v40 = vld [vmem:[#allocation5 + $0x2a8] sm:$0xff] }
 0x146   : > { %v1254_v42 = vld [vmem:[#allocation5 + $0x1a00] sm:$0xff]  ;;  %1711 = vmatpush.msrb.mxu0 %v1190_v41  ;;  %v571_v41 = vld [vmem:[#allocation5 + $0x4a8] sm:$0xff] }
 0x147   : > { %v1318_v43 = vld [vmem:[#allocation5 + $0x1c00] sm:$0xff]  ;;  %1731 = vmatpush.msrb.mxu1 %v1254_v42  ;;  %1712 = vmatmul.f32.vlgmr.msrb.gmra.mxu0 %v4670_v45  ;;  %v639_v42 = vld [vmem:[#allocation5 + $0x6c8] sm:$0xff] }
 0x148   : > { %v1386_v44 = vld [vmem:[#allocation5 + $0x1e20] sm:$0xff]  ;;  %1751 = vmatpush.msrb.mxu2 %v1318_v43  ;;  %1776 = vmatpush.msra.mxu0 %v483_v49  ;;  %v439_v43 = vld [vmem:[#allocation5 + $0x88] sm:$0xff] }
 0x149   : > { %1770 = vmatpush.msrb.mxu3 %v1386_v44  ;;  %v1382_v52 = vld [vmem:[#allocation5 + $0x1e00] sm:$0xff]  ;;  %1752 = vmatmul.f32.vlgmr.msrb.gmra.mxu2 %v4672_v46  ;;  %v503_v44 = vld [vmem:[#allocation5 + $0x288] sm:$0xff] }
 0x14a   : > { %1796 = vmatpush.msra.mxu1 %v547_v50  ;;  %1816 = vmatpush.msra.mxu2 %v611_v51  ;;  %v435_v49 = vld [vmem:[#allocation5 + $0x68] sm:$0xff] }
 0x14b   : > { %1771 = vmatpush.msrb.mxu3 %v1382_v52  ;;  %1732 = vmatmul.f32.vlgmr.msrb.gmra.mxu1 %v4676_v53  ;;  %v499_v50 = vld [vmem:[#allocation5 + $0x268] sm:$0xff] }
 0x14c   : > { %1772 = vmatmul.f32.vlgmr.msrb.gmra.mxu3 %v4678_v54  ;;  %1777 = vmatpush.msra.mxu0 %v479_v55  ;;  %v563_v51 = vld [vmem:[#allocation5 + $0x468] sm:$0xff] }
 0x14d   : > { %1797 = vmatpush.msra.mxu1 %v543_v56  ;;  %1817 = vmatpush.msra.mxu2 %v607_v57  ;;  %v631_v52 = vld [vmem:[#allocation5 + $0x688] sm:$0xff] }
 0x14e   : > { %1836 = vmatpush.msra.mxu3 %v675_v58  ;;  %1778 = vmatpush.msra.mxu0 %v475_v59  ;;  %v431_v55 = vld [vmem:[#allocation5 + $0x48] sm:$0xff] }
 0x14f   : > { %1798 = vmatpush.msra.mxu1 %v539_v60  ;;  %1818 = vmatpush.msra.mxu2 %v603_v61  ;;  %v495_v56 = vld [vmem:[#allocation5 + $0x248] sm:$0xff] }
 0x150   : > { %1837 = vmatpush.msra.mxu3 %v671_v62  ;;  %1779 = vmatpush.msra.mxu0 %v471_v63  ;;  %v559_v57 = vld [vmem:[#allocation5 + $0x448] sm:$0xff] }
 0x151   : > { %1799 = vmatpush.msra.mxu1 %v535_v0  ;;  %1819 = vmatpush.msra.mxu2 %v599_v1  ;;  %v627_v58 = vld [vmem:[#allocation5 + $0x668] sm:$0xff] }
 0x152   : > { %1838 = vmatpush.msra.mxu3 %v667_v5  ;;  %1780 = vmatpush.msra.mxu0 %v467_v6  ;;  %v427_v59 = vld [vmem:[#allocation5 + $0x28] sm:$0xff] }
 0x153   : > { %1800 = vmatpush.msra.mxu1 %v531_v7  ;;  %1820 = vmatpush.msra.mxu2 %v595_v8  ;;  %v491_v60 = vld [vmem:[#allocation5 + $0x228] sm:$0xff] }
 0x154   : > { %1839 = vmatpush.msra.mxu3 %v663_v9  ;;  %1781 = vmatpush.msra.mxu0 %v463_v11  ;;  %v555_v61 = vld [vmem:[#allocation5 + $0x428] sm:$0xff] }
 0x155   : > { %1801 = vmatpush.msra.mxu1 %v527_v12  ;;  %1821 = vmatpush.msra.mxu2 %v591_v13  ;;  %v623_v62 = vld [vmem:[#allocation5 + $0x648] sm:$0xff] }
 0x156   : > { %1840 = vmatpush.msra.mxu3 %v659_v14  ;;  %1782 = vmatpush.msra.mxu0 %v459_v15  ;;  %v423_v63 = vld [vmem:[#allocation5 + $0x8] sm:$0xff] }
 0x157   : > { %1802 = vmatpush.msra.mxu1 %v523_v16  ;;  %1822 = vmatpush.msra.mxu2 %v587_v17  ;;  %v487_v0 = vld [vmem:[#allocation5 + $0x208] sm:$0xff] }
 0x158   : > { %1841 = vmatpush.msra.mxu3 %v655_v18  ;;  %1783 = vmatpush.msra.mxu0 %v455_v19  ;;  %v551_v1 = vld [vmem:[#allocation5 + $0x408] sm:$0xff] }
 0x159   : > { %1803 = vmatpush.msra.mxu1 %v519_v20  ;;  %1823 = vmatpush.msra.mxu2 %v583_v23  ;;  %v619_v5 = vld [vmem:[#allocation5 + $0x628] sm:$0xff] }
 0x15a   : > { %1842 = vmatpush.msra.mxu3 %v651_v24  ;;  %1784 = vmatpush.msra.mxu0 %v451_v26  ;;  %v739_v6 = vld [vmem:[#allocation5 + $0x9e8] sm:$0xff] }
 0x15b   : > { %1804 = vmatpush.msra.mxu1 %v515_v27  ;;  %1824 = vmatpush.msra.mxu2 %v579_v28  ;;  %v803_v7 = vld [vmem:[#allocation5 + $0xbe8] sm:$0xff] }
 0x15c   : > { %1843 = vmatpush.msra.mxu3 %v647_v29  ;;  %1785 = vmatpush.msra.mxu0 %v447_v34  ;;  %v867_v8 = vld [vmem:[#allocation5 + $0xde8] sm:$0xff] }
 0x15d   : > { %1805 = vmatpush.msra.mxu1 %v511_v35  ;;  %1825 = vmatpush.msra.mxu2 %v575_v36  ;;  %v615_v9 = vld [vmem:[#allocation5 + $0x608] sm:$0xff] }
 0x15e   : > { %1844 = vmatpush.msra.mxu3 %v643_v38  ;;  %1786 = vmatpush.msra.mxu0 %v443_v39  ;;  %v735_v11 = vld [vmem:[#allocation5 + $0x9c8] sm:$0xff] }
 0x15f   : > { %1806 = vmatpush.msra.mxu1 %v507_v40  ;;  %1826 = vmatpush.msra.mxu2 %v571_v41  ;;  %v799_v12 = vld [vmem:[#allocation5 + $0xbc8] sm:$0xff] }
 0x160   : > { %1845 = vmatpush.msra.mxu3 %v639_v42  ;;  %1787 = vmatpush.msra.mxu0 %v439_v43  ;;  %v863_v13 = vld [vmem:[#allocation5 + $0xdc8] sm:$0xff] }
 0x161   : > { %1807 = vmatpush.msra.mxu1 %v503_v44  ;;  %1827 = vmatpush.msra.mxu2 %v567_v47  ;;  %v931_v14 = vld [vmem:[#allocation5 + $0xfe8] sm:$0xff] }
 0x162   : > { %1846 = vmatpush.msra.mxu3 %v635_v48  ;;  %1788 = vmatpush.msra.mxu0 %v435_v49  ;;  %v731_v15 = vld [vmem:[#allocation5 + $0x9a8] sm:$0xff] }
 0x163   : > { %1808 = vmatpush.msra.mxu1 %v499_v50  ;;  %1828 = vmatpush.msra.mxu2 %v563_v51  ;;  %v795_v16 = vld [vmem:[#allocation5 + $0xba8] sm:$0xff] }
 0x164   : > { %1847 = vmatpush.msra.mxu3 %v631_v52  ;;  %1789 = vmatpush.msra.mxu0 %v431_v55  ;;  %v859_v17 = vld [vmem:[#allocation5 + $0xda8] sm:$0xff] }
 0x165   : > { %1809 = vmatpush.msra.mxu1 %v495_v56  ;;  %1829 = vmatpush.msra.mxu2 %v559_v57  ;;  %v927_v18 = vld [vmem:[#allocation5 + $0xfc8] sm:$0xff] }
 0x166   : > { %1848 = vmatpush.msra.mxu3 %v627_v58  ;;  %1790 = vmatpush.msra.mxu0 %v427_v59  ;;  %v727_v19 = vld [vmem:[#allocation5 + $0x988] sm:$0xff] }
 0x167   : > { %1810 = vmatpush.msra.mxu1 %v491_v60  ;;  %1830 = vmatpush.msra.mxu2 %v555_v61  ;;  %v791_v20 = vld [vmem:[#allocation5 + $0xb88] sm:$0xff] }
 0x168   : > { %1849 = vmatpush.msra.mxu3 %v623_v62  ;;  %1791 = vmatpush.msra.mxu0 %v423_v63  ;;  %v855_v23 = vld [vmem:[#allocation5 + $0xd88] sm:$0xff] }
 0x169   : > { %1811 = vmatpush.msra.mxu1 %v487_v0  ;;  %1831 = vmatpush.msra.mxu2 %v551_v1  ;;  %v923_v24 = vld [vmem:[#allocation5 + $0xfa8] sm:$0xff] }
 0x16a   : > { %1850 = vmatpush.msra.mxu3 %v619_v5  ;;  %1856 = vmatpush.msrb.mxu0 %v739_v6  ;;  %v723_v26 = vld [vmem:[#allocation5 + $0x968] sm:$0xff] }
 0x16b   : > { %1876 = vmatpush.msrb.mxu1 %v803_v7  ;;  %1896 = vmatpush.msrb.mxu2 %v867_v8  ;;  %v787_v27 = vld [vmem:[#allocation5 + $0xb68] sm:$0xff] }
 0x16c   : > { %1851 = vmatpush.msra.mxu3 %v615_v9  ;;  %1857 = vmatpush.msrb.mxu0 %v735_v11  ;;  %v851_v28 = vld [vmem:[#allocation5 + $0xd68] sm:$0xff] }
 0x16d   : > { %1877 = vmatpush.msrb.mxu1 %v799_v12  ;;  %1897 = vmatpush.msrb.mxu2 %v863_v13  ;;  %v919_v29 = vld [vmem:[#allocation5 + $0xf88] sm:$0xff] }
 0x16e   : > { %1916 = vmatpush.msrb.mxu3 %v931_v14  ;;  %1858 = vmatpush.msrb.mxu0 %v731_v15  ;;  %v719_v34 = vld [vmem:[#allocation5 + $0x948] sm:$0xff] }
 0x16f   : > { %1878 = vmatpush.msrb.mxu1 %v795_v16  ;;  %1898 = vmatpush.msrb.mxu2 %v859_v17  ;;  %v783_v35 = vld [vmem:[#allocation5 + $0xb48] sm:$0xff] }
 0x170   : > { %1917 = vmatpush.msrb.mxu3 %v927_v18  ;;  %1859 = vmatpush.msrb.mxu0 %v727_v19  ;;  %v847_v36 = vld [vmem:[#allocation5 + $0xd48] sm:$0xff] }
 0x171   : > { %1879 = vmatpush.msrb.mxu1 %v791_v20  ;;  %1899 = vmatpush.msrb.mxu2 %v855_v23  ;;  %v915_v38 = vld [vmem:[#allocation5 + $0xf68] sm:$0xff] }
 0x172   : > { %1918 = vmatpush.msrb.mxu3 %v923_v24  ;;  %1860 = vmatpush.msrb.mxu0 %v723_v26  ;;  %v715_v39 = vld [vmem:[#allocation5 + $0x928] sm:$0xff] }
 0x173   : > { %1880 = vmatpush.msrb.mxu1 %v787_v27  ;;  %1900 = vmatpush.msrb.mxu2 %v851_v28  ;;  %v779_v40 = vld [vmem:[#allocation5 + $0xb28] sm:$0xff] }
 0x174   : > { %1919 = vmatpush.msrb.mxu3 %v919_v29  ;;  %1861 = vmatpush.msrb.mxu0 %v719_v34  ;;  %v843_v41 = vld [vmem:[#allocation5 + $0xd28] sm:$0xff] }
 0x175   : > { %1881 = vmatpush.msrb.mxu1 %v783_v35  ;;  %v911_v42 = vld [vmem:[#allocation5 + $0xf48] sm:$0xff]  ;;  %1901 = vmatpush.msrb.mxu2 %v847_v36 }
 0x176   : > { %1920 = vmatpush.msrb.mxu3 %v915_v38  ;;  %v711_v43 = vld [vmem:[#allocation5 + $0x908] sm:$0xff]  ;;  %1862 = vmatpush.msrb.mxu0 %v715_v39 }
 0x177   : > { %v775_v44 = vld [vmem:[#allocation5 + $0xb08] sm:$0xff]  ;;  %1882 = vmatpush.msrb.mxu1 %v779_v40  ;;  %1902 = vmatpush.msrb.mxu2 %v843_v41 }
 0x178   : > { %v839_v47 = vld [vmem:[#allocation5 + $0xd08] sm:$0xff]  ;;  %1921 = vmatpush.msrb.mxu3 %v911_v42  ;;  %1863 = vmatpush.msrb.mxu0 %v711_v43 }
 0x179   : > { %v907_v48 = vld [vmem:[#allocation5 + $0xf28] sm:$0xff]  ;;  %1883 = vmatpush.msrb.mxu1 %v775_v44  ;;  %1903 = vmatpush.msrb.mxu2 %v839_v47 }
 0x17a   : > { %v707_v49 = vld [vmem:[#allocation5 + $0x8e8] sm:$0xff]  ;;  %1922 = vmatpush.msrb.mxu3 %v907_v48  ;;  %1792 = vmatmul.f32.vlgmr.msra.gmra.mxu0 %v4623_v2 }
 0x17b   : > { %v771_v50 = vld [vmem:[#allocation5 + $0xae8] sm:$0xff]  ;;  %1864 = vmatpush.msrb.mxu0 %v707_v49  ;;  %1812 = vmatmul.f32.vlgmr.msra.gmra.mxu1 %v4625_v3 }
 0x17c   : > { %v835_v51 = vld [vmem:[#allocation5 + $0xce8] sm:$0xff]  ;;  %1884 = vmatpush.msrb.mxu1 %v771_v50  ;;  %1832 = vmatmul.f32.vlgmr.msra.gmra.mxu2 %v4627_v4 }
 0x17d   : > { %v903_v52 = vld [vmem:[#allocation5 + $0xf08] sm:$0xff]  ;;  %1904 = vmatpush.msrb.mxu2 %v835_v51  ;;  %1852 = vmatmul.f32.vlgmr.msra.gmra.mxu3 %v4632_v10 }
 0x17e   : > { %v703_v55 = vld [vmem:[#allocation5 + $0x8c8] sm:$0xff]  ;;  %1923 = vmatpush.msrb.mxu3 %v903_v52 }
 0x17f   : > { %v767_v56 = vld [vmem:[#allocation5 + $0xac8] sm:$0xff]  ;;  %1865 = vmatpush.msrb.mxu0 %v703_v55 }
 0x180   : > { %v831_v57 = vld [vmem:[#allocation5 + $0xcc8] sm:$0xff]  ;;  %1885 = vmatpush.msrb.mxu1 %v767_v56 }
 0x181   : > { %v899_v58 = vld [vmem:[#allocation5 + $0xee8] sm:$0xff]  ;;  %1905 = vmatpush.msrb.mxu2 %v831_v57 }
 0x182   : > { %v699_v59 = vld [vmem:[#allocation5 + $0x8a8] sm:$0xff]  ;;  %1924 = vmatpush.msrb.mxu3 %v899_v58 }
 0x183   : > { %v763_v60 = vld [vmem:[#allocation5 + $0xaa8] sm:$0xff]  ;;  %1866 = vmatpush.msrb.mxu0 %v699_v59 }
 0x184   : > { %v827_v61 = vld [vmem:[#allocation5 + $0xca8] sm:$0xff]  ;;  %1886 = vmatpush.msrb.mxu1 %v763_v60 }
 0x185   : > { %v895_v62 = vld [vmem:[#allocation5 + $0xec8] sm:$0xff]  ;;  %1906 = vmatpush.msrb.mxu2 %v827_v61 }
 0x186   : > { %v695_v63 = vld [vmem:[#allocation5 + $0x888] sm:$0xff]  ;;  %1925 = vmatpush.msrb.mxu3 %v895_v62 }
 0x187   : > { %v759_v0 = vld [vmem:[#allocation5 + $0xa88] sm:$0xff]  ;;  %1867 = vmatpush.msrb.mxu0 %v695_v63 }
 0x188   : > { %v823_v1 = vld [vmem:[#allocation5 + $0xc88] sm:$0xff]  ;;  %1887 = vmatpush.msrb.mxu1 %v759_v0 }
 0x189   : > { %v891_v5 = vld [vmem:[#allocation5 + $0xea8] sm:$0xff]  ;;  %1907 = vmatpush.msrb.mxu2 %v823_v1 }
 0x18a   : > { %v691_v6 = vld [vmem:[#allocation5 + $0x868] sm:$0xff]  ;;  %1926 = vmatpush.msrb.mxu3 %v891_v5 }
 0x18b   : > { %v755_v7 = vld [vmem:[#allocation5 + $0xa68] sm:$0xff]  ;;  %1868 = vmatpush.msrb.mxu0 %v691_v6 }
 0x18c   : > { %v819_v8 = vld [vmem:[#allocation5 + $0xc68] sm:$0xff]  ;;  %1888 = vmatpush.msrb.mxu1 %v755_v7 }
 0x18d   : > { %v887_v9 = vld [vmem:[#allocation5 + $0xe88] sm:$0xff]  ;;  %1908 = vmatpush.msrb.mxu2 %v819_v8 }
 0x18e   : > { %v687_v11 = vld [vmem:[#allocation5 + $0x848] sm:$0xff]  ;;  %1927 = vmatpush.msrb.mxu3 %v887_v9 }
 0x18f   : > { %v751_v12 = vld [vmem:[#allocation5 + $0xa48] sm:$0xff]  ;;  %1869 = vmatpush.msrb.mxu0 %v687_v11 }
 0x190   : > { %v815_v13 = vld [vmem:[#allocation5 + $0xc48] sm:$0xff]  ;;  %1889 = vmatpush.msrb.mxu1 %v751_v12 }
 0x191   : > { %v883_v14 = vld [vmem:[#allocation5 + $0xe68] sm:$0xff]  ;;  %1909 = vmatpush.msrb.mxu2 %v815_v13 }
 0x192   : > { %v683_v15 = vld [vmem:[#allocation5 + $0x828] sm:$0xff]  ;;  %1928 = vmatpush.msrb.mxu3 %v883_v14 }
 0x193   : > { %v747_v16 = vld [vmem:[#allocation5 + $0xa28] sm:$0xff]  ;;  %1870 = vmatpush.msrb.mxu0 %v683_v15 }
 0x194   : > { %v811_v17 = vld [vmem:[#allocation5 + $0xc28] sm:$0xff]  ;;  %1890 = vmatpush.msrb.mxu1 %v747_v16 }
 0x195   : > { %v879_v18 = vld [vmem:[#allocation5 + $0xe48] sm:$0xff]  ;;  %1910 = vmatpush.msrb.mxu2 %v811_v17 }
 0x196   : > { %v679_v19 = vld [vmem:[#allocation5 + $0x808] sm:$0xff]  ;;  %1929 = vmatpush.msrb.mxu3 %v879_v18 }
 0x197   : > { %v743_v20 = vld [vmem:[#allocation5 + $0xa08] sm:$0xff]  ;;  %1871 = vmatpush.msrb.mxu0 %v679_v19 }
 0x198   : > { %v807_v23 = vld [vmem:[#allocation5 + $0xc08] sm:$0xff]  ;;  %1891 = vmatpush.msrb.mxu1 %v743_v20  ;;  %1872 = vmatmul.f32.vlgmr.msrb.gmra.mxu0 %v4641_v30 }
 0x199   : > { %v875_v24 = vld [vmem:[#allocation5 + $0xe28] sm:$0xff]  ;;  %1911 = vmatpush.msrb.mxu2 %v807_v23  ;;  %1892 = vmatmul.f32.vlgmr.msrb.gmra.mxu1 %v4647_v37 }
 0x19a   : > { %v995_v26 = vld [vmem:[#allocation5 + $0x11e8] sm:$0xff]  ;;  %1930 = vmatpush.msrb.mxu3 %v875_v24  ;;  %1912 = vmatmul.f32.vlgmr.msrb.gmra.mxu2 %v4638_v25 }
 0x19b   : > { %v1059_v27 = vld [vmem:[#allocation5 + $0x13e8] sm:$0xff]  ;;  %1936 = vmatpush.msra.mxu0 %v995_v26 }
 0x19c   : > { %v1123_v28 = vld [vmem:[#allocation5 + $0x15e8] sm:$0xff]  ;;  %1956 = vmatpush.msra.mxu1 %v1059_v27 }
 0x19d   : > { %v871_v29 = vld [vmem:[#allocation5 + $0xe08] sm:$0xff]  ;;  %1976 = vmatpush.msra.mxu2 %v1123_v28 }
 0x19e   : > { %v991_v34 = vld [vmem:[#allocation5 + $0x11c8] sm:$0xff]  ;;  %1931 = vmatpush.msrb.mxu3 %v871_v29 }
 0x19f   : > { %v1055_v35 = vld [vmem:[#allocation5 + $0x13c8] sm:$0xff]  ;;  %1937 = vmatpush.msra.mxu0 %v991_v34  ;;  %1932 = vmatmul.f32.vlgmr.msrb.gmra.mxu3 %v4644_v33 }
 0x1a0   : > { %v1119_v36 = vld [vmem:[#allocation5 + $0x15c8] sm:$0xff]  ;;  %1957 = vmatpush.msra.mxu1 %v1055_v35 }
 0x1a1   : > { %v1187_v38 = vld [vmem:[#allocation5 + $0x17e8] sm:$0xff]  ;;  %1977 = vmatpush.msra.mxu2 %v1119_v36 }
 0x1a2   : > { %v987_v39 = vld [vmem:[#allocation5 + $0x11a8] sm:$0xff]  ;;  %1996 = vmatpush.msra.mxu3 %v1187_v38 }
 0x1a3   : > { %v1051_v40 = vld [vmem:[#allocation5 + $0x13a8] sm:$0xff]  ;;  %1938 = vmatpush.msra.mxu0 %v987_v39 }
 0x1a4   : > { %v1115_v41 = vld [vmem:[#allocation5 + $0x15a8] sm:$0xff]  ;;  %1958 = vmatpush.msra.mxu1 %v1051_v40 }
 0x1a5   : > { %v1183_v42 = vld [vmem:[#allocation5 + $0x17c8] sm:$0xff]  ;;  %1978 = vmatpush.msra.mxu2 %v1115_v41 }
 0x1a6   : > { %v983_v43 = vld [vmem:[#allocation5 + $0x1188] sm:$0xff]  ;;  %1997 = vmatpush.msra.mxu3 %v1183_v42 }
 0x1a7   : > { %v1047_v44 = vld [vmem:[#allocation5 + $0x1388] sm:$0xff]  ;;  %1939 = vmatpush.msra.mxu0 %v983_v43 }
 0x1a8   : > { %v1111_v47 = vld [vmem:[#allocation5 + $0x1588] sm:$0xff]  ;;  %1959 = vmatpush.msra.mxu1 %v1047_v44 }
 0x1a9   : > { %v1179_v48 = vld [vmem:[#allocation5 + $0x17a8] sm:$0xff]  ;;  %1979 = vmatpush.msra.mxu2 %v1111_v47 }
 0x1aa   : > { %v979_v49 = vld [vmem:[#allocation5 + $0x1168] sm:$0xff]  ;;  %1998 = vmatpush.msra.mxu3 %v1179_v48 }
 0x1ab   : > { %v1043_v50 = vld [vmem:[#allocation5 + $0x1368] sm:$0xff]  ;;  %1940 = vmatpush.msra.mxu0 %v979_v49 }
 0x1ac   : > { %v1107_v51 = vld [vmem:[#allocation5 + $0x1568] sm:$0xff]  ;;  %1960 = vmatpush.msra.mxu1 %v1043_v50 }
 0x1ad   : > { %v1175_v52 = vld [vmem:[#allocation5 + $0x1788] sm:$0xff]  ;;  %1980 = vmatpush.msra.mxu2 %v1107_v51 }
 0x1ae   : > { %v975_v55 = vld [vmem:[#allocation5 + $0x1148] sm:$0xff]  ;;  %1999 = vmatpush.msra.mxu3 %v1175_v52 }
 0x1af   : > { %v1039_v56 = vld [vmem:[#allocation5 + $0x1348] sm:$0xff]  ;;  %1941 = vmatpush.msra.mxu0 %v975_v55 }
 0x1b0   : > { %v1103_v57 = vld [vmem:[#allocation5 + $0x1548] sm:$0xff]  ;;  %1961 = vmatpush.msra.mxu1 %v1039_v56 }
 0x1b1   : > { %v1171_v58 = vld [vmem:[#allocation5 + $0x1768] sm:$0xff]  ;;  %1981 = vmatpush.msra.mxu2 %v1103_v57 }
 0x1b2   : > { %v971_v59 = vld [vmem:[#allocation5 + $0x1128] sm:$0xff]  ;;  %2000 = vmatpush.msra.mxu3 %v1171_v58 }
 0x1b3   : > { %v1035_v60 = vld [vmem:[#allocation5 + $0x1328] sm:$0xff]  ;;  %1942 = vmatpush.msra.mxu0 %v971_v59 }
 0x1b4   : > { %v1099_v61 = vld [vmem:[#allocation5 + $0x1528] sm:$0xff]  ;;  %1962 = vmatpush.msra.mxu1 %v1035_v60 }
 0x1b5   : > { %v1167_v62 = vld [vmem:[#allocation5 + $0x1748] sm:$0xff]  ;;  %1982 = vmatpush.msra.mxu2 %v1099_v61 }
 0x1b6   : > { %v967_v63 = vld [vmem:[#allocation5 + $0x1108] sm:$0xff]  ;;  %2001 = vmatpush.msra.mxu3 %v1167_v62 }
 0x1b7   : > { %v1031_v0 = vld [vmem:[#allocation5 + $0x1308] sm:$0xff]  ;;  %1943 = vmatpush.msra.mxu0 %v967_v63 }
 0x1b8   : > { %v1095_v1 = vld [vmem:[#allocation5 + $0x1508] sm:$0xff]  ;;  %1963 = vmatpush.msra.mxu1 %v1031_v0 }
 0x1b9   : > { %v1163_v5 = vld [vmem:[#allocation5 + $0x1728] sm:$0xff]  ;;  %1983 = vmatpush.msra.mxu2 %v1095_v1 }
 0x1ba   : > { %v963_v6 = vld [vmem:[#allocation5 + $0x10e8] sm:$0xff]  ;;  %2002 = vmatpush.msra.mxu3 %v1163_v5 }
 0x1bb   : > { %v1027_v7 = vld [vmem:[#allocation5 + $0x12e8] sm:$0xff]  ;;  %1944 = vmatpush.msra.mxu0 %v963_v6 }
 0x1bc   : > { %v1091_v8 = vld [vmem:[#allocation5 + $0x14e8] sm:$0xff]  ;;  %1964 = vmatpush.msra.mxu1 %v1027_v7 }
 0x1bd   : > { %v1159_v9 = vld [vmem:[#allocation5 + $0x1708] sm:$0xff]  ;;  %1984 = vmatpush.msra.mxu2 %v1091_v8 }
 0x1be   : > { %v959_v11 = vld [vmem:[#allocation5 + $0x10c8] sm:$0xff]  ;;  %2003 = vmatpush.msra.mxu3 %v1159_v9 }
 0x1bf   : > { %v1023_v12 = vld [vmem:[#allocation5 + $0x12c8] sm:$0xff]  ;;  %1945 = vmatpush.msra.mxu0 %v959_v11 }
 0x1c0   : > { %v1087_v13 = vld [vmem:[#allocation5 + $0x14c8] sm:$0xff]  ;;  %1965 = vmatpush.msra.mxu1 %v1023_v12 }
 0x1c1   : > { %v1155_v14 = vld [vmem:[#allocation5 + $0x16e8] sm:$0xff]  ;;  %1985 = vmatpush.msra.mxu2 %v1087_v13 }
 0x1c2   : > { %v955_v15 = vld [vmem:[#allocation5 + $0x10a8] sm:$0xff]  ;;  %2004 = vmatpush.msra.mxu3 %v1155_v14 }
 0x1c3   : > { %v1019_v16 = vld [vmem:[#allocation5 + $0x12a8] sm:$0xff]  ;;  %1946 = vmatpush.msra.mxu0 %v955_v15 }
 0x1c4   : > { %v1083_v17 = vld [vmem:[#allocation5 + $0x14a8] sm:$0xff]  ;;  %1966 = vmatpush.msra.mxu1 %v1019_v16 }
 0x1c5   : > { %v1151_v18 = vld [vmem:[#allocation5 + $0x16c8] sm:$0xff]  ;;  %1986 = vmatpush.msra.mxu2 %v1083_v17 }
 0x1c6   : > { %v951_v19 = vld [vmem:[#allocation5 + $0x1088] sm:$0xff]  ;;  %2005 = vmatpush.msra.mxu3 %v1151_v18 }
 0x1c7   : > { %v1015_v20 = vld [vmem:[#allocation5 + $0x1288] sm:$0xff]  ;;  %1947 = vmatpush.msra.mxu0 %v951_v19 }
 0x1c8   : > { %v1079_v23 = vld [vmem:[#allocation5 + $0x1488] sm:$0xff]  ;;  %1967 = vmatpush.msra.mxu1 %v1015_v20 }
 0x1c9   : > { %v1147_v24 = vld [vmem:[#allocation5 + $0x16a8] sm:$0xff]  ;;  %1987 = vmatpush.msra.mxu2 %v1079_v23 }
 0x1ca   : > { %v947_v26 = vld [vmem:[#allocation5 + $0x1068] sm:$0xff]  ;;  %2006 = vmatpush.msra.mxu3 %v1147_v24 }
 0x1cb   : > { %v1011_v27 = vld [vmem:[#allocation5 + $0x1268] sm:$0xff]  ;;  %1948 = vmatpush.msra.mxu0 %v947_v26 }
 0x1cc   : > { %v1075_v28 = vld [vmem:[#allocation5 + $0x1468] sm:$0xff]  ;;  %1968 = vmatpush.msra.mxu1 %v1011_v27 }
 0x1cd   : > { %v1143_v29 = vld [vmem:[#allocation5 + $0x1688] sm:$0xff]  ;;  %1988 = vmatpush.msra.mxu2 %v1075_v28 }
 0x1ce   : > { %v943_v34 = vld [vmem:[#allocation5 + $0x1048] sm:$0xff]  ;;  %2007 = vmatpush.msra.mxu3 %v1143_v29 }
 0x1cf   : > { %v1007_v35 = vld [vmem:[#allocation5 + $0x1248] sm:$0xff]  ;;  %1949 = vmatpush.msra.mxu0 %v943_v34 }
 0x1d0   : > { %v1071_v36 = vld [vmem:[#allocation5 + $0x1448] sm:$0xff]  ;;  %1969 = vmatpush.msra.mxu1 %v1007_v35 }
 0x1d1   : > { %v1139_v38 = vld [vmem:[#allocation5 + $0x1668] sm:$0xff]  ;;  %1989 = vmatpush.msra.mxu2 %v1071_v36 }
 0x1d2   : > { %v939_v39 = vld [vmem:[#allocation5 + $0x1028] sm:$0xff]  ;;  %2008 = vmatpush.msra.mxu3 %v1139_v38 }
 0x1d3   : > { %v1003_v40 = vld [vmem:[#allocation5 + $0x1228] sm:$0xff]  ;;  %1950 = vmatpush.msra.mxu0 %v939_v39 }
 0x1d4   : > { %v1067_v41 = vld [vmem:[#allocation5 + $0x1428] sm:$0xff]  ;;  %1970 = vmatpush.msra.mxu1 %v1003_v40 }
 0x1d5   : > { %v1135_v42 = vld [vmem:[#allocation5 + $0x1648] sm:$0xff]  ;;  %1990 = vmatpush.msra.mxu2 %v1067_v41 }
 0x1d6   : > { %v935_v43 = vld [vmem:[#allocation5 + $0x1008] sm:$0xff]  ;;  %2009 = vmatpush.msra.mxu3 %v1135_v42 }
 0x1d7   : > { %v999_v44 = vld [vmem:[#allocation5 + $0x1208] sm:$0xff]  ;;  %1951 = vmatpush.msra.mxu0 %v935_v43 }
 0x1d8   : > { %v1063_v47 = vld [vmem:[#allocation5 + $0x1408] sm:$0xff]  ;;  %1971 = vmatpush.msra.mxu1 %v999_v44  ;;  %1952 = vmatmul.f32.vlgmr.msra.gmra.mxu0 %v4654_v21 }
 0x1d9   : > { %v1131_v48 = vld [vmem:[#allocation5 + $0x1628] sm:$0xff]  ;;  %1991 = vmatpush.msra.mxu2 %v1063_v47  ;;  %1972 = vmatmul.f32.vlgmr.msra.gmra.mxu1 %v4660_v31 }
 0x1da   : > { %v1251_v49 = vld [vmem:[#allocation5 + $0x19e8] sm:$0xff]  ;;  %2010 = vmatpush.msra.mxu3 %v1131_v48  ;;  %1992 = vmatmul.f32.vlgmr.msra.gmra.mxu2 %v4656_v22 }
 0x1db   : > { %v1315_v50 = vld [vmem:[#allocation5 + $0x1be8] sm:$0xff]  ;;  %2016 = vmatpush.msrb.mxu0 %v1251_v49 }
 0x1dc   : > { %v1379_v51 = vld [vmem:[#allocation5 + $0x1de8] sm:$0xff]  ;;  %2036 = vmatpush.msrb.mxu1 %v1315_v50 }
 0x1dd   : > { %v1127_v52 = vld [vmem:[#allocation5 + $0x1608] sm:$0xff]  ;;  %2056 = vmatpush.msrb.mxu2 %v1379_v51 }
 0x1de   : > { %v1247_v55 = vld [vmem:[#allocation5 + $0x19c8] sm:$0xff]  ;;  %2011 = vmatpush.msra.mxu3 %v1127_v52 }
 0x1df   : > { %v1311_v56 = vld [vmem:[#allocation5 + $0x1bc8] sm:$0xff]  ;;  %2012 = vmatmul.f32.vlgmr.msra.gmra.mxu3 %v4662_v32  ;;  %2017 = vmatpush.msrb.mxu0 %v1247_v55 }
 0x1e0   : > { %v1375_v57 = vld [vmem:[#allocation5 + $0x1dc8] sm:$0xff]  ;;  %2037 = vmatpush.msrb.mxu1 %v1311_v56 }
 0x1e1   : > { %v1443_v58 = vld [vmem:[#allocation5 + $0x1fe8] sm:$0xff]  ;;  %2057 = vmatpush.msrb.mxu2 %v1375_v57 }
 0x1e2   : > { %v1243_v59 = vld [vmem:[#allocation5 + $0x19a8] sm:$0xff]  ;;  %2076 = vmatpush.msrb.mxu3 %v1443_v58 }
 0x1e3   : > { %v1307_v60 = vld [vmem:[#allocation5 + $0x1ba8] sm:$0xff]  ;;  %2018 = vmatpush.msrb.mxu0 %v1243_v59 }
 0x1e4   : > { %v1371_v61 = vld [vmem:[#allocation5 + $0x1da8] sm:$0xff]  ;;  %2038 = vmatpush.msrb.mxu1 %v1307_v60 }
 0x1e5   : > { %v1439_v62 = vld [vmem:[#allocation5 + $0x1fc8] sm:$0xff]  ;;  %2058 = vmatpush.msrb.mxu2 %v1371_v61 }
 0x1e6   : > { %v1239_v63 = vld [vmem:[#allocation5 + $0x1988] sm:$0xff]  ;;  %2077 = vmatpush.msrb.mxu3 %v1439_v62 }
 0x1e7   : > { %v1303_v0 = vld [vmem:[#allocation5 + $0x1b88] sm:$0xff]  ;;  %2019 = vmatpush.msrb.mxu0 %v1239_v63 }
 0x1e8   : > { %v1367_v1 = vld [vmem:[#allocation5 + $0x1d88] sm:$0xff]  ;;  %2039 = vmatpush.msrb.mxu1 %v1303_v0 }
 0x1e9   : > { %v1435_v5 = vld [vmem:[#allocation5 + $0x1fa8] sm:$0xff]  ;;  %2059 = vmatpush.msrb.mxu2 %v1367_v1 }
 0x1ea   : > { %v1235_v6 = vld [vmem:[#allocation5 + $0x1968] sm:$0xff]  ;;  %2078 = vmatpush.msrb.mxu3 %v1435_v5 }
 0x1eb   : > { %v1299_v7 = vld [vmem:[#allocation5 + $0x1b68] sm:$0xff]  ;;  %2020 = vmatpush.msrb.mxu0 %v1235_v6  ;;  %v484_v6 = vld [vmem:[#allocation5 + $0x1f0] sm:$0xff] }
 0x1ec   : > { %v1363_v8 = vld [vmem:[#allocation5 + $0x1d68] sm:$0xff]  ;;  %2040 = vmatpush.msrb.mxu1 %v1299_v7  ;;  %v548_v7 = vld [vmem:[#allocation5 + $0x3f0] sm:$0xff] }
 0x1ed   : > { %v1431_v9 = vld [vmem:[#allocation5 + $0x1f88] sm:$0xff]  ;;  %2060 = vmatpush.msrb.mxu2 %v1363_v8  ;;  %v612_v8 = vld [vmem:[#allocation5 + $0x5f0] sm:$0xff] }
 0x1ee   : > { %v1231_v11 = vld [vmem:[#allocation5 + $0x1948] sm:$0xff]  ;;  %2079 = vmatpush.msrb.mxu3 %v1431_v9 }
 0x1ef   : > { %v1295_v12 = vld [vmem:[#allocation5 + $0x1b48] sm:$0xff]  ;;  %2021 = vmatpush.msrb.mxu0 %v1231_v11  ;;  %v480_v11 = vld [vmem:[#allocation5 + $0x1d0] sm:$0xff] }
 0x1f0   : > { %v1359_v13 = vld [vmem:[#allocation5 + $0x1d48] sm:$0xff]  ;;  %2041 = vmatpush.msrb.mxu1 %v1295_v12  ;;  %v544_v12 = vld [vmem:[#allocation5 + $0x3d0] sm:$0xff] }
 0x1f1   : > { %v1427_v14 = vld [vmem:[#allocation5 + $0x1f68] sm:$0xff]  ;;  %2061 = vmatpush.msrb.mxu2 %v1359_v13  ;;  %v608_v13 = vld [vmem:[#allocation5 + $0x5d0] sm:$0xff] }
 0x1f2   : > { %v1227_v15 = vld [vmem:[#allocation5 + $0x1928] sm:$0xff]  ;;  %2080 = vmatpush.msrb.mxu3 %v1427_v14  ;;  %v676_v14 = vld [vmem:[#allocation5 + $0x7f0] sm:$0xff] }
 0x1f3   : > { %v1291_v16 = vld [vmem:[#allocation5 + $0x1b28] sm:$0xff]  ;;  %2022 = vmatpush.msrb.mxu0 %v1227_v15  ;;  %v476_v15 = vld [vmem:[#allocation5 + $0x1b0] sm:$0xff] }
 0x1f4   : > { %v1355_v17 = vld [vmem:[#allocation5 + $0x1d28] sm:$0xff]  ;;  %2042 = vmatpush.msrb.mxu1 %v1291_v16  ;;  %v540_v16 = vld [vmem:[#allocation5 + $0x3b0] sm:$0xff] }
 0x1f5   : > { %v1423_v18 = vld [vmem:[#allocation5 + $0x1f48] sm:$0xff]  ;;  %2062 = vmatpush.msrb.mxu2 %v1355_v17  ;;  %v604_v17 = vld [vmem:[#allocation5 + $0x5b0] sm:$0xff] }
 0x1f6   : > { %v1223_v19 = vld [vmem:[#allocation5 + $0x1908] sm:$0xff]  ;;  %2081 = vmatpush.msrb.mxu3 %v1423_v18  ;;  %v672_v18 = vld [vmem:[#allocation5 + $0x7d0] sm:$0xff] }
 0x1f7   : > { %v1287_v20 = vld [vmem:[#allocation5 + $0x1b08] sm:$0xff]  ;;  %2023 = vmatpush.msrb.mxu0 %v1223_v19  ;;  %v472_v19 = vld [vmem:[#allocation5 + $0x190] sm:$0xff] }
 0x1f8   : > { %v1351_v23 = vld [vmem:[#allocation5 + $0x1d08] sm:$0xff]  ;;  %2043 = vmatpush.msrb.mxu1 %v1287_v20  ;;  %v536_v20 = vld [vmem:[#allocation5 + $0x390] sm:$0xff] }
 0x1f9   : > { %v1419_v24 = vld [vmem:[#allocation5 + $0x1f28] sm:$0xff]  ;;  %2063 = vmatpush.msrb.mxu2 %v1351_v23  ;;  %v600_v23 = vld [vmem:[#allocation5 + $0x590] sm:$0xff] }
 0x1fa   : > { %v1219_v26 = vld [vmem:[#allocation5 + $0x18e8] sm:$0xff]  ;;  %2082 = vmatpush.msrb.mxu3 %v1419_v24  ;;  %v668_v24 = vld [vmem:[#allocation5 + $0x7b0] sm:$0xff] }
 0x1fb   : > { %v1283_v27 = vld [vmem:[#allocation5 + $0x1ae8] sm:$0xff]  ;;  %2024 = vmatpush.msrb.mxu0 %v1219_v26  ;;  %v468_v26 = vld [vmem:[#allocation5 + $0x170] sm:$0xff] }
 0x1fc   : > { %v1347_v28 = vld [vmem:[#allocation5 + $0x1ce8] sm:$0xff]  ;;  %2044 = vmatpush.msrb.mxu1 %v1283_v27  ;;  %v532_v27 = vld [vmem:[#allocation5 + $0x370] sm:$0xff] }
 0x1fd   : > { %v1415_v29 = vld [vmem:[#allocation5 + $0x1f08] sm:$0xff]  ;;  %2064 = vmatpush.msrb.mxu2 %v1347_v28  ;;  %v596_v28 = vld [vmem:[#allocation5 + $0x570] sm:$0xff] }
 0x1fe   : > { %v1215_v34 = vld [vmem:[#allocation5 + $0x18c8] sm:$0xff]  ;;  %2083 = vmatpush.msrb.mxu3 %v1415_v29  ;;  %v664_v29 = vld [vmem:[#allocation5 + $0x790] sm:$0xff] }
 0x1ff   : > { %v1279_v35 = vld [vmem:[#allocation5 + $0x1ac8] sm:$0xff]  ;;  %2025 = vmatpush.msrb.mxu0 %v1215_v34  ;;  %v464_v34 = vld [vmem:[#allocation5 + $0x150] sm:$0xff] }
 0x200   : > { %v1343_v36 = vld [vmem:[#allocation5 + $0x1cc8] sm:$0xff]  ;;  %2045 = vmatpush.msrb.mxu1 %v1279_v35  ;;  %v528_v35 = vld [vmem:[#allocation5 + $0x350] sm:$0xff] }
 0x201   : > { %v1411_v38 = vld [vmem:[#allocation5 + $0x1ee8] sm:$0xff]  ;;  %2065 = vmatpush.msrb.mxu2 %v1343_v36  ;;  %v592_v36 = vld [vmem:[#allocation5 + $0x550] sm:$0xff] }
 0x202   : > { %v1211_v39 = vld [vmem:[#allocation5 + $0x18a8] sm:$0xff]  ;;  %2084 = vmatpush.msrb.mxu3 %v1411_v38  ;;  %v660_v38 = vld [vmem:[#allocation5 + $0x770] sm:$0xff] }
 0x203   : > { %v1275_v40 = vld [vmem:[#allocation5 + $0x1aa8] sm:$0xff]  ;;  %2026 = vmatpush.msrb.mxu0 %v1211_v39  ;;  %v460_v39 = vld [vmem:[#allocation5 + $0x130] sm:$0xff] }
 0x204   : > { %v1339_v41 = vld [vmem:[#allocation5 + $0x1ca8] sm:$0xff]  ;;  %2046 = vmatpush.msrb.mxu1 %v1275_v40  ;;  %v524_v40 = vld [vmem:[#allocation5 + $0x330] sm:$0xff] }
 0x205   : > { %v1407_v42 = vld [vmem:[#allocation5 + $0x1ec8] sm:$0xff]  ;;  %2066 = vmatpush.msrb.mxu2 %v1339_v41  ;;  %v588_v41 = vld [vmem:[#allocation5 + $0x530] sm:$0xff] }
 0x206   : > { %v1207_v43 = vld [vmem:[#allocation5 + $0x1888] sm:$0xff]  ;;  %2085 = vmatpush.msrb.mxu3 %v1407_v42  ;;  %v656_v42 = vld [vmem:[#allocation5 + $0x750] sm:$0xff] }
 0x207   : > { %v1271_v44 = vld [vmem:[#allocation5 + $0x1a88] sm:$0xff]  ;;  %2027 = vmatpush.msrb.mxu0 %v1207_v43  ;;  %v456_v43 = vld [vmem:[#allocation5 + $0x110] sm:$0xff] }
 0x208   : > { %v1335_v47 = vld [vmem:[#allocation5 + $0x1c88] sm:$0xff]  ;;  %2047 = vmatpush.msrb.mxu1 %v1271_v44  ;;  %v520_v44 = vld [vmem:[#allocation5 + $0x310] sm:$0xff] }
 0x209   : > { %v1403_v48 = vld [vmem:[#allocation5 + $0x1ea8] sm:$0xff]  ;;  %2067 = vmatpush.msrb.mxu2 %v1335_v47  ;;  %v584_v47 = vld [vmem:[#allocation5 + $0x510] sm:$0xff] }
 0x20a   : > { %v1203_v49 = vld [vmem:[#allocation5 + $0x1868] sm:$0xff]  ;;  %2086 = vmatpush.msrb.mxu3 %v1403_v48  ;;  %v652_v48 = vld [vmem:[#allocation5 + $0x730] sm:$0xff] }
 0x20b   : > { %v1267_v50 = vld [vmem:[#allocation5 + $0x1a68] sm:$0xff]  ;;  %2028 = vmatpush.msrb.mxu0 %v1203_v49  ;;  %v452_v49 = vld [vmem:[#allocation5 + $0xf0] sm:$0xff] }
 0x20c   : > { %v1331_v51 = vld [vmem:[#allocation5 + $0x1c68] sm:$0xff]  ;;  %2048 = vmatpush.msrb.mxu1 %v1267_v50  ;;  %v516_v50 = vld [vmem:[#allocation5 + $0x2f0] sm:$0xff] }
 0x20d   : > { %v1399_v52 = vld [vmem:[#allocation5 + $0x1e88] sm:$0xff]  ;;  %2068 = vmatpush.msrb.mxu2 %v1331_v51  ;;  %v580_v51 = vld [vmem:[#allocation5 + $0x4f0] sm:$0xff] }
 0x20e   : > { %v1199_v55 = vld [vmem:[#allocation5 + $0x1848] sm:$0xff]  ;;  %2087 = vmatpush.msrb.mxu3 %v1399_v52  ;;  %v648_v52 = vld [vmem:[#allocation5 + $0x710] sm:$0xff] }
 0x20f   : > { %v1263_v56 = vld [vmem:[#allocation5 + $0x1a48] sm:$0xff]  ;;  %2029 = vmatpush.msrb.mxu0 %v1199_v55  ;;  %v448_v55 = vld [vmem:[#allocation5 + $0xd0] sm:$0xff] }
 0x210   : > { %v1327_v57 = vld [vmem:[#allocation5 + $0x1c48] sm:$0xff]  ;;  %2049 = vmatpush.msrb.mxu1 %v1263_v56  ;;  %v512_v56 = vld [vmem:[#allocation5 + $0x2d0] sm:$0xff] }
 0x211   : > { %v1395_v58 = vld [vmem:[#allocation5 + $0x1e68] sm:$0xff]  ;;  %2069 = vmatpush.msrb.mxu2 %v1327_v57  ;;  %v576_v57 = vld [vmem:[#allocation5 + $0x4d0] sm:$0xff] }
 0x212   : > { %v1195_v59 = vld [vmem:[#allocation5 + $0x1828] sm:$0xff]  ;;  %2088 = vmatpush.msrb.mxu3 %v1395_v58  ;;  %v644_v58 = vld [vmem:[#allocation5 + $0x6f0] sm:$0xff] }
 0x213   : > { %v1259_v60 = vld [vmem:[#allocation5 + $0x1a28] sm:$0xff]  ;;  %2030 = vmatpush.msrb.mxu0 %v1195_v59  ;;  %v444_v59 = vld [vmem:[#allocation5 + $0xb0] sm:$0xff] }
 0x214   : > { %v1323_v61 = vld [vmem:[#allocation5 + $0x1c28] sm:$0xff]  ;;  %2050 = vmatpush.msrb.mxu1 %v1259_v60  ;;  %v508_v60 = vld [vmem:[#allocation5 + $0x2b0] sm:$0xff] }
 0x215   : > { %v1391_v62 = vld [vmem:[#allocation5 + $0x1e48] sm:$0xff]  ;;  %2070 = vmatpush.msrb.mxu2 %v1323_v61  ;;  %v572_v61 = vld [vmem:[#allocation5 + $0x4b0] sm:$0xff] }
 0x216   : > { %v1191_v63 = vld [vmem:[#allocation5 + $0x1808] sm:$0xff]  ;;  %2089 = vmatpush.msrb.mxu3 %v1391_v62  ;;  %v640_v62 = vld [vmem:[#allocation5 + $0x6d0] sm:$0xff] }
 0x217   : > { %v1255_v0 = vld [vmem:[#allocation5 + $0x1a08] sm:$0xff]  ;;  %2031 = vmatpush.msrb.mxu0 %v1191_v63  ;;  %v440_v63 = vld [vmem:[#allocation5 + $0x90] sm:$0xff] }
 0x218   : > { %v1319_v1 = vld [vmem:[#allocation5 + $0x1c08] sm:$0xff]  ;;  %2051 = vmatpush.msrb.mxu1 %v1255_v0  ;;  %2032 = vmatmul.f32.vlgmr.msrb.gmra.mxu0 %v4670_v45  ;;  %v504_v0 = vld [vmem:[#allocation5 + $0x290] sm:$0xff] }
 0x219   : > { %v1387_v5 = vld [vmem:[#allocation5 + $0x1e28] sm:$0xff]  ;;  %2071 = vmatpush.msrb.mxu2 %v1319_v1  ;;  %2096 = vmatpush.msra.mxu0 %v484_v6  ;;  %v568_v1 = vld [vmem:[#allocation5 + $0x490] sm:$0xff] }
 0x21a   : > { %2090 = vmatpush.msrb.mxu3 %v1387_v5  ;;  %v1383_v9 = vld [vmem:[#allocation5 + $0x1e08] sm:$0xff]  ;;  %2072 = vmatmul.f32.vlgmr.msrb.gmra.mxu2 %v4672_v46  ;;  %v636_v5 = vld [vmem:[#allocation5 + $0x6b0] sm:$0xff] }
 0x21b   : > { %2116 = vmatpush.msra.mxu1 %v548_v7  ;;  %2136 = vmatpush.msra.mxu2 %v612_v8  ;;  %v436_v6 = vld [vmem:[#allocation5 + $0x70] sm:$0xff] }
 0x21c   : > { %2091 = vmatpush.msrb.mxu3 %v1383_v9  ;;  %2052 = vmatmul.f32.vlgmr.msrb.gmra.mxu1 %v4676_v53  ;;  %v500_v7 = vld [vmem:[#allocation5 + $0x270] sm:$0xff] }
 0x21d   : > { %2092 = vmatmul.f32.vlgmr.msrb.gmra.mxu3 %v4678_v54  ;;  %2097 = vmatpush.msra.mxu0 %v480_v11  ;;  %v564_v8 = vld [vmem:[#allocation5 + $0x470] sm:$0xff] }
 0x21e   : > { %2117 = vmatpush.msra.mxu1 %v544_v12  ;;  %2137 = vmatpush.msra.mxu2 %v608_v13  ;;  %v632_v9 = vld [vmem:[#allocation5 + $0x690] sm:$0xff] }
 0x21f   : > { %2156 = vmatpush.msra.mxu3 %v676_v14  ;;  %2098 = vmatpush.msra.mxu0 %v476_v15  ;;  %v432_v11 = vld [vmem:[#allocation5 + $0x50] sm:$0xff] }
 0x220   : > { %2118 = vmatpush.msra.mxu1 %v540_v16  ;;  %2138 = vmatpush.msra.mxu2 %v604_v17  ;;  %v496_v12 = vld [vmem:[#allocation5 + $0x250] sm:$0xff] }
 0x221   : > { %2157 = vmatpush.msra.mxu3 %v672_v18  ;;  %2099 = vmatpush.msra.mxu0 %v472_v19  ;;  %v560_v13 = vld [vmem:[#allocation5 + $0x450] sm:$0xff] }
 0x222   : > { %2119 = vmatpush.msra.mxu1 %v536_v20  ;;  %2139 = vmatpush.msra.mxu2 %v600_v23  ;;  %v628_v14 = vld [vmem:[#allocation5 + $0x670] sm:$0xff] }
 0x223   : > { %2158 = vmatpush.msra.mxu3 %v668_v24  ;;  %2100 = vmatpush.msra.mxu0 %v468_v26  ;;  %v428_v15 = vld [vmem:[#allocation5 + $0x30] sm:$0xff] }
 0x224   : > { %2120 = vmatpush.msra.mxu1 %v532_v27  ;;  %2140 = vmatpush.msra.mxu2 %v596_v28  ;;  %v492_v16 = vld [vmem:[#allocation5 + $0x230] sm:$0xff] }
 0x225   : > { %2159 = vmatpush.msra.mxu3 %v664_v29  ;;  %2101 = vmatpush.msra.mxu0 %v464_v34  ;;  %v556_v17 = vld [vmem:[#allocation5 + $0x430] sm:$0xff] }
 0x226   : > { %2121 = vmatpush.msra.mxu1 %v528_v35  ;;  %2141 = vmatpush.msra.mxu2 %v592_v36  ;;  %v624_v18 = vld [vmem:[#allocation5 + $0x650] sm:$0xff] }
 0x227   : > { %2160 = vmatpush.msra.mxu3 %v660_v38  ;;  %2102 = vmatpush.msra.mxu0 %v460_v39  ;;  %v424_v19 = vld [vmem:[#allocation5 + $0x10] sm:$0xff] }
 0x228   : > { %2122 = vmatpush.msra.mxu1 %v524_v40  ;;  %2142 = vmatpush.msra.mxu2 %v588_v41  ;;  %v488_v20 = vld [vmem:[#allocation5 + $0x210] sm:$0xff] }
 0x229   : > { %2161 = vmatpush.msra.mxu3 %v656_v42  ;;  %2103 = vmatpush.msra.mxu0 %v456_v43  ;;  %v552_v23 = vld [vmem:[#allocation5 + $0x410] sm:$0xff] }
 0x22a   : > { %2123 = vmatpush.msra.mxu1 %v520_v44  ;;  %2143 = vmatpush.msra.mxu2 %v584_v47  ;;  %v620_v24 = vld [vmem:[#allocation5 + $0x630] sm:$0xff] }
 0x22b   : > { %2162 = vmatpush.msra.mxu3 %v652_v48  ;;  %2104 = vmatpush.msra.mxu0 %v452_v49  ;;  %v740_v26 = vld [vmem:[#allocation5 + $0x9f0] sm:$0xff] }
 0x22c   : > { %2124 = vmatpush.msra.mxu1 %v516_v50  ;;  %2144 = vmatpush.msra.mxu2 %v580_v51  ;;  %v804_v27 = vld [vmem:[#allocation5 + $0xbf0] sm:$0xff] }
 0x22d   : > { %2163 = vmatpush.msra.mxu3 %v648_v52  ;;  %2105 = vmatpush.msra.mxu0 %v448_v55  ;;  %v868_v28 = vld [vmem:[#allocation5 + $0xdf0] sm:$0xff] }
 0x22e   : > { %2125 = vmatpush.msra.mxu1 %v512_v56  ;;  %2145 = vmatpush.msra.mxu2 %v576_v57  ;;  %v616_v29 = vld [vmem:[#allocation5 + $0x610] sm:$0xff] }
 0x22f   : > { %2164 = vmatpush.msra.mxu3 %v644_v58  ;;  %2106 = vmatpush.msra.mxu0 %v444_v59  ;;  %v736_v34 = vld [vmem:[#allocation5 + $0x9d0] sm:$0xff] }
 0x230   : > { %2126 = vmatpush.msra.mxu1 %v508_v60  ;;  %2146 = vmatpush.msra.mxu2 %v572_v61  ;;  %v800_v35 = vld [vmem:[#allocation5 + $0xbd0] sm:$0xff] }
 0x231   : > { %2165 = vmatpush.msra.mxu3 %v640_v62  ;;  %2107 = vmatpush.msra.mxu0 %v440_v63  ;;  %v864_v36 = vld [vmem:[#allocation5 + $0xdd0] sm:$0xff] }
 0x232   : > { %2127 = vmatpush.msra.mxu1 %v504_v0  ;;  %2147 = vmatpush.msra.mxu2 %v568_v1  ;;  %v932_v38 = vld [vmem:[#allocation5 + $0xff0] sm:$0xff] }
 0x233   : > { %2166 = vmatpush.msra.mxu3 %v636_v5  ;;  %2108 = vmatpush.msra.mxu0 %v436_v6  ;;  %v732_v39 = vld [vmem:[#allocation5 + $0x9b0] sm:$0xff] }
 0x234   : > { %2128 = vmatpush.msra.mxu1 %v500_v7  ;;  %2148 = vmatpush.msra.mxu2 %v564_v8  ;;  %v796_v40 = vld [vmem:[#allocation5 + $0xbb0] sm:$0xff] }
 0x235   : > { %2167 = vmatpush.msra.mxu3 %v632_v9  ;;  %2109 = vmatpush.msra.mxu0 %v432_v11  ;;  %v860_v41 = vld [vmem:[#allocation5 + $0xdb0] sm:$0xff] }
 0x236   : > { %2129 = vmatpush.msra.mxu1 %v496_v12  ;;  %2149 = vmatpush.msra.mxu2 %v560_v13  ;;  %v928_v42 = vld [vmem:[#allocation5 + $0xfd0] sm:$0xff] }
 0x237   : > { %2168 = vmatpush.msra.mxu3 %v628_v14  ;;  %2110 = vmatpush.msra.mxu0 %v428_v15  ;;  %v728_v43 = vld [vmem:[#allocation5 + $0x990] sm:$0xff] }
 0x238   : > { %2130 = vmatpush.msra.mxu1 %v492_v16  ;;  %2150 = vmatpush.msra.mxu2 %v556_v17  ;;  %v792_v44 = vld [vmem:[#allocation5 + $0xb90] sm:$0xff] }
 0x239   : > { %2169 = vmatpush.msra.mxu3 %v624_v18  ;;  %2111 = vmatpush.msra.mxu0 %v424_v19  ;;  %v856_v47 = vld [vmem:[#allocation5 + $0xd90] sm:$0xff] }
 0x23a   : > { %2131 = vmatpush.msra.mxu1 %v488_v20  ;;  %2151 = vmatpush.msra.mxu2 %v552_v23  ;;  %v924_v48 = vld [vmem:[#allocation5 + $0xfb0] sm:$0xff] }
 0x23b   : > { %2170 = vmatpush.msra.mxu3 %v620_v24  ;;  %2176 = vmatpush.msrb.mxu0 %v740_v26  ;;  %v724_v49 = vld [vmem:[#allocation5 + $0x970] sm:$0xff] }
 0x23c   : > { %2196 = vmatpush.msrb.mxu1 %v804_v27  ;;  %2216 = vmatpush.msrb.mxu2 %v868_v28  ;;  %v788_v50 = vld [vmem:[#allocation5 + $0xb70] sm:$0xff] }
 0x23d   : > { %2171 = vmatpush.msra.mxu3 %v616_v29  ;;  %2177 = vmatpush.msrb.mxu0 %v736_v34  ;;  %v852_v51 = vld [vmem:[#allocation5 + $0xd70] sm:$0xff] }
 0x23e   : > { %2197 = vmatpush.msrb.mxu1 %v800_v35  ;;  %2217 = vmatpush.msrb.mxu2 %v864_v36  ;;  %v920_v52 = vld [vmem:[#allocation5 + $0xf90] sm:$0xff] }
 0x23f   : > { %2236 = vmatpush.msrb.mxu3 %v932_v38  ;;  %2178 = vmatpush.msrb.mxu0 %v732_v39  ;;  %v720_v55 = vld [vmem:[#allocation5 + $0x950] sm:$0xff] }
 0x240   : > { %2198 = vmatpush.msrb.mxu1 %v796_v40  ;;  %2218 = vmatpush.msrb.mxu2 %v860_v41  ;;  %v784_v56 = vld [vmem:[#allocation5 + $0xb50] sm:$0xff] }
 0x241   : > { %2237 = vmatpush.msrb.mxu3 %v928_v42  ;;  %2179 = vmatpush.msrb.mxu0 %v728_v43  ;;  %v848_v57 = vld [vmem:[#allocation5 + $0xd50] sm:$0xff] }
 0x242   : > { %2199 = vmatpush.msrb.mxu1 %v792_v44  ;;  %2219 = vmatpush.msrb.mxu2 %v856_v47  ;;  %v916_v58 = vld [vmem:[#allocation5 + $0xf70] sm:$0xff] }
 0x243   : > { %2238 = vmatpush.msrb.mxu3 %v924_v48  ;;  %2180 = vmatpush.msrb.mxu0 %v724_v49  ;;  %v716_v59 = vld [vmem:[#allocation5 + $0x930] sm:$0xff] }
 0x244   : > { %2200 = vmatpush.msrb.mxu1 %v788_v50  ;;  %2220 = vmatpush.msrb.mxu2 %v852_v51  ;;  %v780_v60 = vld [vmem:[#allocation5 + $0xb30] sm:$0xff] }
 0x245   : > { %2239 = vmatpush.msrb.mxu3 %v920_v52  ;;  %2181 = vmatpush.msrb.mxu0 %v720_v55  ;;  %v844_v61 = vld [vmem:[#allocation5 + $0xd30] sm:$0xff] }
 0x246   : > { %2201 = vmatpush.msrb.mxu1 %v784_v56  ;;  %v912_v62 = vld [vmem:[#allocation5 + $0xf50] sm:$0xff]  ;;  %2221 = vmatpush.msrb.mxu2 %v848_v57 }
 0x247   : > { %2240 = vmatpush.msrb.mxu3 %v916_v58  ;;  %v712_v63 = vld [vmem:[#allocation5 + $0x910] sm:$0xff]  ;;  %2182 = vmatpush.msrb.mxu0 %v716_v59 }
 0x248   : > { %v776_v0 = vld [vmem:[#allocation5 + $0xb10] sm:$0xff]  ;;  %2202 = vmatpush.msrb.mxu1 %v780_v60  ;;  %2222 = vmatpush.msrb.mxu2 %v844_v61 }
 0x249   : > { %v840_v1 = vld [vmem:[#allocation5 + $0xd10] sm:$0xff]  ;;  %2241 = vmatpush.msrb.mxu3 %v912_v62  ;;  %2183 = vmatpush.msrb.mxu0 %v712_v63 }
 0x24a   : > { %v908_v5 = vld [vmem:[#allocation5 + $0xf30] sm:$0xff]  ;;  %2203 = vmatpush.msrb.mxu1 %v776_v0  ;;  %2223 = vmatpush.msrb.mxu2 %v840_v1 }
 0x24b   : > { %v708_v6 = vld [vmem:[#allocation5 + $0x8f0] sm:$0xff]  ;;  %2242 = vmatpush.msrb.mxu3 %v908_v5  ;;  %2112 = vmatmul.f32.vlgmr.msra.gmra.mxu0 %v4623_v2 }
 0x24c   : > { %v772_v7 = vld [vmem:[#allocation5 + $0xaf0] sm:$0xff]  ;;  %2184 = vmatpush.msrb.mxu0 %v708_v6  ;;  %2132 = vmatmul.f32.vlgmr.msra.gmra.mxu1 %v4625_v3 }
 0x24d   : > { %v836_v8 = vld [vmem:[#allocation5 + $0xcf0] sm:$0xff]  ;;  %2204 = vmatpush.msrb.mxu1 %v772_v7  ;;  %2152 = vmatmul.f32.vlgmr.msra.gmra.mxu2 %v4627_v4 }
 0x24e   : > { %v904_v9 = vld [vmem:[#allocation5 + $0xf10] sm:$0xff]  ;;  %2224 = vmatpush.msrb.mxu2 %v836_v8  ;;  %2172 = vmatmul.f32.vlgmr.msra.gmra.mxu3 %v4632_v10 }
 0x24f   : > { %v704_v11 = vld [vmem:[#allocation5 + $0x8d0] sm:$0xff]  ;;  %2243 = vmatpush.msrb.mxu3 %v904_v9 }
 0x250   : > { %v768_v12 = vld [vmem:[#allocation5 + $0xad0] sm:$0xff]  ;;  %2185 = vmatpush.msrb.mxu0 %v704_v11 }
 0x251   : > { %v832_v13 = vld [vmem:[#allocation5 + $0xcd0] sm:$0xff]  ;;  %2205 = vmatpush.msrb.mxu1 %v768_v12 }
 0x252   : > { %v900_v14 = vld [vmem:[#allocation5 + $0xef0] sm:$0xff]  ;;  %2225 = vmatpush.msrb.mxu2 %v832_v13 }
 0x253   : > { %v700_v15 = vld [vmem:[#allocation5 + $0x8b0] sm:$0xff]  ;;  %2244 = vmatpush.msrb.mxu3 %v900_v14 }
 0x254   : > { %v764_v16 = vld [vmem:[#allocation5 + $0xab0] sm:$0xff]  ;;  %2186 = vmatpush.msrb.mxu0 %v700_v15 }
 0x255   : > { %v828_v17 = vld [vmem:[#allocation5 + $0xcb0] sm:$0xff]  ;;  %2206 = vmatpush.msrb.mxu1 %v764_v16 }
 0x256   : > { %v896_v18 = vld [vmem:[#allocation5 + $0xed0] sm:$0xff]  ;;  %2226 = vmatpush.msrb.mxu2 %v828_v17 }
 0x257   : > { %v696_v19 = vld [vmem:[#allocation5 + $0x890] sm:$0xff]  ;;  %2245 = vmatpush.msrb.mxu3 %v896_v18 }
 0x258   : > { %v760_v20 = vld [vmem:[#allocation5 + $0xa90] sm:$0xff]  ;;  %2187 = vmatpush.msrb.mxu0 %v696_v19 }
 0x259   : > { %v824_v23 = vld [vmem:[#allocation5 + $0xc90] sm:$0xff]  ;;  %2207 = vmatpush.msrb.mxu1 %v760_v20 }
 0x25a   : > { %v892_v24 = vld [vmem:[#allocation5 + $0xeb0] sm:$0xff]  ;;  %2227 = vmatpush.msrb.mxu2 %v824_v23 }
 0x25b   : > { %v692_v26 = vld [vmem:[#allocation5 + $0x870] sm:$0xff]  ;;  %2246 = vmatpush.msrb.mxu3 %v892_v24 }
 0x25c   : > { %v756_v27 = vld [vmem:[#allocation5 + $0xa70] sm:$0xff]  ;;  %2188 = vmatpush.msrb.mxu0 %v692_v26 }
 0x25d   : > { %v820_v28 = vld [vmem:[#allocation5 + $0xc70] sm:$0xff]  ;;  %2208 = vmatpush.msrb.mxu1 %v756_v27 }
 0x25e   : > { %v888_v29 = vld [vmem:[#allocation5 + $0xe90] sm:$0xff]  ;;  %2228 = vmatpush.msrb.mxu2 %v820_v28 }
 0x25f   : > { %v688_v34 = vld [vmem:[#allocation5 + $0x850] sm:$0xff]  ;;  %2247 = vmatpush.msrb.mxu3 %v888_v29 }
 0x260   : > { %v752_v35 = vld [vmem:[#allocation5 + $0xa50] sm:$0xff]  ;;  %2189 = vmatpush.msrb.mxu0 %v688_v34 }
 0x261   : > { %v816_v36 = vld [vmem:[#allocation5 + $0xc50] sm:$0xff]  ;;  %2209 = vmatpush.msrb.mxu1 %v752_v35 }
 0x262   : > { %v884_v38 = vld [vmem:[#allocation5 + $0xe70] sm:$0xff]  ;;  %2229 = vmatpush.msrb.mxu2 %v816_v36 }
 0x263   : > { %v684_v39 = vld [vmem:[#allocation5 + $0x830] sm:$0xff]  ;;  %2248 = vmatpush.msrb.mxu3 %v884_v38 }
 0x264   : > { %v748_v40 = vld [vmem:[#allocation5 + $0xa30] sm:$0xff]  ;;  %2190 = vmatpush.msrb.mxu0 %v684_v39 }
 0x265   : > { %v812_v41 = vld [vmem:[#allocation5 + $0xc30] sm:$0xff]  ;;  %2210 = vmatpush.msrb.mxu1 %v748_v40 }
 0x266   : > { %v880_v42 = vld [vmem:[#allocation5 + $0xe50] sm:$0xff]  ;;  %2230 = vmatpush.msrb.mxu2 %v812_v41 }
 0x267   : > { %v680_v43 = vld [vmem:[#allocation5 + $0x810] sm:$0xff]  ;;  %2249 = vmatpush.msrb.mxu3 %v880_v42 }
 0x268   : > { %v744_v44 = vld [vmem:[#allocation5 + $0xa10] sm:$0xff]  ;;  %2191 = vmatpush.msrb.mxu0 %v680_v43 }
 0x269   : > { %v808_v47 = vld [vmem:[#allocation5 + $0xc10] sm:$0xff]  ;;  %2211 = vmatpush.msrb.mxu1 %v744_v44  ;;  %2192 = vmatmul.f32.vlgmr.msrb.gmra.mxu0 %v4641_v30 }
 0x26a   : > { %v876_v48 = vld [vmem:[#allocation5 + $0xe30] sm:$0xff]  ;;  %2231 = vmatpush.msrb.mxu2 %v808_v47  ;;  %2212 = vmatmul.f32.vlgmr.msrb.gmra.mxu1 %v4647_v37 }
 0x26b   : > { %v996_v49 = vld [vmem:[#allocation5 + $0x11f0] sm:$0xff]  ;;  %2250 = vmatpush.msrb.mxu3 %v876_v48  ;;  %2232 = vmatmul.f32.vlgmr.msrb.gmra.mxu2 %v4638_v25 }
 0x26c   : > { %v1060_v50 = vld [vmem:[#allocation5 + $0x13f0] sm:$0xff]  ;;  %2256 = vmatpush.msra.mxu0 %v996_v49 }
 0x26d   : > { %v1124_v51 = vld [vmem:[#allocation5 + $0x15f0] sm:$0xff]  ;;  %2276 = vmatpush.msra.mxu1 %v1060_v50 }
 0x26e   : > { %v872_v52 = vld [vmem:[#allocation5 + $0xe10] sm:$0xff]  ;;  %2296 = vmatpush.msra.mxu2 %v1124_v51 }
 0x26f   : > { %v992_v55 = vld [vmem:[#allocation5 + $0x11d0] sm:$0xff]  ;;  %2251 = vmatpush.msrb.mxu3 %v872_v52 }
 0x270   : > { %v1056_v56 = vld [vmem:[#allocation5 + $0x13d0] sm:$0xff]  ;;  %2257 = vmatpush.msra.mxu0 %v992_v55  ;;  %2252 = vmatmul.f32.vlgmr.msrb.gmra.mxu3 %v4644_v33 }
 0x271   : > { %v1120_v57 = vld [vmem:[#allocation5 + $0x15d0] sm:$0xff]  ;;  %2277 = vmatpush.msra.mxu1 %v1056_v56 }
 0x272   : > { %v1188_v58 = vld [vmem:[#allocation5 + $0x17f0] sm:$0xff]  ;;  %2297 = vmatpush.msra.mxu2 %v1120_v57 }
 0x273   : > { %v988_v59 = vld [vmem:[#allocation5 + $0x11b0] sm:$0xff]  ;;  %2316 = vmatpush.msra.mxu3 %v1188_v58 }
 0x274   : > { %v1052_v60 = vld [vmem:[#allocation5 + $0x13b0] sm:$0xff]  ;;  %2258 = vmatpush.msra.mxu0 %v988_v59 }
 0x275   : > { %v1116_v61 = vld [vmem:[#allocation5 + $0x15b0] sm:$0xff]  ;;  %2278 = vmatpush.msra.mxu1 %v1052_v60 }
 0x276   : > { %v1184_v62 = vld [vmem:[#allocation5 + $0x17d0] sm:$0xff]  ;;  %2298 = vmatpush.msra.mxu2 %v1116_v61 }
 0x277   : > { %v984_v63 = vld [vmem:[#allocation5 + $0x1190] sm:$0xff]  ;;  %2317 = vmatpush.msra.mxu3 %v1184_v62 }
 0x278   : > { %v1048_v0 = vld [vmem:[#allocation5 + $0x1390] sm:$0xff]  ;;  %2259 = vmatpush.msra.mxu0 %v984_v63 }
 0x279   : > { %v1112_v1 = vld [vmem:[#allocation5 + $0x1590] sm:$0xff]  ;;  %2279 = vmatpush.msra.mxu1 %v1048_v0 }
 0x27a   : > { %v1180_v5 = vld [vmem:[#allocation5 + $0x17b0] sm:$0xff]  ;;  %2299 = vmatpush.msra.mxu2 %v1112_v1 }
 0x27b   : > { %v980_v6 = vld [vmem:[#allocation5 + $0x1170] sm:$0xff]  ;;  %2318 = vmatpush.msra.mxu3 %v1180_v5 }
 0x27c   : > { %v1044_v7 = vld [vmem:[#allocation5 + $0x1370] sm:$0xff]  ;;  %2260 = vmatpush.msra.mxu0 %v980_v6 }
 0x27d   : > { %v1108_v8 = vld [vmem:[#allocation5 + $0x1570] sm:$0xff]  ;;  %2280 = vmatpush.msra.mxu1 %v1044_v7 }
 0x27e   : > { %v1176_v9 = vld [vmem:[#allocation5 + $0x1790] sm:$0xff]  ;;  %2300 = vmatpush.msra.mxu2 %v1108_v8 }
 0x27f   : > { %v976_v11 = vld [vmem:[#allocation5 + $0x1150] sm:$0xff]  ;;  %2319 = vmatpush.msra.mxu3 %v1176_v9 }
 0x280   : > { %v1040_v12 = vld [vmem:[#allocation5 + $0x1350] sm:$0xff]  ;;  %2261 = vmatpush.msra.mxu0 %v976_v11 }
 0x281   : > { %v1104_v13 = vld [vmem:[#allocation5 + $0x1550] sm:$0xff]  ;;  %2281 = vmatpush.msra.mxu1 %v1040_v12 }
 0x282   : > { %v1172_v14 = vld [vmem:[#allocation5 + $0x1770] sm:$0xff]  ;;  %2301 = vmatpush.msra.mxu2 %v1104_v13 }
 0x283   : > { %v972_v15 = vld [vmem:[#allocation5 + $0x1130] sm:$0xff]  ;;  %2320 = vmatpush.msra.mxu3 %v1172_v14 }
 0x284   : > { %v1036_v16 = vld [vmem:[#allocation5 + $0x1330] sm:$0xff]  ;;  %2262 = vmatpush.msra.mxu0 %v972_v15 }
 0x285   : > { %v1100_v17 = vld [vmem:[#allocation5 + $0x1530] sm:$0xff]  ;;  %2282 = vmatpush.msra.mxu1 %v1036_v16 }
 0x286   : > { %v1168_v18 = vld [vmem:[#allocation5 + $0x1750] sm:$0xff]  ;;  %2302 = vmatpush.msra.mxu2 %v1100_v17 }
 0x287   : > { %v968_v19 = vld [vmem:[#allocation5 + $0x1110] sm:$0xff]  ;;  %2321 = vmatpush.msra.mxu3 %v1168_v18 }
 0x288   : > { %v1032_v20 = vld [vmem:[#allocation5 + $0x1310] sm:$0xff]  ;;  %2263 = vmatpush.msra.mxu0 %v968_v19 }
 0x289   : > { %v1096_v23 = vld [vmem:[#allocation5 + $0x1510] sm:$0xff]  ;;  %2283 = vmatpush.msra.mxu1 %v1032_v20 }
 0x28a   : > { %v1164_v24 = vld [vmem:[#allocation5 + $0x1730] sm:$0xff]  ;;  %2303 = vmatpush.msra.mxu2 %v1096_v23 }
 0x28b   : > { %v964_v26 = vld [vmem:[#allocation5 + $0x10f0] sm:$0xff]  ;;  %2322 = vmatpush.msra.mxu3 %v1164_v24 }
 0x28c   : > { %v1028_v27 = vld [vmem:[#allocation5 + $0x12f0] sm:$0xff]  ;;  %2264 = vmatpush.msra.mxu0 %v964_v26 }
 0x28d   : > { %v1092_v28 = vld [vmem:[#allocation5 + $0x14f0] sm:$0xff]  ;;  %2284 = vmatpush.msra.mxu1 %v1028_v27 }
 0x28e   : > { %v1160_v29 = vld [vmem:[#allocation5 + $0x1710] sm:$0xff]  ;;  %2304 = vmatpush.msra.mxu2 %v1092_v28 }
 0x28f   : > { %v960_v34 = vld [vmem:[#allocation5 + $0x10d0] sm:$0xff]  ;;  %2323 = vmatpush.msra.mxu3 %v1160_v29 }
 0x290   : > { %v1024_v35 = vld [vmem:[#allocation5 + $0x12d0] sm:$0xff]  ;;  %2265 = vmatpush.msra.mxu0 %v960_v34 }
 0x291   : > { %v1088_v36 = vld [vmem:[#allocation5 + $0x14d0] sm:$0xff]  ;;  %2285 = vmatpush.msra.mxu1 %v1024_v35 }
 0x292   : > { %v1156_v38 = vld [vmem:[#allocation5 + $0x16f0] sm:$0xff]  ;;  %2305 = vmatpush.msra.mxu2 %v1088_v36 }
 0x293   : > { %v956_v39 = vld [vmem:[#allocation5 + $0x10b0] sm:$0xff]  ;;  %2324 = vmatpush.msra.mxu3 %v1156_v38 }
 0x294   : > { %v1020_v40 = vld [vmem:[#allocation5 + $0x12b0] sm:$0xff]  ;;  %2266 = vmatpush.msra.mxu0 %v956_v39 }
 0x295   : > { %v1084_v41 = vld [vmem:[#allocation5 + $0x14b0] sm:$0xff]  ;;  %2286 = vmatpush.msra.mxu1 %v1020_v40 }
 0x296   : > { %v1152_v42 = vld [vmem:[#allocation5 + $0x16d0] sm:$0xff]  ;;  %2306 = vmatpush.msra.mxu2 %v1084_v41 }
 0x297   : > { %v952_v43 = vld [vmem:[#allocation5 + $0x1090] sm:$0xff]  ;;  %2325 = vmatpush.msra.mxu3 %v1152_v42 }
 0x298   : > { %v1016_v44 = vld [vmem:[#allocation5 + $0x1290] sm:$0xff]  ;;  %2267 = vmatpush.msra.mxu0 %v952_v43 }
 0x299   : > { %v1080_v47 = vld [vmem:[#allocation5 + $0x1490] sm:$0xff]  ;;  %2287 = vmatpush.msra.mxu1 %v1016_v44 }
 0x29a   : > { %v1148_v48 = vld [vmem:[#allocation5 + $0x16b0] sm:$0xff]  ;;  %2307 = vmatpush.msra.mxu2 %v1080_v47 }
 0x29b   : > { %v948_v49 = vld [vmem:[#allocation5 + $0x1070] sm:$0xff]  ;;  %2326 = vmatpush.msra.mxu3 %v1148_v48 }
 0x29c   : > { %v1012_v50 = vld [vmem:[#allocation5 + $0x1270] sm:$0xff]  ;;  %2268 = vmatpush.msra.mxu0 %v948_v49 }
 0x29d   : > { %v1076_v51 = vld [vmem:[#allocation5 + $0x1470] sm:$0xff]  ;;  %2288 = vmatpush.msra.mxu1 %v1012_v50 }
 0x29e   : > { %v1144_v52 = vld [vmem:[#allocation5 + $0x1690] sm:$0xff]  ;;  %2308 = vmatpush.msra.mxu2 %v1076_v51 }
 0x29f   : > { %v944_v55 = vld [vmem:[#allocation5 + $0x1050] sm:$0xff]  ;;  %2327 = vmatpush.msra.mxu3 %v1144_v52 }
 0x2a0   : > { %v1008_v56 = vld [vmem:[#allocation5 + $0x1250] sm:$0xff]  ;;  %2269 = vmatpush.msra.mxu0 %v944_v55 }
 0x2a1   : > { %v1072_v57 = vld [vmem:[#allocation5 + $0x1450] sm:$0xff]  ;;  %2289 = vmatpush.msra.mxu1 %v1008_v56 }
 0x2a2   : > { %v1140_v58 = vld [vmem:[#allocation5 + $0x1670] sm:$0xff]  ;;  %2309 = vmatpush.msra.mxu2 %v1072_v57 }
 0x2a3   : > { %v940_v59 = vld [vmem:[#allocation5 + $0x1030] sm:$0xff]  ;;  %2328 = vmatpush.msra.mxu3 %v1140_v58 }
 0x2a4   : > { %v1004_v60 = vld [vmem:[#allocation5 + $0x1230] sm:$0xff]  ;;  %2270 = vmatpush.msra.mxu0 %v940_v59 }
 0x2a5   : > { %v1068_v61 = vld [vmem:[#allocation5 + $0x1430] sm:$0xff]  ;;  %2290 = vmatpush.msra.mxu1 %v1004_v60 }
 0x2a6   : > { %v1136_v62 = vld [vmem:[#allocation5 + $0x1650] sm:$0xff]  ;;  %2310 = vmatpush.msra.mxu2 %v1068_v61 }
 0x2a7   : > { %v936_v63 = vld [vmem:[#allocation5 + $0x1010] sm:$0xff]  ;;  %2329 = vmatpush.msra.mxu3 %v1136_v62 }
 0x2a8   : > { %v1000_v0 = vld [vmem:[#allocation5 + $0x1210] sm:$0xff]  ;;  %2271 = vmatpush.msra.mxu0 %v936_v63 }
 0x2a9   : > { %v1064_v1 = vld [vmem:[#allocation5 + $0x1410] sm:$0xff]  ;;  %2291 = vmatpush.msra.mxu1 %v1000_v0  ;;  %2272 = vmatmul.f32.vlgmr.msra.gmra.mxu0 %v4654_v21 }
 0x2aa   : > { %v1132_v5 = vld [vmem:[#allocation5 + $0x1630] sm:$0xff]  ;;  %2311 = vmatpush.msra.mxu2 %v1064_v1  ;;  %2292 = vmatmul.f32.vlgmr.msra.gmra.mxu1 %v4660_v31 }
 0x2ab   : > { %v1252_v6 = vld [vmem:[#allocation5 + $0x19f0] sm:$0xff]  ;;  %2330 = vmatpush.msra.mxu3 %v1132_v5  ;;  %2312 = vmatmul.f32.vlgmr.msra.gmra.mxu2 %v4656_v22 }
 0x2ac   : > { %v1316_v7 = vld [vmem:[#allocation5 + $0x1bf0] sm:$0xff]  ;;  %2336 = vmatpush.msrb.mxu0 %v1252_v6 }
 0x2ad   : > { %v1380_v8 = vld [vmem:[#allocation5 + $0x1df0] sm:$0xff]  ;;  %2356 = vmatpush.msrb.mxu1 %v1316_v7 }
 0x2ae   : > { %v1128_v9 = vld [vmem:[#allocation5 + $0x1610] sm:$0xff]  ;;  %2376 = vmatpush.msrb.mxu2 %v1380_v8 }
 0x2af   : > { %v1248_v11 = vld [vmem:[#allocation5 + $0x19d0] sm:$0xff]  ;;  %2331 = vmatpush.msra.mxu3 %v1128_v9 }
 0x2b0   : > { %v1312_v12 = vld [vmem:[#allocation5 + $0x1bd0] sm:$0xff]  ;;  %2332 = vmatmul.f32.vlgmr.msra.gmra.mxu3 %v4662_v32  ;;  %2337 = vmatpush.msrb.mxu0 %v1248_v11 }
 0x2b1   : > { %v1376_v13 = vld [vmem:[#allocation5 + $0x1dd0] sm:$0xff]  ;;  %2357 = vmatpush.msrb.mxu1 %v1312_v12 }
 0x2b2   : > { %v1444_v14 = vld [vmem:[#allocation5 + $0x1ff0] sm:$0xff]  ;;  %2377 = vmatpush.msrb.mxu2 %v1376_v13 }
 0x2b3   : > { %v1244_v15 = vld [vmem:[#allocation5 + $0x19b0] sm:$0xff]  ;;  %2396 = vmatpush.msrb.mxu3 %v1444_v14 }
 0x2b4   : > { %v1308_v16 = vld [vmem:[#allocation5 + $0x1bb0] sm:$0xff]  ;;  %2338 = vmatpush.msrb.mxu0 %v1244_v15 }
 0x2b5   : > { %v1372_v17 = vld [vmem:[#allocation5 + $0x1db0] sm:$0xff]  ;;  %2358 = vmatpush.msrb.mxu1 %v1308_v16 }
 0x2b6   : > { %v1440_v18 = vld [vmem:[#allocation5 + $0x1fd0] sm:$0xff]  ;;  %2378 = vmatpush.msrb.mxu2 %v1372_v17 }
 0x2b7   : > { %v1240_v19 = vld [vmem:[#allocation5 + $0x1990] sm:$0xff]  ;;  %2397 = vmatpush.msrb.mxu3 %v1440_v18 }
 0x2b8   : > { %v1304_v20 = vld [vmem:[#allocation5 + $0x1b90] sm:$0xff]  ;;  %2339 = vmatpush.msrb.mxu0 %v1240_v19 }
 0x2b9   : > { %v1368_v23 = vld [vmem:[#allocation5 + $0x1d90] sm:$0xff]  ;;  %2359 = vmatpush.msrb.mxu1 %v1304_v20 }
 0x2ba   : > { %v1436_v24 = vld [vmem:[#allocation5 + $0x1fb0] sm:$0xff]  ;;  %2379 = vmatpush.msrb.mxu2 %v1368_v23 }
 0x2bb   : > { %v1236_v26 = vld [vmem:[#allocation5 + $0x1970] sm:$0xff]  ;;  %2398 = vmatpush.msrb.mxu3 %v1436_v24 }
 0x2bc   : > { %v1300_v27 = vld [vmem:[#allocation5 + $0x1b70] sm:$0xff]  ;;  %2340 = vmatpush.msrb.mxu0 %v1236_v26  ;;  %v485_v26 = vld [vmem:[#allocation5 + $0x1f8] sm:$0xff] }
 0x2bd   : > { %v1364_v28 = vld [vmem:[#allocation5 + $0x1d70] sm:$0xff]  ;;  %2360 = vmatpush.msrb.mxu1 %v1300_v27  ;;  %v549_v27 = vld [vmem:[#allocation5 + $0x3f8] sm:$0xff] }
 0x2be   : > { %v1432_v29 = vld [vmem:[#allocation5 + $0x1f90] sm:$0xff]  ;;  %2380 = vmatpush.msrb.mxu2 %v1364_v28  ;;  %v613_v28 = vld [vmem:[#allocation5 + $0x5f8] sm:$0xff] }
 0x2bf   : > { %v1232_v34 = vld [vmem:[#allocation5 + $0x1950] sm:$0xff]  ;;  %2399 = vmatpush.msrb.mxu3 %v1432_v29 }
 0x2c0   : > { %v1296_v35 = vld [vmem:[#allocation5 + $0x1b50] sm:$0xff]  ;;  %2341 = vmatpush.msrb.mxu0 %v1232_v34  ;;  %v481_v34 = vld [vmem:[#allocation5 + $0x1d8] sm:$0xff] }
 0x2c1   : > { %v1360_v36 = vld [vmem:[#allocation5 + $0x1d50] sm:$0xff]  ;;  %2361 = vmatpush.msrb.mxu1 %v1296_v35  ;;  %v545_v35 = vld [vmem:[#allocation5 + $0x3d8] sm:$0xff] }
 0x2c2   : > { %v1428_v38 = vld [vmem:[#allocation5 + $0x1f70] sm:$0xff]  ;;  %2381 = vmatpush.msrb.mxu2 %v1360_v36  ;;  %v609_v36 = vld [vmem:[#allocation5 + $0x5d8] sm:$0xff] }
 0x2c3   : > { %v1228_v39 = vld [vmem:[#allocation5 + $0x1930] sm:$0xff]  ;;  %2400 = vmatpush.msrb.mxu3 %v1428_v38  ;;  %v677_v38 = vld [vmem:[#allocation5 + $0x7f8] sm:$0xff] }
 0x2c4   : > { %v1292_v40 = vld [vmem:[#allocation5 + $0x1b30] sm:$0xff]  ;;  %2342 = vmatpush.msrb.mxu0 %v1228_v39  ;;  %v477_v39 = vld [vmem:[#allocation5 + $0x1b8] sm:$0xff] }
 0x2c5   : > { %v1356_v41 = vld [vmem:[#allocation5 + $0x1d30] sm:$0xff]  ;;  %2362 = vmatpush.msrb.mxu1 %v1292_v40  ;;  %v541_v40 = vld [vmem:[#allocation5 + $0x3b8] sm:$0xff] }
 0x2c6   : > { %v1424_v42 = vld [vmem:[#allocation5 + $0x1f50] sm:$0xff]  ;;  %2382 = vmatpush.msrb.mxu2 %v1356_v41  ;;  %v605_v41 = vld [vmem:[#allocation5 + $0x5b8] sm:$0xff] }
 0x2c7   : > { %v1224_v43 = vld [vmem:[#allocation5 + $0x1910] sm:$0xff]  ;;  %2401 = vmatpush.msrb.mxu3 %v1424_v42  ;;  %v673_v42 = vld [vmem:[#allocation5 + $0x7d8] sm:$0xff] }
 0x2c8   : > { %v1288_v44 = vld [vmem:[#allocation5 + $0x1b10] sm:$0xff]  ;;  %2343 = vmatpush.msrb.mxu0 %v1224_v43  ;;  %v473_v43 = vld [vmem:[#allocation5 + $0x198] sm:$0xff] }
 0x2c9   : > { %v1352_v47 = vld [vmem:[#allocation5 + $0x1d10] sm:$0xff]  ;;  %2363 = vmatpush.msrb.mxu1 %v1288_v44  ;;  %v537_v44 = vld [vmem:[#allocation5 + $0x398] sm:$0xff] }
 0x2ca   : > { %v1420_v48 = vld [vmem:[#allocation5 + $0x1f30] sm:$0xff]  ;;  %2383 = vmatpush.msrb.mxu2 %v1352_v47  ;;  %v601_v47 = vld [vmem:[#allocation5 + $0x598] sm:$0xff] }
 0x2cb   : > { %v1220_v49 = vld [vmem:[#allocation5 + $0x18f0] sm:$0xff]  ;;  %2402 = vmatpush.msrb.mxu3 %v1420_v48  ;;  %v669_v48 = vld [vmem:[#allocation5 + $0x7b8] sm:$0xff] }
 0x2cc   : > { %v1284_v50 = vld [vmem:[#allocation5 + $0x1af0] sm:$0xff]  ;;  %2344 = vmatpush.msrb.mxu0 %v1220_v49  ;;  %v469_v49 = vld [vmem:[#allocation5 + $0x178] sm:$0xff] }
 0x2cd   : > { %v1348_v51 = vld [vmem:[#allocation5 + $0x1cf0] sm:$0xff]  ;;  %2364 = vmatpush.msrb.mxu1 %v1284_v50  ;;  %v533_v50 = vld [vmem:[#allocation5 + $0x378] sm:$0xff] }
 0x2ce   : > { %v1416_v52 = vld [vmem:[#allocation5 + $0x1f10] sm:$0xff]  ;;  %2384 = vmatpush.msrb.mxu2 %v1348_v51  ;;  %v597_v51 = vld [vmem:[#allocation5 + $0x578] sm:$0xff] }
 0x2cf   : > { %v1216_v55 = vld [vmem:[#allocation5 + $0x18d0] sm:$0xff]  ;;  %2403 = vmatpush.msrb.mxu3 %v1416_v52  ;;  %v665_v52 = vld [vmem:[#allocation5 + $0x798] sm:$0xff] }
 0x2d0   : > { %v1280_v56 = vld [vmem:[#allocation5 + $0x1ad0] sm:$0xff]  ;;  %2345 = vmatpush.msrb.mxu0 %v1216_v55  ;;  %v465_v55 = vld [vmem:[#allocation5 + $0x158] sm:$0xff] }
 0x2d1   : > { %v1344_v57 = vld [vmem:[#allocation5 + $0x1cd0] sm:$0xff]  ;;  %2365 = vmatpush.msrb.mxu1 %v1280_v56  ;;  %v529_v56 = vld [vmem:[#allocation5 + $0x358] sm:$0xff] }
 0x2d2   : > { %v1412_v58 = vld [vmem:[#allocation5 + $0x1ef0] sm:$0xff]  ;;  %2385 = vmatpush.msrb.mxu2 %v1344_v57  ;;  %v593_v57 = vld [vmem:[#allocation5 + $0x558] sm:$0xff] }
 0x2d3   : > { %v1212_v59 = vld [vmem:[#allocation5 + $0x18b0] sm:$0xff]  ;;  %2404 = vmatpush.msrb.mxu3 %v1412_v58  ;;  %v661_v58 = vld [vmem:[#allocation5 + $0x778] sm:$0xff] }
 0x2d4   : > { %v1276_v60 = vld [vmem:[#allocation5 + $0x1ab0] sm:$0xff]  ;;  %2346 = vmatpush.msrb.mxu0 %v1212_v59  ;;  %v461_v59 = vld [vmem:[#allocation5 + $0x138] sm:$0xff] }
 0x2d5   : > { %v1340_v61 = vld [vmem:[#allocation5 + $0x1cb0] sm:$0xff]  ;;  %2366 = vmatpush.msrb.mxu1 %v1276_v60  ;;  %v525_v60 = vld [vmem:[#allocation5 + $0x338] sm:$0xff] }
 0x2d6   : > { %v1408_v62 = vld [vmem:[#allocation5 + $0x1ed0] sm:$0xff]  ;;  %2386 = vmatpush.msrb.mxu2 %v1340_v61  ;;  %v589_v61 = vld [vmem:[#allocation5 + $0x538] sm:$0xff] }
 0x2d7   : > { %v1208_v63 = vld [vmem:[#allocation5 + $0x1890] sm:$0xff]  ;;  %2405 = vmatpush.msrb.mxu3 %v1408_v62  ;;  %v657_v62 = vld [vmem:[#allocation5 + $0x758] sm:$0xff] }
 0x2d8   : > { %v1272_v0 = vld [vmem:[#allocation5 + $0x1a90] sm:$0xff]  ;;  %2347 = vmatpush.msrb.mxu0 %v1208_v63  ;;  %v457_v63 = vld [vmem:[#allocation5 + $0x118] sm:$0xff] }
 0x2d9   : > { %v1336_v1 = vld [vmem:[#allocation5 + $0x1c90] sm:$0xff]  ;;  %2367 = vmatpush.msrb.mxu1 %v1272_v0  ;;  %v521_v0 = vld [vmem:[#allocation5 + $0x318] sm:$0xff] }
 0x2da   : > { %v1404_v5 = vld [vmem:[#allocation5 + $0x1eb0] sm:$0xff]  ;;  %2387 = vmatpush.msrb.mxu2 %v1336_v1  ;;  %v585_v1 = vld [vmem:[#allocation5 + $0x518] sm:$0xff] }
 0x2db   : > { %v1204_v6 = vld [vmem:[#allocation5 + $0x1870] sm:$0xff]  ;;  %2406 = vmatpush.msrb.mxu3 %v1404_v5  ;;  %v653_v5 = vld [vmem:[#allocation5 + $0x738] sm:$0xff] }
 0x2dc   : > { %v1268_v7 = vld [vmem:[#allocation5 + $0x1a70] sm:$0xff]  ;;  %2348 = vmatpush.msrb.mxu0 %v1204_v6  ;;  %v453_v6 = vld [vmem:[#allocation5 + $0xf8] sm:$0xff] }
 0x2dd   : > { %v1332_v8 = vld [vmem:[#allocation5 + $0x1c70] sm:$0xff]  ;;  %2368 = vmatpush.msrb.mxu1 %v1268_v7  ;;  %v517_v7 = vld [vmem:[#allocation5 + $0x2f8] sm:$0xff] }
 0x2de   : > { %v1400_v9 = vld [vmem:[#allocation5 + $0x1e90] sm:$0xff]  ;;  %2388 = vmatpush.msrb.mxu2 %v1332_v8  ;;  %v581_v8 = vld [vmem:[#allocation5 + $0x4f8] sm:$0xff] }
 0x2df   : > { %v1200_v11 = vld [vmem:[#allocation5 + $0x1850] sm:$0xff]  ;;  %2407 = vmatpush.msrb.mxu3 %v1400_v9  ;;  %v649_v9 = vld [vmem:[#allocation5 + $0x718] sm:$0xff] }
 0x2e0   : > { %v1264_v12 = vld [vmem:[#allocation5 + $0x1a50] sm:$0xff]  ;;  %2349 = vmatpush.msrb.mxu0 %v1200_v11  ;;  %v449_v11 = vld [vmem:[#allocation5 + $0xd8] sm:$0xff] }
 0x2e1   : > { %v1328_v13 = vld [vmem:[#allocation5 + $0x1c50] sm:$0xff]  ;;  %2369 = vmatpush.msrb.mxu1 %v1264_v12  ;;  %v513_v12 = vld [vmem:[#allocation5 + $0x2d8] sm:$0xff] }
 0x2e2   : > { %v1396_v14 = vld [vmem:[#allocation5 + $0x1e70] sm:$0xff]  ;;  %2389 = vmatpush.msrb.mxu2 %v1328_v13  ;;  %v577_v13 = vld [vmem:[#allocation5 + $0x4d8] sm:$0xff] }
 0x2e3   : > { %v1196_v15 = vld [vmem:[#allocation5 + $0x1830] sm:$0xff]  ;;  %2408 = vmatpush.msrb.mxu3 %v1396_v14  ;;  %v645_v14 = vld [vmem:[#allocation5 + $0x6f8] sm:$0xff] }
 0x2e4   : > { %v1260_v16 = vld [vmem:[#allocation5 + $0x1a30] sm:$0xff]  ;;  %2350 = vmatpush.msrb.mxu0 %v1196_v15  ;;  %v445_v15 = vld [vmem:[#allocation5 + $0xb8] sm:$0xff] }
 0x2e5   : > { %v1324_v17 = vld [vmem:[#allocation5 + $0x1c30] sm:$0xff]  ;;  %2370 = vmatpush.msrb.mxu1 %v1260_v16  ;;  %v509_v16 = vld [vmem:[#allocation5 + $0x2b8] sm:$0xff] }
 0x2e6   : > { %v1392_v18 = vld [vmem:[#allocation5 + $0x1e50] sm:$0xff]  ;;  %2390 = vmatpush.msrb.mxu2 %v1324_v17  ;;  %v573_v17 = vld [vmem:[#allocation5 + $0x4b8] sm:$0xff] }
 0x2e7   : > { %v1192_v19 = vld [vmem:[#allocation5 + $0x1810] sm:$0xff]  ;;  %2409 = vmatpush.msrb.mxu3 %v1392_v18  ;;  %v641_v18 = vld [vmem:[#allocation5 + $0x6d8] sm:$0xff] }
 0x2e8   : > { %v1256_v20 = vld [vmem:[#allocation5 + $0x1a10] sm:$0xff]  ;;  %2351 = vmatpush.msrb.mxu0 %v1192_v19  ;;  %v441_v19 = vld [vmem:[#allocation5 + $0x98] sm:$0xff] }
 0x2e9   : > { %v1320_v23 = vld [vmem:[#allocation5 + $0x1c10] sm:$0xff]  ;;  %2371 = vmatpush.msrb.mxu1 %v1256_v20  ;;  %2352 = vmatmul.f32.vlgmr.msrb.gmra.mxu0 %v4670_v45  ;;  %v505_v20 = vld [vmem:[#allocation5 + $0x298] sm:$0xff] }
 0x2ea   : > { %v1388_v24 = vld [vmem:[#allocation5 + $0x1e30] sm:$0xff]  ;;  %2391 = vmatpush.msrb.mxu2 %v1320_v23  ;;  %2416 = vmatpush.msra.mxu0 %v485_v26  ;;  %v569_v23 = vld [vmem:[#allocation5 + $0x498] sm:$0xff] }
 0x2eb   : > { %2410 = vmatpush.msrb.mxu3 %v1388_v24  ;;  %v1384_v29 = vld [vmem:[#allocation5 + $0x1e10] sm:$0xff]  ;;  %2392 = vmatmul.f32.vlgmr.msrb.gmra.mxu2 %v4672_v46  ;;  %v637_v24 = vld [vmem:[#allocation5 + $0x6b8] sm:$0xff] }
 0x2ec   : > { %2436 = vmatpush.msra.mxu1 %v549_v27  ;;  %2456 = vmatpush.msra.mxu2 %v613_v28  ;;  %v437_v26 = vld [vmem:[#allocation5 + $0x78] sm:$0xff] }
 0x2ed   : > { %2411 = vmatpush.msrb.mxu3 %v1384_v29  ;;  %2372 = vmatmul.f32.vlgmr.msrb.gmra.mxu1 %v4676_v53  ;;  %v501_v27 = vld [vmem:[#allocation5 + $0x278] sm:$0xff] }
 0x2ee   : > { %2412 = vmatmul.f32.vlgmr.msrb.gmra.mxu3 %v4678_v54  ;;  %2417 = vmatpush.msra.mxu0 %v481_v34  ;;  %v565_v28 = vld [vmem:[#allocation5 + $0x478] sm:$0xff] }
 0x2ef   : > { %2437 = vmatpush.msra.mxu1 %v545_v35  ;;  %2457 = vmatpush.msra.mxu2 %v609_v36  ;;  %v633_v29 = vld [vmem:[#allocation5 + $0x698] sm:$0xff] }
 0x2f0   : > { %2476 = vmatpush.msra.mxu3 %v677_v38  ;;  %2418 = vmatpush.msra.mxu0 %v477_v39  ;;  %v433_v34 = vld [vmem:[#allocation5 + $0x58] sm:$0xff] }
 0x2f1   : > { %2438 = vmatpush.msra.mxu1 %v541_v40  ;;  %2458 = vmatpush.msra.mxu2 %v605_v41  ;;  %v497_v35 = vld [vmem:[#allocation5 + $0x258] sm:$0xff] }
 0x2f2   : > { %2477 = vmatpush.msra.mxu3 %v673_v42  ;;  %2419 = vmatpush.msra.mxu0 %v473_v43  ;;  %v561_v36 = vld [vmem:[#allocation5 + $0x458] sm:$0xff] }
 0x2f3   : > { %2439 = vmatpush.msra.mxu1 %v537_v44  ;;  %2459 = vmatpush.msra.mxu2 %v601_v47  ;;  %v629_v38 = vld [vmem:[#allocation5 + $0x678] sm:$0xff] }
 0x2f4   : > { %2478 = vmatpush.msra.mxu3 %v669_v48  ;;  %2420 = vmatpush.msra.mxu0 %v469_v49  ;;  %v429_v39 = vld [vmem:[#allocation5 + $0x38] sm:$0xff] }
 0x2f5   : > { %2440 = vmatpush.msra.mxu1 %v533_v50  ;;  %2460 = vmatpush.msra.mxu2 %v597_v51  ;;  %v493_v40 = vld [vmem:[#allocation5 + $0x238] sm:$0xff] }
 0x2f6   : > { %2479 = vmatpush.msra.mxu3 %v665_v52  ;;  %2421 = vmatpush.msra.mxu0 %v465_v55  ;;  %v557_v41 = vld [vmem:[#allocation5 + $0x438] sm:$0xff] }
 0x2f7   : > { %2441 = vmatpush.msra.mxu1 %v529_v56  ;;  %2461 = vmatpush.msra.mxu2 %v593_v57  ;;  %v625_v42 = vld [vmem:[#allocation5 + $0x658] sm:$0xff] }
 0x2f8   : > { %2480 = vmatpush.msra.mxu3 %v661_v58  ;;  %2422 = vmatpush.msra.mxu0 %v461_v59  ;;  %v425_v43 = vld [vmem:[#allocation5 + $0x18] sm:$0xff] }
 0x2f9   : > { %2442 = vmatpush.msra.mxu1 %v525_v60  ;;  %2462 = vmatpush.msra.mxu2 %v589_v61  ;;  %v489_v44 = vld [vmem:[#allocation5 + $0x218] sm:$0xff] }
 0x2fa   : > { %2481 = vmatpush.msra.mxu3 %v657_v62  ;;  %2423 = vmatpush.msra.mxu0 %v457_v63  ;;  %v553_v47 = vld [vmem:[#allocation5 + $0x418] sm:$0xff] }
 0x2fb   : > { %2443 = vmatpush.msra.mxu1 %v521_v0  ;;  %2463 = vmatpush.msra.mxu2 %v585_v1  ;;  %v621_v48 = vld [vmem:[#allocation5 + $0x638] sm:$0xff] }
 0x2fc   : > { %2482 = vmatpush.msra.mxu3 %v653_v5  ;;  %2424 = vmatpush.msra.mxu0 %v453_v6  ;;  %v741_v49 = vld [vmem:[#allocation5 + $0x9f8] sm:$0xff] }
 0x2fd   : > { %2444 = vmatpush.msra.mxu1 %v517_v7  ;;  %2464 = vmatpush.msra.mxu2 %v581_v8  ;;  %v805_v50 = vld [vmem:[#allocation5 + $0xbf8] sm:$0xff] }
 0x2fe   : > { %2483 = vmatpush.msra.mxu3 %v649_v9  ;;  %2425 = vmatpush.msra.mxu0 %v449_v11  ;;  %v869_v51 = vld [vmem:[#allocation5 + $0xdf8] sm:$0xff]  ;;  %v4716_v11 = vpop.f32.mrf.mxu0 }
 0x2ff   : > { %2445 = vmatpush.msra.mxu1 %v513_v12  ;;  %2465 = vmatpush.msra.mxu2 %v577_v13  ;;  %v617_v52 = vld [vmem:[#allocation5 + $0x618] sm:$0xff] }
 0x300   : > { %2484 = vmatpush.msra.mxu3 %v645_v14  ;;  %2426 = vmatpush.msra.mxu0 %v445_v15  ;;  %v737_v55 = vld [vmem:[#allocation5 + $0x9d8] sm:$0xff] }
 0x301   : > { %2446 = vmatpush.msra.mxu1 %v509_v16  ;;  %2466 = vmatpush.msra.mxu2 %v573_v17  ;;  %v801_v56 = vld [vmem:[#allocation5 + $0xbd8] sm:$0xff] }
 0x302   : > { %2485 = vmatpush.msra.mxu3 %v641_v18  ;;  %2427 = vmatpush.msra.mxu0 %v441_v19  ;;  %v865_v57 = vld [vmem:[#allocation5 + $0xdd8] sm:$0xff] }
 0x303   : > { %2447 = vmatpush.msra.mxu1 %v505_v20  ;;  %2467 = vmatpush.msra.mxu2 %v569_v23  ;;  %v933_v58 = vld [vmem:[#allocation5 + $0xff8] sm:$0xff]  ;;  %v4718_v20 = vpop.f32.mrf.mxu1 }
 0x304   : > { %2486 = vmatpush.msra.mxu3 %v637_v24  ;;  %2428 = vmatpush.msra.mxu0 %v437_v26  ;;  %v733_v59 = vld [vmem:[#allocation5 + $0x9b8] sm:$0xff] }
 0x305   : > { %2448 = vmatpush.msra.mxu1 %v501_v27  ;;  %2468 = vmatpush.msra.mxu2 %v565_v28  ;;  %v797_v60 = vld [vmem:[#allocation5 + $0xbb8] sm:$0xff] }
 0x306   : > { %2487 = vmatpush.msra.mxu3 %v633_v29  ;;  %2429 = vmatpush.msra.mxu0 %v433_v34  ;;  %v861_v61 = vld [vmem:[#allocation5 + $0xdb8] sm:$0xff] }
 0x307   : > { %2449 = vmatpush.msra.mxu1 %v497_v35  ;;  %2469 = vmatpush.msra.mxu2 %v561_v36  ;;  %v929_v62 = vld [vmem:[#allocation5 + $0xfd8] sm:$0xff]  ;;  %v4720_v36 = vpop.f32.mrf.mxu2 }
 0x308   : > { %2488 = vmatpush.msra.mxu3 %v629_v38  ;;  %2430 = vmatpush.msra.mxu0 %v429_v39  ;;  %v729_v63 = vld [vmem:[#allocation5 + $0x998] sm:$0xff] }
 0x309   : > { %2450 = vmatpush.msra.mxu1 %v493_v40  ;;  %2470 = vmatpush.msra.mxu2 %v557_v41  ;;  %v793_v0 = vld [vmem:[#allocation5 + $0xb98] sm:$0xff] }
 0x30a   : > { %2489 = vmatpush.msra.mxu3 %v625_v42  ;;  %2431 = vmatpush.msra.mxu0 %v425_v43  ;;  %v857_v1 = vld [vmem:[#allocation5 + $0xd98] sm:$0xff]  ;;  %v4722_v42 = vpop.f32.mrf.mxu0 }
 0x30b   : > { %2451 = vmatpush.msra.mxu1 %v489_v44  ;;  %2471 = vmatpush.msra.mxu2 %v553_v47  ;;  %v925_v5 = vld [vmem:[#allocation5 + $0xfb8] sm:$0xff] }
 0x30c   : > { %2490 = vmatpush.msra.mxu3 %v621_v48  ;;  %2496 = vmatpush.msrb.mxu0 %v741_v49  ;;  %v725_v6 = vld [vmem:[#allocation5 + $0x978] sm:$0xff]  ;;  %v4724_v49 = vpop.f32.mrf.mxu3 }
 0x30d   : > { %2516 = vmatpush.msrb.mxu1 %v805_v50  ;;  %2536 = vmatpush.msrb.mxu2 %v869_v51  ;;  %v789_v7 = vld [vmem:[#allocation5 + $0xb78] sm:$0xff] }
 0x30e   : > { %2491 = vmatpush.msra.mxu3 %v617_v52  ;;  %2497 = vmatpush.msrb.mxu0 %v737_v55  ;;  %v853_v8 = vld [vmem:[#allocation5 + $0xd78] sm:$0xff] }
 0x30f   : > { %2517 = vmatpush.msrb.mxu1 %v801_v56  ;;  %2537 = vmatpush.msrb.mxu2 %v865_v57  ;;  %v921_v9 = vld [vmem:[#allocation5 + $0xf98] sm:$0xff]  ;;  %v4726_v56 = vpop.f32.mrf.mxu1 }
 0x310   : > { %2556 = vmatpush.msrb.mxu3 %v933_v58  ;;  %2498 = vmatpush.msrb.mxu0 %v733_v59  ;;  %v721_v12 = vld [vmem:[#allocation5 + $0x958] sm:$0xff] }
 0x311   : > { %2518 = vmatpush.msrb.mxu1 %v797_v60  ;;  %2538 = vmatpush.msrb.mxu2 %v861_v61  ;;  %v785_v13 = vld [vmem:[#allocation5 + $0xb58] sm:$0xff] }
 0x312   : > { %2557 = vmatpush.msrb.mxu3 %v929_v62  ;;  %2499 = vmatpush.msrb.mxu0 %v729_v63  ;;  %v849_v14 = vld [vmem:[#allocation5 + $0xd58] sm:$0xff] }
 0x313   : > { %2519 = vmatpush.msrb.mxu1 %v793_v0  ;;  %2539 = vmatpush.msrb.mxu2 %v857_v1  ;;  %v917_v15 = vld [vmem:[#allocation5 + $0xf78] sm:$0xff]  ;;  %v4728_v1 = vpop.f32.mrf.mxu2 }
 0x314   : > { %2558 = vmatpush.msrb.mxu3 %v925_v5  ;;  %2500 = vmatpush.msrb.mxu0 %v725_v6  ;;  %v717_v16 = vld [vmem:[#allocation5 + $0x938] sm:$0xff]  ;;  %v4730_v5 = vpop.f32.mrf.mxu0 }
 0x315   : > { %2520 = vmatpush.msrb.mxu1 %v789_v7  ;;  %2540 = vmatpush.msrb.mxu2 %v853_v8  ;;  %v781_v17 = vld [vmem:[#allocation5 + $0xb38] sm:$0xff] }
 0x316   : > { %2559 = vmatpush.msrb.mxu3 %v921_v9  ;;  %2501 = vmatpush.msrb.mxu0 %v721_v12  ;;  %v845_v18 = vld [vmem:[#allocation5 + $0xd38] sm:$0xff] }
 0x317   : > { %2521 = vmatpush.msrb.mxu1 %v785_v13  ;;  %v913_v19 = vld [vmem:[#allocation5 + $0xf58] sm:$0xff]  ;;  %2541 = vmatpush.msrb.mxu2 %v849_v14 }
 0x318   : > { %2560 = vmatpush.msrb.mxu3 %v917_v15  ;;  %v713_v23 = vld [vmem:[#allocation5 + $0x918] sm:$0xff]  ;;  %2502 = vmatpush.msrb.mxu0 %v717_v16  ;;  %v4732_v16 = vpop.f32.mrf.mxu3 }
 0x319   : > { %v777_v24 = vld [vmem:[#allocation5 + $0xb18] sm:$0xff]  ;;  %2522 = vmatpush.msrb.mxu1 %v781_v17  ;;  %2542 = vmatpush.msrb.mxu2 %v845_v18  ;;  %v4734_v17 = vpop.f32.mrf.mxu1 }
 0x31a   : > { %v841_v26 = vld [vmem:[#allocation5 + $0xd18] sm:$0xff]  ;;  %2561 = vmatpush.msrb.mxu3 %v913_v19  ;;  %2503 = vmatpush.msrb.mxu0 %v713_v23 }
 0x31b   : > { %v909_v27 = vld [vmem:[#allocation5 + $0xf38] sm:$0xff]  ;;  %2523 = vmatpush.msrb.mxu1 %v777_v24  ;;  %2543 = vmatpush.msrb.mxu2 %v841_v26 }
 0x31c   : > { %v709_v28 = vld [vmem:[#allocation5 + $0x8f8] sm:$0xff]  ;;  %2562 = vmatpush.msrb.mxu3 %v909_v27  ;;  %2432 = vmatmul.f32.vlgmr.msra.gmra.mxu0 %v4623_v2  ;;  %v4738_v27 = vpop.f32.mrf.mxu2 }
 0x31d   : > { %v773_v29 = vld [vmem:[#allocation5 + $0xaf8] sm:$0xff]  ;;  %2504 = vmatpush.msrb.mxu0 %v709_v28  ;;  %2452 = vmatmul.f32.vlgmr.msra.gmra.mxu1 %v4625_v3  ;;  %v4740_v28 = vpop.f32.mrf.mxu0 }
 0x31e   : > { %v837_v34 = vld [vmem:[#allocation5 + $0xcf8] sm:$0xff]  ;;  %2524 = vmatpush.msrb.mxu1 %v773_v29  ;;  %2472 = vmatmul.f32.vlgmr.msra.gmra.mxu2 %v4627_v4 }
 0x31f   : > { %v905_v35 = vld [vmem:[#allocation5 + $0xf18] sm:$0xff]  ;;  %2544 = vmatpush.msrb.mxu2 %v837_v34  ;;  %2492 = vmatmul.f32.vlgmr.msra.gmra.mxu3 %v4632_v10 }
 0x320   : > { %v705_v38 = vld [vmem:[#allocation5 + $0x8d8] sm:$0xff]  ;;  %2563 = vmatpush.msrb.mxu3 %v905_v35 }
 0x321   : > { %v769_v39 = vld [vmem:[#allocation5 + $0xad8] sm:$0xff]  ;;  %2505 = vmatpush.msrb.mxu0 %v705_v38 }
 0x322   : > { %v833_v40 = vld [vmem:[#allocation5 + $0xcd8] sm:$0xff]  ;;  %2525 = vmatpush.msrb.mxu1 %v769_v39 }
 0x323   : > { %v901_v41 = vld [vmem:[#allocation5 + $0xef8] sm:$0xff]  ;;  %2545 = vmatpush.msrb.mxu2 %v833_v40  ;;  %v4744_v40 = vpop.f32.mrf.mxu3 }
 0x324   : > { %v701_v43 = vld [vmem:[#allocation5 + $0x8b8] sm:$0xff]  ;;  %2564 = vmatpush.msrb.mxu3 %v901_v41  ;;  %v4746_v41 = vpop.f32.mrf.mxu1 }
 0x325   : > { %v765_v44 = vld [vmem:[#allocation5 + $0xab8] sm:$0xff]  ;;  %2506 = vmatpush.msrb.mxu0 %v701_v43 }
 0x326   : > { %v829_v47 = vld [vmem:[#allocation5 + $0xcb8] sm:$0xff]  ;;  %2526 = vmatpush.msrb.mxu1 %v765_v44 }
 0x327   : > { %v897_v48 = vld [vmem:[#allocation5 + $0xed8] sm:$0xff]  ;;  %2546 = vmatpush.msrb.mxu2 %v829_v47 }
 0x328   : > { %v697_v50 = vld [vmem:[#allocation5 + $0x898] sm:$0xff]  ;;  %2565 = vmatpush.msrb.mxu3 %v897_v48 }
 0x329   : > { %v761_v51 = vld [vmem:[#allocation5 + $0xa98] sm:$0xff]  ;;  %2507 = vmatpush.msrb.mxu0 %v697_v50 }
 0x32a   : > { %v825_v52 = vld [vmem:[#allocation5 + $0xc98] sm:$0xff]  ;;  %2527 = vmatpush.msrb.mxu1 %v761_v51  ;;  %v4748_v51 = vpop.f32.mrf.mxu2 }
 0x32b   : > { %v893_v55 = vld [vmem:[#allocation5 + $0xeb8] sm:$0xff]  ;;  %2547 = vmatpush.msrb.mxu2 %v825_v52  ;;  %v4750_v52 = vpop.f32.mrf.mxu0 }
 0x32c   : > { %v693_v57 = vld [vmem:[#allocation5 + $0x878] sm:$0xff]  ;;  %2566 = vmatpush.msrb.mxu3 %v893_v55 }
 0x32d   : > { %v757_v58 = vld [vmem:[#allocation5 + $0xa78] sm:$0xff]  ;;  %2508 = vmatpush.msrb.mxu0 %v693_v57 }
 0x32e   : > { %v821_v59 = vld [vmem:[#allocation5 + $0xc78] sm:$0xff]  ;;  %2528 = vmatpush.msrb.mxu1 %v757_v58 }
 0x32f   : > { %v889_v60 = vld [vmem:[#allocation5 + $0xe98] sm:$0xff]  ;;  %2548 = vmatpush.msrb.mxu2 %v821_v59 }
 0x330   : > { %v689_v61 = vld [vmem:[#allocation5 + $0x858] sm:$0xff]  ;;  %2567 = vmatpush.msrb.mxu3 %v889_v60 }
 0x331   : > { %v753_v62 = vld [vmem:[#allocation5 + $0xa58] sm:$0xff]  ;;  %2509 = vmatpush.msrb.mxu0 %v689_v61  ;;  %v4754_v61 = vpop.f32.mrf.mxu3 }
 0x332   : > { %v817_v63 = vld [vmem:[#allocation5 + $0xc58] sm:$0xff]  ;;  %2529 = vmatpush.msrb.mxu1 %v753_v62  ;;  %v4756_v62 = vpop.f32.mrf.mxu1 }
 0x333   : > { %v885_v0 = vld [vmem:[#allocation5 + $0xe78] sm:$0xff]  ;;  %2549 = vmatpush.msrb.mxu2 %v817_v63 }
 0x334   : > { %v685_v6 = vld [vmem:[#allocation5 + $0x838] sm:$0xff]  ;;  %2568 = vmatpush.msrb.mxu3 %v885_v0 }
 0x335   : > { %v749_v7 = vld [vmem:[#allocation5 + $0xa38] sm:$0xff]  ;;  %2510 = vmatpush.msrb.mxu0 %v685_v6 }
 0x336   : > { %v813_v8 = vld [vmem:[#allocation5 + $0xc38] sm:$0xff]  ;;  %2530 = vmatpush.msrb.mxu1 %v749_v7 }
 0x337   : > { %v881_v9 = vld [vmem:[#allocation5 + $0xe58] sm:$0xff]  ;;  %2550 = vmatpush.msrb.mxu2 %v813_v8 }
 0x338   : > { %v681_v12 = vld [vmem:[#allocation5 + $0x818] sm:$0xff]  ;;  %2569 = vmatpush.msrb.mxu3 %v881_v9 }
 0x339   : > { %v745_v13 = vld [vmem:[#allocation5 + $0xa18] sm:$0xff]  ;;  %2511 = vmatpush.msrb.mxu0 %v681_v12  ;;  %v4760_v12 = vpop.f32.mrf.mxu2 }
 0x33a   : > { %v809_v14 = vld [vmem:[#allocation5 + $0xc18] sm:$0xff]  ;;  %2531 = vmatpush.msrb.mxu1 %v745_v13  ;;  %2512 = vmatmul.f32.vlgmr.msrb.gmra.mxu0 %v4641_v30 }
 0x33b   : > { %v877_v15 = vld [vmem:[#allocation5 + $0xe38] sm:$0xff]  ;;  %2551 = vmatpush.msrb.mxu2 %v809_v14  ;;  %2532 = vmatmul.f32.vlgmr.msrb.gmra.mxu1 %v4647_v37 }
 0x33c   : > { %v997_v18 = vld [vmem:[#allocation5 + $0x11f8] sm:$0xff]  ;;  %2570 = vmatpush.msrb.mxu3 %v877_v15  ;;  %2552 = vmatmul.f32.vlgmr.msrb.gmra.mxu2 %v4638_v25 }
 0x33d   : > { %v1061_v19 = vld [vmem:[#allocation5 + $0x13f8] sm:$0xff]  ;;  %2576 = vmatpush.msra.mxu0 %v997_v18  ;;  %v4762_v18 = vpop.f32.mrf.mxu0 }
 0x33e   : > { %v1125_v23 = vld [vmem:[#allocation5 + $0x15f8] sm:$0xff]  ;;  %2596 = vmatpush.msra.mxu1 %v1061_v19 }
 0x33f   : > { %v873_v24 = vld [vmem:[#allocation5 + $0xe18] sm:$0xff]  ;;  %2616 = vmatpush.msra.mxu2 %v1125_v23 }
 0x340   : > { %v993_v26 = vld [vmem:[#allocation5 + $0x11d8] sm:$0xff]  ;;  %2571 = vmatpush.msrb.mxu3 %v873_v24 }
 0x341   : > { %v1057_v29 = vld [vmem:[#allocation5 + $0x13d8] sm:$0xff]  ;;  %2577 = vmatpush.msra.mxu0 %v993_v26  ;;  %2572 = vmatmul.f32.vlgmr.msrb.gmra.mxu3 %v4644_v33  ;;  %v4764_v26 = vpop.f32.mrf.mxu3 }
 0x342   : > { %v1121_v34 = vld [vmem:[#allocation5 + $0x15d8] sm:$0xff]  ;;  %2597 = vmatpush.msra.mxu1 %v1057_v29 }
 0x343   : > { %v1189_v35 = vld [vmem:[#allocation5 + $0x17f8] sm:$0xff]  ;;  %2617 = vmatpush.msra.mxu2 %v1121_v34 }
 0x344   : > { %v989_v38 = vld [vmem:[#allocation5 + $0x11b8] sm:$0xff]  ;;  %2636 = vmatpush.msra.mxu3 %v1189_v35 }
 0x345   : > { %v1053_v2 = vld [vmem:[#allocation5 + $0x13b8] sm:$0xff]  ;;  %2578 = vmatpush.msra.mxu0 %v989_v38 }
 0x346   : > { %v1117_v3 = vld [vmem:[#allocation5 + $0x15b8] sm:$0xff]  ;;  %2598 = vmatpush.msra.mxu1 %v1053_v2  ;;  %v4766_v2 = vpop.f32.mrf.mxu1 }
 0x347   : > { %v1185_v39 = vld [vmem:[#allocation5 + $0x17d8] sm:$0xff]  ;;  %2618 = vmatpush.msra.mxu2 %v1117_v3 }
 0x348   : > { %v985_v4 = vld [vmem:[#allocation5 + $0x1198] sm:$0xff]  ;;  %2637 = vmatpush.msra.mxu3 %v1185_v39 }
 0x349   : > { %v1049_v43 = vld [vmem:[#allocation5 + $0x1398] sm:$0xff]  ;;  %2579 = vmatpush.msra.mxu0 %v985_v4 }
 0x34a   : > { %v1113_v44 = vld [vmem:[#allocation5 + $0x1598] sm:$0xff]  ;;  %2599 = vmatpush.msra.mxu1 %v1049_v43 }
 0x34b   : > { %v1181_v47 = vld [vmem:[#allocation5 + $0x17b8] sm:$0xff]  ;;  %2619 = vmatpush.msra.mxu2 %v1113_v44 }
 0x34c   : > { %v981_v48 = vld [vmem:[#allocation5 + $0x1178] sm:$0xff]  ;;  %2638 = vmatpush.msra.mxu3 %v1181_v47 }
 0x34d   : > { %v1045_v10 = vld [vmem:[#allocation5 + $0x1378] sm:$0xff]  ;;  %2580 = vmatpush.msra.mxu0 %v981_v48 }
 0x34e   : > { %v1109_v50 = vld [vmem:[#allocation5 + $0x1578] sm:$0xff]  ;;  %2600 = vmatpush.msra.mxu1 %v1045_v10 }
 0x34f   : > { %v1177_v55 = vld [vmem:[#allocation5 + $0x1798] sm:$0xff]  ;;  %2620 = vmatpush.msra.mxu2 %v1109_v50  ;;  %v4768_v50 = vpop.f32.mrf.mxu2 }
 0x350   : > { %v977_v57 = vld [vmem:[#allocation5 + $0x1158] sm:$0xff]  ;;  %2639 = vmatpush.msra.mxu3 %v1177_v55  ;;  %v4770_v55 = vpop.f32.mrf.mxu0 }
 0x351   : > { %v1041_v58 = vld [vmem:[#allocation5 + $0x1358] sm:$0xff]  ;;  %2581 = vmatpush.msra.mxu0 %v977_v57 }
 0x352   : > { %v1105_v59 = vld [vmem:[#allocation5 + $0x1558] sm:$0xff]  ;;  %2601 = vmatpush.msra.mxu1 %v1041_v58 }
 0x353   : > { %v1173_v60 = vld [vmem:[#allocation5 + $0x1778] sm:$0xff]  ;;  %2621 = vmatpush.msra.mxu2 %v1105_v59 }
 0x354   : > { %v973_v63 = vld [vmem:[#allocation5 + $0x1138] sm:$0xff]  ;;  %2640 = vmatpush.msra.mxu3 %v1173_v60 }
 0x355   : > { %v1037_v0 = vld [vmem:[#allocation5 + $0x1338] sm:$0xff]  ;;  %2582 = vmatpush.msra.mxu0 %v973_v63 }
 0x356   : > { %v1101_v25 = vld [vmem:[#allocation5 + $0x1538] sm:$0xff]  ;;  %2602 = vmatpush.msra.mxu1 %v1037_v0 }
 0x357   : > { %v1169_v6 = vld [vmem:[#allocation5 + $0x1758] sm:$0xff]  ;;  %2622 = vmatpush.msra.mxu2 %v1101_v25 }
 0x358   : > { %v969_v7 = vld [vmem:[#allocation5 + $0x1118] sm:$0xff]  ;;  %2641 = vmatpush.msra.mxu3 %v1169_v6 }
 0x359   : > { %v1033_v8 = vld [vmem:[#allocation5 + $0x1318] sm:$0xff]  ;;  %2583 = vmatpush.msra.mxu0 %v969_v7  ;;  %v4772_v7 = vpop.f32.mrf.mxu3 }
 0x35a   : > { %v1097_v30 = vld [vmem:[#allocation5 + $0x1518] sm:$0xff]  ;;  %2603 = vmatpush.msra.mxu1 %v1033_v8  ;;  %v4774_v8 = vpop.f32.mrf.mxu1 }
 0x35b   : > { %v1165_v9 = vld [vmem:[#allocation5 + $0x1738] sm:$0xff]  ;;  %2623 = vmatpush.msra.mxu2 %v1097_v30 }
 0x35c   : > { %v965_v33 = vld [vmem:[#allocation5 + $0x10f8] sm:$0xff]  ;;  %2642 = vmatpush.msra.mxu3 %v1165_v9 }
 0x35d   : > { %v1029_v13 = vld [vmem:[#allocation5 + $0x12f8] sm:$0xff]  ;;  %2584 = vmatpush.msra.mxu0 %v965_v33 }
 0x35e   : > { %v1093_v14 = vld [vmem:[#allocation5 + $0x14f8] sm:$0xff]  ;;  %2604 = vmatpush.msra.mxu1 %v1029_v13 }
 0x35f   : > { %v1161_v15 = vld [vmem:[#allocation5 + $0x1718] sm:$0xff]  ;;  %2624 = vmatpush.msra.mxu2 %v1093_v14 }
 0x360   : > { %v961_v37 = vld [vmem:[#allocation5 + $0x10d8] sm:$0xff]  ;;  %2643 = vmatpush.msra.mxu3 %v1161_v15 }
 0x361   : > { %v1025_v19 = vld [vmem:[#allocation5 + $0x12d8] sm:$0xff]  ;;  %2585 = vmatpush.msra.mxu0 %v961_v37  ;;  %v4776_v37 = vpop.f32.mrf.mxu2 }
 0x362   : > { %v1089_v23 = vld [vmem:[#allocation5 + $0x14d8] sm:$0xff]  ;;  %2605 = vmatpush.msra.mxu1 %v1025_v19  ;;  %v4778_v19 = vpop.f32.mrf.mxu0 }
 0x363   : > { %v1157_v24 = vld [vmem:[#allocation5 + $0x16f8] sm:$0xff]  ;;  %2625 = vmatpush.msra.mxu2 %v1089_v23 }
 0x364   : > { %v957_v29 = vld [vmem:[#allocation5 + $0x10b8] sm:$0xff]  ;;  %2644 = vmatpush.msra.mxu3 %v1157_v24 }
 0x365   : > { %v1021_v34 = vld [vmem:[#allocation5 + $0x12b8] sm:$0xff]  ;;  %2586 = vmatpush.msra.mxu0 %v957_v29 }
 0x366   : > { %v1085_v35 = vld [vmem:[#allocation5 + $0x14b8] sm:$0xff]  ;;  %2606 = vmatpush.msra.mxu1 %v1021_v34 }
 0x367   : > { %v1153_v38 = vld [vmem:[#allocation5 + $0x16d8] sm:$0xff]  ;;  %2626 = vmatpush.msra.mxu2 %v1085_v35  ;;  %v4782_v35 = vld [vmem:[#allocation7] sm:$0xf] }
 0x368   : > { %v953_v3 = vld [vmem:[#allocation5 + $0x1098] sm:$0xff]  ;;  %2645 = vmatpush.msra.mxu3 %v1153_v38 }
 0x369   : > { %v1017_v39 = vld [vmem:[#allocation5 + $0x1298] sm:$0xff]  ;;  %2587 = vmatpush.msra.mxu0 %v953_v3 }
 0x36a   : > { %v1081_v4 = vld [vmem:[#allocation5 + $0x1498] sm:$0xff]  ;;  %2607 = vmatpush.msra.mxu1 %v1017_v39  ;;  %v4784_v39 = vpop.f32.mrf.mxu3 }
 0x36b   : > { %v1149_v43 = vld [vmem:[#allocation5 + $0x16b8] sm:$0xff]  ;;  %2627 = vmatpush.msra.mxu2 %v1081_v4  ;;  %v4786_v4 = vpop.f32.mrf.mxu1 }
 0x36c   : > { %v949_v44 = vld [vmem:[#allocation5 + $0x1078] sm:$0xff]  ;;  %2646 = vmatpush.msra.mxu3 %v1149_v43 }
 0x36d   : > { %v1013_v47 = vld [vmem:[#allocation5 + $0x1278] sm:$0xff]  ;;  %2588 = vmatpush.msra.mxu0 %v949_v44 }
 0x36e   : > { %v1077_v48 = vld [vmem:[#allocation5 + $0x1478] sm:$0xff]  ;;  %2608 = vmatpush.msra.mxu1 %v1013_v47  ;;  %v1448_v47 = vperm.slane %v4782_v35, 0 }
 0x36f   : > { %v1145_v10 = vld [vmem:[#allocation5 + $0x1698] sm:$0xff]  ;;  %2628 = vmatpush.msra.mxu2 %v1077_v48 }
 0x370   : > { %v945_v57 = vld [vmem:[#allocation5 + $0x1058] sm:$0xff]  ;;  %2647 = vmatpush.msra.mxu3 %v1145_v10 }
 0x371   : > { %v1009_v58 = vld [vmem:[#allocation5 + $0x1258] sm:$0xff]  ;;  %2589 = vmatpush.msra.mxu0 %v945_v57  ;;  %v1449_v57 = vperm.slane %v4782_v35, 1 }
 0x372   : > { %v1073_v59 = vld [vmem:[#allocation5 + $0x1458] sm:$0xff]  ;;  %2609 = vmatpush.msra.mxu1 %v1009_v58  ;;  %v1450_v58 = vperm.slane %v4782_v35, 2 }
 0x373   : > { %v1141_v60 = vld [vmem:[#allocation5 + $0x1678] sm:$0xff]  ;;  %2629 = vmatpush.msra.mxu2 %v1073_v59  ;;  %v4793_v59 = vpop.f32.mrf.mxu2 }
 0x374   : > { %v941_v63 = vld [vmem:[#allocation5 + $0x1038] sm:$0xff]  ;;  %2648 = vmatpush.msra.mxu3 %v1141_v60  ;;  %v2113_v60 = vpop.f32.mrf.mxu0 }
 0x375   : > { %v1005_v0 = vld [vmem:[#allocation5 + $0x1238] sm:$0xff]  ;;  %2590 = vmatpush.msra.mxu0 %v941_v63 }
 0x376   : > { %v1069_v25 = vld [vmem:[#allocation5 + $0x1438] sm:$0xff]  ;;  %2610 = vmatpush.msra.mxu1 %v1005_v0 }
 0x377   : > { %v1137_v6 = vld [vmem:[#allocation5 + $0x1658] sm:$0xff]  ;;  %2630 = vmatpush.msra.mxu2 %v1069_v25 }
 0x378   : > { %v937_v30 = vld [vmem:[#allocation5 + $0x1018] sm:$0xff]  ;;  %2649 = vmatpush.msra.mxu3 %v1137_v6 }
 0x379   : > { %v1001_v9 = vld [vmem:[#allocation5 + $0x1218] sm:$0xff]  ;;  %2591 = vmatpush.msra.mxu0 %v937_v30  ;;  %v1474_v30 = vadd.f32 %v4716_v11, %v1448_v47 }
 0x37a   : > { %v1065_v33 = vld [vmem:[#allocation5 + $0x1418] sm:$0xff]  ;;  %2611 = vmatpush.msra.mxu1 %v1001_v9  ;;  %2592 = vmatmul.f32.vlgmr.msra.gmra.mxu0 %v4654_v21 }
 0x37b   : > { %v1133_v13 = vld [vmem:[#allocation5 + $0x1638] sm:$0xff]  ;;  %2631 = vmatpush.msra.mxu2 %v1065_v33  ;;  %2612 = vmatmul.f32.vlgmr.msra.gmra.mxu1 %v4660_v31 }
 0x37c   : > { %v1253_v14 = vld [vmem:[#allocation5 + $0x19f8] sm:$0xff]  ;;  %2650 = vmatpush.msra.mxu3 %v1133_v13  ;;  %2632 = vmatmul.f32.vlgmr.msra.gmra.mxu2 %v4656_v22  ;;  %v1794_v13 = vadd.f32 %v4750_v52, %v1449_v57 }
 0x37d   : > { %v1317_v15 = vld [vmem:[#allocation5 + $0x1bf8] sm:$0xff]  ;;  %2656 = vmatpush.msrb.mxu0 %v1253_v14  ;;  %v2114_v14 = vadd.f32 %v2113_v60, %v1450_v58 }
 0x37e   : > { %v1381_v23 = vld [vmem:[#allocation5 + $0x1df8] sm:$0xff]  ;;  %2676 = vmatpush.msrb.mxu1 %v1317_v15 }
 0x37f   : > { %v1129_v24 = vld [vmem:[#allocation5 + $0x1618] sm:$0xff]  ;;  %2696 = vmatpush.msrb.mxu2 %v1381_v23 }
 0x380   : > { %v1249_v29 = vld [vmem:[#allocation5 + $0x19d8] sm:$0xff]  ;;  %2651 = vmatpush.msra.mxu3 %v1129_v24  ;;  %v4797_v24 = vpop.f32.mrf.mxu3 }
 0x381   : > { %v1313_v34 = vld [vmem:[#allocation5 + $0x1bd8] sm:$0xff]  ;;  %2652 = vmatmul.f32.vlgmr.msra.gmra.mxu3 %v4662_v32  ;;  %2657 = vmatpush.msrb.mxu0 %v1249_v29  ;;  %v2133_v29 = vpop.f32.mrf.mxu1 }
 0x382   : > { %v1377_v38 = vld [vmem:[#allocation5 + $0x1dd8] sm:$0xff]  ;;  %2677 = vmatpush.msrb.mxu1 %v1313_v34 }
 0x383   : > { %v1445_v3 = vld [vmem:[#allocation5 + $0x1ff8] sm:$0xff]  ;;  %2697 = vmatpush.msrb.mxu2 %v1377_v38 }
 0x384   : > { %v1245_v21 = vld [vmem:[#allocation5 + $0x19b8] sm:$0xff]  ;;  %2716 = vmatpush.msrb.mxu3 %v1445_v3 }
 0x385   : > { %v1309_v22 = vld [vmem:[#allocation5 + $0x1bb8] sm:$0xff]  ;;  %2658 = vmatpush.msrb.mxu0 %v1245_v21  ;;  %v1494_v21 = vadd.f32 %v4718_v20, %v1474_v30 }
 0x386   : > { %v1373_v43 = vld [vmem:[#allocation5 + $0x1db8] sm:$0xff]  ;;  %2678 = vmatpush.msrb.mxu1 %v1309_v22 }
 0x387   : > { %v1441_v44 = vld [vmem:[#allocation5 + $0x1fd8] sm:$0xff]  ;;  %2698 = vmatpush.msrb.mxu2 %v1373_v43  ;;  %v1814_v43 = vadd.f32 %v4756_v62, %v1794_v13 }
 0x388   : > { %v1241_v48 = vld [vmem:[#allocation5 + $0x1998] sm:$0xff]  ;;  %2717 = vmatpush.msrb.mxu3 %v1441_v44  ;;  %v2134_v44 = vadd.f32 %v2133_v29, %v2114_v14  ;;  %v2173_v30 = vpop.f32.mrf.mxu3 }
 0x389   : > { %v1305_v10 = vld [vmem:[#allocation5 + $0x1b98] sm:$0xff]  ;;  %2659 = vmatpush.msrb.mxu0 %v1241_v48 }
 0x38a   : > { %v1369_v31 = vld [vmem:[#allocation5 + $0x1d98] sm:$0xff]  ;;  %2679 = vmatpush.msrb.mxu1 %v1305_v10  ;;  %v2153_v10 = vpop.f32.mrf.mxu2 }
 0x38b   : > { %v1437_v32 = vld [vmem:[#allocation5 + $0x1fb8] sm:$0xff]  ;;  %2699 = vmatpush.msrb.mxu2 %v1369_v31 }
 0x38c   : > { %v1237_v63 = vld [vmem:[#allocation5 + $0x1978] sm:$0xff]  ;;  %2718 = vmatpush.msrb.mxu3 %v1437_v32  ;;  %v1514_v32 = vadd.f32 %v4720_v36, %v1494_v21 }
 0x38d   : > { %v1301_v0 = vld [vmem:[#allocation5 + $0x1b78] sm:$0xff]  ;;  %2660 = vmatpush.msrb.mxu0 %v1237_v63  ;;  %v1834_v63 = vadd.f32 %v4760_v12, %v1814_v43 }
 0x38e   : > { %v1365_v25 = vld [vmem:[#allocation5 + $0x1d78] sm:$0xff]  ;;  %2680 = vmatpush.msrb.mxu1 %v1301_v0  ;;  %v2154_v0 = vadd.f32 %v2153_v10, %v2134_v44  ;;  %v1534_v14 = vadd.f32 %v4724_v49, %v1514_v32 }
 0x38f   : > { %v1433_v6 = vld [vmem:[#allocation5 + $0x1f98] sm:$0xff]  ;;  %2700 = vmatpush.msrb.mxu2 %v1365_v25 }
 0x390   : > { %v1233_v9 = vld [vmem:[#allocation5 + $0x1958] sm:$0xff]  ;;  %2719 = vmatpush.msrb.mxu3 %v1433_v6  ;;  %v2174_v29 = vadd.f32 %v2173_v30, %v2154_v0 }
 0x391   : > { %v1297_v33 = vld [vmem:[#allocation5 + $0x1b58] sm:$0xff]  ;;  %2661 = vmatpush.msrb.mxu0 %v1233_v9 }
 0x392   : > { %v1361_v15 = vld [vmem:[#allocation5 + $0x1d58] sm:$0xff]  ;;  %2681 = vmatpush.msrb.mxu1 %v1297_v33 }
 0x393   : > { %v1429_v23 = vld [vmem:[#allocation5 + $0x1f78] sm:$0xff]  ;;  %2701 = vmatpush.msrb.mxu2 %v1361_v15 }
 0x394   : > { %v1229_v34 = vld [vmem:[#allocation5 + $0x1938] sm:$0xff]  ;;  %2720 = vmatpush.msrb.mxu3 %v1429_v23  ;;  %v1854_v23 = vadd.f32 %v4764_v26, %v1834_v63 }
 0x395   : > { %v1293_v38 = vld [vmem:[#allocation5 + $0x1b38] sm:$0xff]  ;;  %2662 = vmatpush.msrb.mxu0 %v1229_v34 }
 0x396   : > { %v1357_v11 = vld [vmem:[#allocation5 + $0x1d38] sm:$0xff]  ;;  %2682 = vmatpush.msrb.mxu1 %v1293_v38  ;;  %v1874_v44 = vadd.f32 %v4762_v18, %v1854_v23  ;;  %v3016_v23 = vld [vmem:[#allocation8 + $0x8a0] sm:$0xff] }
 0x397   : > { %v1425_v3 = vld [vmem:[#allocation5 + $0x1f58] sm:$0xff]  ;;  %2702 = vmatpush.msrb.mxu2 %v1357_v11  ;;  %v2193_v11 = vpop.f32.mrf.mxu0 }
 0x398   : > { %v1225_v52 = vld [vmem:[#allocation5 + $0x1918] sm:$0xff]  ;;  %2721 = vmatpush.msrb.mxu3 %v1425_v3 }
 0x399   : > { %v1289_v22 = vld [vmem:[#allocation5 + $0x1b18] sm:$0xff]  ;;  %2663 = vmatpush.msrb.mxu0 %v1225_v52 }
 0x39a   : > { %v1353_v47 = vld [vmem:[#allocation5 + $0x1d18] sm:$0xff]  ;;  %2683 = vmatpush.msrb.mxu1 %v1289_v22  ;;  %v1554_v22 = vadd.f32 %v4722_v42, %v1534_v14  ;;  %v2253_v14 = vpop.f32.mrf.mxu3 }
 0x39b   : > { %v1421_v48 = vld [vmem:[#allocation5 + $0x1f38] sm:$0xff]  ;;  %2703 = vmatpush.msrb.mxu2 %v1353_v47  ;;  %v2194_v47 = vadd.f32 %v2193_v11, %v2174_v29 }
 0x39c   : > { %v1221_v57 = vld [vmem:[#allocation5 + $0x18f8] sm:$0xff]  ;;  %2722 = vmatpush.msrb.mxu3 %v1421_v48  ;;  %v1574_v32 = vadd.f32 %v4726_v56, %v1554_v22 }
 0x39d   : > { %v1285_v58 = vld [vmem:[#allocation5 + $0x1af8] sm:$0xff]  ;;  %2664 = vmatpush.msrb.mxu0 %v1221_v57  ;;  %v2213_v57 = vpop.f32.mrf.mxu1 }
 0x39e   : > { %v1349_v31 = vld [vmem:[#allocation5 + $0x1cf8] sm:$0xff]  ;;  %2684 = vmatpush.msrb.mxu1 %v1285_v58  ;;  %v2214_v63 = vadd.f32 %v2213_v57, %v2194_v47  ;;  %v1594_v56 = vadd.f32 %v4728_v1, %v1574_v32  ;;  %v2788_v32 = vld [vmem:[#allocation8 + $0x180] sm:$0xff] }
 0x39f   : > { %v1417_v20 = vld [vmem:[#allocation5 + $0x1f18] sm:$0xff]  ;;  %2704 = vmatpush.msrb.mxu2 %v1349_v31  ;;  %v2273_v29 = vpop.f32.mrf.mxu0 }
 0x3a0   : > { %v1217_v60 = vld [vmem:[#allocation5 + $0x18d8] sm:$0xff]  ;;  %2723 = vmatpush.msrb.mxu3 %v1417_v20  ;;  %v1614_v1 = vadd.f32 %v4732_v16, %v1594_v56 }
 0x3a1   : > { %v1281_v62 = vld [vmem:[#allocation5 + $0x1ad8] sm:$0xff]  ;;  %2665 = vmatpush.msrb.mxu0 %v1217_v60 }
 0x3a2   : > { %v1345_v25 = vld [vmem:[#allocation5 + $0x1cd8] sm:$0xff]  ;;  %2685 = vmatpush.msrb.mxu1 %v1281_v62  ;;  %v1894_v62 = vadd.f32 %v4766_v2, %v1874_v44  ;;  %v1634_v11 = vadd.f32 %v4730_v5, %v1614_v1  ;;  %v2800_v5 = vld [vmem:[#allocation8 + $0x1e0] sm:$0xff] }
 0x3a3   : > { %v1413_v6 = vld [vmem:[#allocation5 + $0x1ef8] sm:$0xff]  ;;  %2705 = vmatpush.msrb.mxu2 %v1345_v25  ;;  %v2896_v44 = vld [vmem:[#allocation8 + $0x4e0] sm:$0xff] }
 0x3a4   : > { %v1213_v9 = vld [vmem:[#allocation5 + $0x18b8] sm:$0xff]  ;;  %2724 = vmatpush.msrb.mxu3 %v1413_v6  ;;  %v2233_v6 = vpop.f32.mrf.mxu2  ;;  %v1914_v2 = vadd.f32 %v4768_v50, %v1894_v62  ;;  %v2956_v1 = vld [vmem:[#allocation8 + $0x6c0] sm:$0xff] }
 0x3a5   : > { %v1277_v33 = vld [vmem:[#allocation5 + $0x1ab8] sm:$0xff]  ;;  %2666 = vmatpush.msrb.mxu0 %v1213_v9 }
 0x3a6   : > { %v1341_v13 = vld [vmem:[#allocation5 + $0x1cb8] sm:$0xff]  ;;  %2686 = vmatpush.msrb.mxu1 %v1277_v33 }
 0x3a7   : > { %v1409_v36 = vld [vmem:[#allocation5 + $0x1ed8] sm:$0xff]  ;;  %2706 = vmatpush.msrb.mxu2 %v1341_v13  ;;  %v2353_v62 = vpop.f32.mrf.mxu0 }
 0x3a8   : > { %v1209_v15 = vld [vmem:[#allocation5 + $0x1898] sm:$0xff]  ;;  %2725 = vmatpush.msrb.mxu3 %v1409_v36  ;;  %v2234_v36 = vadd.f32 %v2233_v6, %v2214_v63 }
 0x3a9   : > { %v1273_v12 = vld [vmem:[#allocation5 + $0x1a98] sm:$0xff]  ;;  %2667 = vmatpush.msrb.mxu0 %v1209_v15  ;;  %v2824_v15 = vld [vmem:[#allocation8 + $0x2a0] sm:$0xff] }
 0x3aa   : > { %v1337_v34 = vld [vmem:[#allocation5 + $0x1c98] sm:$0xff]  ;;  %2687 = vmatpush.msrb.mxu1 %v1273_v12  ;;  %v2920_v12 = vld [vmem:[#allocation8 + $0x5a0] sm:$0xff] }
 0x3ab   : > { %v1405_v38 = vld [vmem:[#allocation5 + $0x1eb8] sm:$0xff]  ;;  %2707 = vmatpush.msrb.mxu2 %v1337_v34 }
 0x3ac   : > { %v1205_v3 = vld [vmem:[#allocation5 + $0x1878] sm:$0xff]  ;;  %2726 = vmatpush.msrb.mxu3 %v1405_v38 }
 0x3ad   : > { %v1269_v21 = vld [vmem:[#allocation5 + $0x1a78] sm:$0xff]  ;;  %2668 = vmatpush.msrb.mxu0 %v1205_v3  ;;  %v2812_v3 = vld [vmem:[#allocation8 + $0x240] sm:$0xff] }
 0x3ae   : > { %v1333_v52 = vld [vmem:[#allocation5 + $0x1c78] sm:$0xff]  ;;  %2688 = vmatpush.msrb.mxu1 %v1269_v21  ;;  %v2908_v21 = vld [vmem:[#allocation8 + $0x540] sm:$0xff] }
 0x3af   : > { %v1401_v49 = vld [vmem:[#allocation5 + $0x1e98] sm:$0xff]  ;;  %2708 = vmatpush.msrb.mxu2 %v1333_v52 }
 0x3b0   : > { %v1201_v43 = vld [vmem:[#allocation5 + $0x1858] sm:$0xff]  ;;  %2727 = vmatpush.msrb.mxu3 %v1401_v49 }
 0x3b1   : > { %v1265_v26 = vld [vmem:[#allocation5 + $0x1a58] sm:$0xff]  ;;  %2669 = vmatpush.msrb.mxu0 %v1201_v43  ;;  %v1654_v43 = vadd.f32 %v4734_v17, %v1634_v11  ;;  %v2752_v11 = vld [vmem:[#allocation8 + $0x60] sm:$0xff] }
 0x3b2   : > { %v1329_v48 = vld [vmem:[#allocation5 + $0x1c58] sm:$0xff]  ;;  %2689 = vmatpush.msrb.mxu1 %v1265_v26  ;;  %v2313_v26 = vpop.f32.mrf.mxu2 }
 0x3b3   : > { %v1397_v10 = vld [vmem:[#allocation5 + $0x1e78] sm:$0xff]  ;;  %2709 = vmatpush.msrb.mxu2 %v1329_v48  ;;  %v2992_v48 = vld [vmem:[#allocation8 + $0x7e0] sm:$0xff] }
 0x3b4   : > { %v1197_v58 = vld [vmem:[#allocation5 + $0x1838] sm:$0xff]  ;;  %2728 = vmatpush.msrb.mxu3 %v1397_v10  ;;  %v1674_v10 = vadd.f32 %v4738_v27, %v1654_v43 }
 0x3b5   : > { %v1261_v31 = vld [vmem:[#allocation5 + $0x1a38] sm:$0xff]  ;;  %2670 = vmatpush.msrb.mxu0 %v1197_v58 }
 0x3b6   : > { %v1325_v20 = vld [vmem:[#allocation5 + $0x1c38] sm:$0xff]  ;;  %2690 = vmatpush.msrb.mxu1 %v1261_v31 }
 0x3b7   : > { %v1393_v42 = vld [vmem:[#allocation5 + $0x1e58] sm:$0xff]  ;;  %2710 = vmatpush.msrb.mxu2 %v1325_v20 }
 0x3b8   : > { %v1193_v60 = vld [vmem:[#allocation5 + $0x1818] sm:$0xff]  ;;  %2729 = vmatpush.msrb.mxu3 %v1393_v42  ;;  %v2333_v42 = vpop.f32.mrf.mxu3 }
 0x3b9   : > { %v1257_v18 = vld [vmem:[#allocation5 + $0x1a18] sm:$0xff]  ;;  %2671 = vmatpush.msrb.mxu0 %v1193_v60  ;;  %v2884_v60 = vld [vmem:[#allocation8 + $0x480] sm:$0xff] }
 0x3ba   : > { %v1321_v0 = vld [vmem:[#allocation5 + $0x1c18] sm:$0xff]  ;;  %2691 = vmatpush.msrb.mxu1 %v1257_v18  ;;  %2672 = vmatmul.f32.vlgmr.msrb.gmra.mxu0 %v4670_v45  ;;  %v1934_v45 = vadd.f32 %v4772_v7, %v1914_v2  ;;  %v1694_v18 = vadd.f32 %v4744_v40, %v1674_v10  ;;  %v2968_v40 = vld [vmem:[#allocation8 + $0x720] sm:$0xff] }
 0x3bb   : > { %v1389_v25 = vld [vmem:[#allocation5 + $0x1e38] sm:$0xff]  ;;  %2711 = vmatpush.msrb.mxu2 %v1321_v0  ;;  %2692 = vmatmul.f32.vlgmr.msrb.gmra.mxu1 %v4676_v53  ;;  %v3004_v53 = vld [vmem:[#allocation8 + $0x840] sm:$0xff] }
 0x3bc   : > { %v2830_v30 = vld [vmem:[#allocation8 + $0x2d0] sm:$0xff]  ;;  %2730 = vmatpush.msrb.mxu3 %v1389_v25  ;;  %2712 = vmatmul.f32.vlgmr.msrb.gmra.mxu2 %v4672_v46  ;;  %v2254_v46 = vadd.f32 %v2253_v14, %v2234_v36  ;;  %v1954_v16 = vadd.f32 %v4770_v55, %v1934_v45  ;;  %v1714_v6 = vadd.f32 %v4740_v28, %v1694_v18  ;;  %v2764_v28 = vld [vmem:[#allocation8 + $0xc0] sm:$0xff]  ;;  %v2915_v10 = vld [vmem:[#allocation8 + $0x578] sm:$0xff] }
 0x3bd   : > { %v2926_v9 = vld [vmem:[#allocation8 + $0x5d0] sm:$0xff]  ;;  %3138 = vmatpush.msra.mxu0 %v2830_v30  ;;  %v2776_v30 = vld [vmem:[#allocation8 + $0x120] sm:$0xff]  ;;  %v2993_v18 = vld [vmem:[#allocation8 + $0x7e8] sm:$0xff] }
 0x3be   : > { %v3022_v33 = vld [vmem:[#allocation8 + $0x8d0] sm:$0xff]  ;;  %3158 = vmatpush.msra.mxu1 %v2926_v9  ;;  %v2274_v52 = vadd.f32 %v2273_v29, %v2254_v46  ;;  %v1974_v47 = vadd.f32 %v4774_v8, %v1954_v16  ;;  %v2980_v8 = vld [vmem:[#allocation8 + $0x780] sm:$0xff]  ;;  %v1734_v14 = vadd.f32 %v4746_v41, %v1714_v6  ;;  %v2783_v6 = vld [vmem:[#allocation8 + $0x158] sm:$0xff] }
 0x3bf   : > { %v1385_v13 = vld [vmem:[#allocation5 + $0x1e18] sm:$0xff]  ;;  %3178 = vmatpush.msra.mxu2 %v3022_v33  ;;  %3139 = vmatpush.msra.mxu0 %v2824_v15  ;;  %v2872_v9 = vld [vmem:[#allocation8 + $0x420] sm:$0xff]  ;;  %v2393_v15 = vpop.f32.mrf.mxu2 }
 0x3c0   : > { %2731 = vmatpush.msrb.mxu3 %v1385_v13  ;;  %v2818_v50 = vld [vmem:[#allocation8 + $0x270] sm:$0xff]  ;;  %3159 = vmatpush.msra.mxu1 %v2920_v12  ;;  %v1994_v31 = vadd.f32 %v4776_v37, %v1974_v47  ;;  %v2860_v12 = vld [vmem:[#allocation8 + $0x3c0] sm:$0xff]  ;;  %v1754_v29 = vadd.f32 %v4748_v51, %v1734_v14  ;;  %v2921_v47 = vld [vmem:[#allocation8 + $0x5a8] sm:$0xff] }
 0x3c1   : > { %2732 = vmatmul.f32.vlgmr.msrb.gmra.mxu3 %v4678_v54  ;;  %v2914_v34 = vld [vmem:[#allocation8 + $0x570] sm:$0xff]  ;;  %3179 = vmatpush.msra.mxu2 %v3016_v23  ;;  %v2293_v54 = vpop.f32.mrf.mxu1  ;;  %v2963_v14 = vld [vmem:[#allocation8 + $0x6f8] sm:$0xff] }
 0x3c2   : > { %v3010_v38 = vld [vmem:[#allocation8 + $0x870] sm:$0xff]  ;;  %3140 = vmatpush.msra.mxu0 %v2818_v50  ;;  %3160 = vmatpush.msra.mxu1 %v2914_v34  ;;  %v2294_v55 = vadd.f32 %v2293_v54, %v2274_v52  ;;  %v2014_v0 = vadd.f32 %v4784_v39, %v1994_v31  ;;  %v2740_v54 = vld [vmem:[#allocation8] sm:$0xff]  ;;  %v2909_v31 = vld [vmem:[#allocation8 + $0x548] sm:$0xff] }
 0x3c3   : > { %3180 = vmatpush.msra.mxu2 %v3010_v38  ;;  %v2806_v49 = vld [vmem:[#allocation8 + $0x210] sm:$0xff]  ;;  %v2413_v38 = vpop.f32.mrf.mxu3 }
 0x3c4   : > { %v2902_v22 = vld [vmem:[#allocation8 + $0x510] sm:$0xff]  ;;  %3141 = vmatpush.msra.mxu0 %v2812_v3  ;;  %3161 = vmatpush.msra.mxu1 %v2908_v21  ;;  %v2314_v20 = vadd.f32 %v2313_v26, %v2294_v55  ;;  %v2034_v56 = vadd.f32 %v4778_v19, %v2014_v0  ;;  %v2848_v3 = vld [vmem:[#allocation8 + $0x360] sm:$0xff]  ;;  %v1774_v21 = vadd.f32 %v4754_v61, %v1754_v29  ;;  %v2927_v26 = vld [vmem:[#allocation8 + $0x5d8] sm:$0xff] }
 0x3c5   : > { %v2998_v7 = vld [vmem:[#allocation8 + $0x810] sm:$0xff]  ;;  %3181 = vmatpush.msra.mxu2 %v3004_v53  ;;  %v3017_v55 = vld [vmem:[#allocation8 + $0x8a8] sm:$0xff]  ;;  %v2855_v29 = vld [vmem:[#allocation8 + $0x398] sm:$0xff] }
 0x3c6   : > { %3142 = vmatpush.msra.mxu0 %v2806_v49  ;;  %3162 = vmatpush.msra.mxu1 %v2902_v22  ;;  %v2794_v57 = vld [vmem:[#allocation8 + $0x1b0] sm:$0xff]  ;;  %v2334_v37 = vadd.f32 %v2333_v42, %v2314_v20  ;;  %v2054_v23 = vadd.f32 %v4786_v4, %v2034_v56  ;;  %v2944_v4 = vld [vmem:[#allocation8 + $0x660] sm:$0xff]  ;;  %v3005_v20 = vld [vmem:[#allocation8 + $0x848] sm:$0xff] }
 0x3c7   : > { %3182 = vmatpush.msra.mxu2 %v2998_v7  ;;  %v2890_v58 = vld [vmem:[#allocation8 + $0x4b0] sm:$0xff]  ;;  %v2836_v49 = vld [vmem:[#allocation8 + $0x300] sm:$0xff]  ;;  %v4833_v7 = vmax.f32 %v1774_v21, 0.0  ;;  %v2903_v42 = vld [vmem:[#allocation8 + $0x518] sm:$0xff] }
 0x3c8   : > { %3143 = vmatpush.msra.mxu0 %v2800_v5  ;;  %3163 = vmatpush.msra.mxu1 %v2896_v44  ;;  %v2986_v17 = vld [vmem:[#allocation8 + $0x7b0] sm:$0xff]  ;;  %v2354_v33 = vadd.f32 %v2353_v62, %v2334_v37  ;;  %v2074_v45 = vadd.f32 %v4793_v59, %v2054_v23  ;;  %v2932_v22 = vld [vmem:[#allocation8 + $0x600] sm:$0xff]  ;;  %v3023_v5 = vld [vmem:[#allocation8 + $0x8d8] sm:$0xff] }
 0x3c9   : > { %3183 = vmatpush.msra.mxu2 %v2992_v48  ;;  %v2782_v27 = vld [vmem:[#allocation8 + $0x150] sm:$0xff]  ;;  %v2373_v13 = vpop.f32.mrf.mxu1  ;;  %v2825_v44 = vld [vmem:[#allocation8 + $0x2a8] sm:$0xff]  ;;  %v2819_v48 = vld [vmem:[#allocation8 + $0x278] sm:$0xff] }
 0x3ca   : > { %3144 = vmatpush.msra.mxu0 %v2794_v57  ;;  %3164 = vmatpush.msra.mxu1 %v2890_v58  ;;  %v2878_v63 = vld [vmem:[#allocation8 + $0x450] sm:$0xff]  ;;  %v2374_v19 = vadd.f32 %v2373_v13, %v2354_v33  ;;  %v2094_v52 = vadd.f32 %v4797_v24, %v2074_v45  ;;  %v2831_v24 = vld [vmem:[#allocation8 + $0x2d8] sm:$0xff]  ;;  %v2813_v58 = vld [vmem:[#allocation8 + $0x248] sm:$0xff] }
 0x3cb   : > { %3184 = vmatpush.msra.mxu2 %v2986_v17  ;;  %v2974_v25 = vld [vmem:[#allocation8 + $0x750] sm:$0xff]  ;;  %v3011_v57 = vld [vmem:[#allocation8 + $0x878] sm:$0xff]  ;;  %v2789_v0 = vld [vmem:[#allocation8 + $0x188] sm:$0xff] }
 0x3cc   : > { %3145 = vmatpush.msra.mxu0 %v2788_v32  ;;  %3165 = vmatpush.msra.mxu1 %v2884_v60  ;;  %v2770_v2 = vld [vmem:[#allocation8 + $0xf0] sm:$0xff]  ;;  %v2394_v46 = vadd.f32 %v2393_v15, %v2374_v19  ;;  %v4835_v43 = vmax.f32 %v2094_v52, 0.0  ;;  %v2807_v17 = vld [vmem:[#allocation8 + $0x218] sm:$0xff]  ;;  %v2801_v60 = vld [vmem:[#allocation8 + $0x1e8] sm:$0xff] }
 0x3cd   : > { %3185 = vmatpush.msra.mxu2 %v2980_v8  ;;  %v2866_v36 = vld [vmem:[#allocation8 + $0x3f0] sm:$0xff]  ;;  %v2999_v32 = vld [vmem:[#allocation8 + $0x818] sm:$0xff]  ;;  %v2897_v8 = vld [vmem:[#allocation8 + $0x4e8] sm:$0xff] }
 0x3ce   : > { %3146 = vmatpush.msra.mxu0 %v2782_v27  ;;  %3166 = vmatpush.msra.mxu1 %v2878_v63  ;;  %v2962_v39 = vld [vmem:[#allocation8 + $0x6f0] sm:$0xff]  ;;  %v2414_v53 = vadd.f32 %v2413_v38, %v2394_v46  ;;  %v2795_v62 = vld [vmem:[#allocation8 + $0x1b8] sm:$0xff]  ;;  %v2885_v37 = vld [vmem:[#allocation8 + $0x488] sm:$0xff] }
 0x3cf   : > { %3186 = vmatpush.msra.mxu2 %v2974_v25  ;;  %v2758_v50 = vld [vmem:[#allocation8 + $0x90] sm:$0xff]  ;;  %v2891_v27 = vld [vmem:[#allocation8 + $0x4b8] sm:$0xff]  ;;  %v2981_v25 = vld [vmem:[#allocation8 + $0x788] sm:$0xff] }
 0x3d0   : > { %3147 = vmatpush.msra.mxu0 %v2776_v30  ;;  %3167 = vmatpush.msra.mxu1 %v2872_v9  ;;  %v2854_v34 = vld [vmem:[#allocation8 + $0x390] sm:$0xff]  ;;  %v4837_v61 = vmax.f32 %v2414_v53, 0.0  ;;  %v2987_v63 = vld [vmem:[#allocation8 + $0x7b8] sm:$0xff]  ;;  %v2777_v33 = vld [vmem:[#allocation8 + $0x128] sm:$0xff] }
 0x3d1   : > { %3187 = vmatpush.msra.mxu2 %v2968_v40  ;;  %v2950_v41 = vld [vmem:[#allocation8 + $0x690] sm:$0xff]  ;;  %v2879_v30 = vld [vmem:[#allocation8 + $0x458] sm:$0xff]  ;;  %v2873_v40 = vld [vmem:[#allocation8 + $0x428] sm:$0xff] }
 0x3d2   : > { %3148 = vmatpush.msra.mxu0 %v2770_v2  ;;  %3168 = vmatpush.msra.mxu1 %v2866_v36  ;;  %v2746_v51 = vld [vmem:[#allocation8 + $0x30] sm:$0xff]  ;;  %v2975_v9 = vld [vmem:[#allocation8 + $0x758] sm:$0xff]  ;;  %v2969_v13 = vld [vmem:[#allocation8 + $0x728] sm:$0xff] }
 0x3d3   : > { %3188 = vmatpush.msra.mxu2 %v2962_v39  ;;  %v2842_v16 = vld [vmem:[#allocation8 + $0x330] sm:$0xff]  ;;  %v3112_v2 = vld [vmem:[#allocation8 + $0xba0] sm:$0xff]  ;;  %v2771_v36 = vld [vmem:[#allocation8 + $0xf8] sm:$0xff] }
 0x3d4   : > { %3149 = vmatpush.msra.mxu0 %v2764_v28  ;;  %3169 = vmatpush.msra.mxu1 %v2860_v12  ;;  %v2938_v59 = vld [vmem:[#allocation8 + $0x630] sm:$0xff]  ;;  %v2867_v39 = vld [vmem:[#allocation8 + $0x3f8] sm:$0xff]  ;;  %v2765_v28 = vld [vmem:[#allocation8 + $0xc8] sm:$0xff] }
 0x3d5   : > { %3189 = vmatpush.msra.mxu2 %v2956_v1  ;;  %v3118_v56 = vld [vmem:[#allocation8 + $0xbd0] sm:$0xff]  ;;  %v2861_v12 = vld [vmem:[#allocation8 + $0x3c8] sm:$0xff]  ;;  %v3100_v19 = vld [vmem:[#allocation8 + $0xb40] sm:$0xff] }
 0x3d6   : > { %3150 = vmatpush.msra.mxu0 %v2758_v50  ;;  %3170 = vmatpush.msra.mxu1 %v2854_v34  ;;  %v3106_v15 = vld [vmem:[#allocation8 + $0xb70] sm:$0xff]  ;;  %v2957_v23 = vld [vmem:[#allocation8 + $0x6c8] sm:$0xff]  ;;  %v2759_v1 = vld [vmem:[#allocation8 + $0x98] sm:$0xff] }
 0x3d7   : > { %3190 = vmatpush.msra.mxu2 %v2950_v41  ;;  %3198 = vmatpush.msra.mxu3 %v3118_v56  ;;  %v2951_v50 = vld [vmem:[#allocation8 + $0x698] sm:$0xff]  ;;  %v3094_v34 = vld [vmem:[#allocation8 + $0xb10] sm:$0xff]  ;;  %v2753_v45 = vld [vmem:[#allocation8 + $0x68] sm:$0xff] }
 0x3d8   : > { %3151 = vmatpush.msra.mxu0 %v2752_v11  ;;  %3171 = vmatpush.msra.mxu1 %v2848_v3  ;;  %v2849_v46 = vld [vmem:[#allocation8 + $0x368] sm:$0xff]  ;;  %v3088_v38 = vld [vmem:[#allocation8 + $0xae0] sm:$0xff]  ;;  %v2747_v11 = vld [vmem:[#allocation8 + $0x38] sm:$0xff] }
 0x3d9   : > { %3191 = vmatpush.msra.mxu2 %v2944_v4  ;;  %3199 = vmatpush.msra.mxu3 %v3112_v2  ;;  %v2945_v41 = vld [vmem:[#allocation8 + $0x668] sm:$0xff]  ;;  %v2843_v3 = vld [vmem:[#allocation8 + $0x338] sm:$0xff]  ;;  %v3082_v21 = vld [vmem:[#allocation8 + $0xab0] sm:$0xff] }
 0x3da   : > { %3152 = vmatpush.msra.mxu0 %v2746_v51  ;;  %3172 = vmatpush.msra.mxu1 %v2842_v16  ;;  %v2939_v4 = vld [vmem:[#allocation8 + $0x638] sm:$0xff]  ;;  %v2741_v51 = vld [vmem:[#allocation8 + $0x8] sm:$0xff]  ;;  %v3076_v53 = vld [vmem:[#allocation8 + $0xa80] sm:$0xff] }
 0x3db   : > { %3192 = vmatpush.msra.mxu2 %v2938_v59  ;;  %3200 = vmatpush.msra.mxu3 %v3106_v15  ;;  %v2837_v16 = vld [vmem:[#allocation8 + $0x308] sm:$0xff]  ;;  %v2832_v59 = vld [vmem:[#allocation8 + $0x2e0] sm:$0xff]  ;;  %v3034_v56 = vld [vmem:[#allocation8 + $0x930] sm:$0xff] }
 0x3dc   : > { %3153 = vmatpush.msra.mxu0 %v2740_v54  ;;  %3173 = vmatpush.msra.mxu1 %v2836_v49  ;;  %v2933_v52 = vld [vmem:[#allocation8 + $0x608] sm:$0xff]  ;;  %v2928_v54 = vld [vmem:[#allocation8 + $0x5e0] sm:$0xff]  ;;  %v2874_v15 = vld [vmem:[#allocation8 + $0x430] sm:$0xff] }
 0x3dd   : > { %3193 = vmatpush.msra.mxu2 %v2932_v22  ;;  %3154 = vmatmul.f32.vlgmr.msra.gmra.mxu0 %v4833_v7  ;;  %v3024_v49 = vld [vmem:[#allocation8 + $0x8e0] sm:$0xff]  ;;  %v3070_v22 = vld [vmem:[#allocation8 + $0xa50] sm:$0xff] }
 0x3de   : > { %3174 = vmatmul.f32.vlgmr.msra.gmra.mxu1 %v4835_v43  ;;  %3194 = vmatmul.f32.vlgmr.msra.gmra.mxu2 %v4837_v61  ;;  %v2976_v2 = vld [vmem:[#allocation8 + $0x760] sm:$0xff] }
 0x3df   : > { %3218 = vmatpush.msrb.mxu0 %v2831_v24  ;;  %3238 = vmatpush.msrb.mxu1 %v2927_v26  ;;  %v2826_v24 = vld [vmem:[#allocation8 + $0x2b0] sm:$0xff] }
 0x3e0   : > { %3258 = vmatpush.msrb.mxu2 %v3023_v5  ;;  %3201 = vmatpush.msra.mxu3 %v3100_v19  ;;  %v2922_v26 = vld [vmem:[#allocation8 + $0x5b0] sm:$0xff]  ;;  %v2772_v19 = vld [vmem:[#allocation8 + $0x100] sm:$0xff] }
 0x3e1   : > { %3219 = vmatpush.msrb.mxu0 %v2825_v44  ;;  %3239 = vmatpush.msrb.mxu1 %v2921_v47  ;;  %v3018_v5 = vld [vmem:[#allocation8 + $0x8b0] sm:$0xff]  ;;  %v2820_v44 = vld [vmem:[#allocation8 + $0x280] sm:$0xff] }
 0x3e2   : > { %3259 = vmatpush.msrb.mxu2 %v3017_v55  ;;  %3202 = vmatpush.msra.mxu3 %v3094_v34  ;;  %v2916_v47 = vld [vmem:[#allocation8 + $0x580] sm:$0xff]  ;;  %v2766_v34 = vld [vmem:[#allocation8 + $0xd0] sm:$0xff] }
 0x3e3   : > { %3220 = vmatpush.msrb.mxu0 %v2819_v48  ;;  %3240 = vmatpush.msrb.mxu1 %v2915_v10  ;;  %v3012_v55 = vld [vmem:[#allocation8 + $0x880] sm:$0xff]  ;;  %v2814_v10 = vld [vmem:[#allocation8 + $0x250] sm:$0xff] }
 0x3e4   : > { %3260 = vmatpush.msrb.mxu2 %v3011_v57  ;;  %3203 = vmatpush.msra.mxu3 %v3088_v38  ;;  %v3064_v48 = vld [vmem:[#allocation8 + $0xa20] sm:$0xff]  ;;  %v2910_v57 = vld [vmem:[#allocation8 + $0x550] sm:$0xff]  ;;  %v3101_v38 = vld [vmem:[#allocation8 + $0xb48] sm:$0xff] }
 0x3e5   : > { %3221 = vmatpush.msrb.mxu0 %v2813_v58  ;;  %3241 = vmatpush.msrb.mxu1 %v2909_v31  ;;  %v3006_v58 = vld [vmem:[#allocation8 + $0x850] sm:$0xff] }
 0x3e6   : > { %3261 = vmatpush.msrb.mxu2 %v3005_v20  ;;  %3204 = vmatpush.msra.mxu3 %v3082_v21  ;;  %v3058_v31 = vld [vmem:[#allocation8 + $0x9f0] sm:$0xff]  ;;  %v2808_v20 = vld [vmem:[#allocation8 + $0x220] sm:$0xff] }
 0x3e7   : > { %3222 = vmatpush.msrb.mxu0 %v2807_v17  ;;  %3242 = vmatpush.msrb.mxu1 %v2903_v42  ;;  %v2904_v17 = vld [vmem:[#allocation8 + $0x520] sm:$0xff] }
 0x3e8   : > { %3262 = vmatpush.msrb.mxu2 %v2999_v32  ;;  %3205 = vmatpush.msra.mxu3 %v3076_v53  ;;  %v3000_v42 = vld [vmem:[#allocation8 + $0x820] sm:$0xff] }
 0x3e9   : > { %3223 = vmatpush.msrb.mxu0 %v2801_v60  ;;  %3243 = vmatpush.msrb.mxu1 %v2897_v8  ;;  %v3052_v32 = vld [vmem:[#allocation8 + $0x9c0] sm:$0xff]  ;;  %v2802_v60 = vld [vmem:[#allocation8 + $0x1f0] sm:$0xff] }
 0x3ea   : > { %3263 = vmatpush.msrb.mxu2 %v2993_v18  ;;  %3206 = vmatpush.msra.mxu3 %v3070_v22  ;;  %v2898_v8 = vld [vmem:[#allocation8 + $0x4f0] sm:$0xff]  ;;  %v2952_v21 = vld [vmem:[#allocation8 + $0x6a0] sm:$0xff] }
 0x3eb   : > { %3224 = vmatpush.msrb.mxu0 %v2795_v62  ;;  %3244 = vmatpush.msrb.mxu1 %v2891_v27  ;;  %v2994_v18 = vld [vmem:[#allocation8 + $0x7f0] sm:$0xff]  ;;  %v2796_v27 = vld [vmem:[#allocation8 + $0x1c0] sm:$0xff] }
 0x3ec   : > { %3264 = vmatpush.msrb.mxu2 %v2987_v63  ;;  %3207 = vmatpush.msra.mxu3 %v3064_v48  ;;  %v3046_v62 = vld [vmem:[#allocation8 + $0x990] sm:$0xff]  ;;  %v2892_v63 = vld [vmem:[#allocation8 + $0x4c0] sm:$0xff] }
 0x3ed   : > { %3225 = vmatpush.msrb.mxu0 %v2789_v0  ;;  %3245 = vmatpush.msrb.mxu1 %v2885_v37  ;;  %v2988_v0 = vld [vmem:[#allocation8 + $0x7c0] sm:$0xff]  ;;  %v2934_v48 = vld [vmem:[#allocation8 + $0x610] sm:$0xff] }
 0x3ee   : > { %3265 = vmatpush.msrb.mxu2 %v2981_v25  ;;  %3208 = vmatpush.msra.mxu3 %v3058_v31  ;;  %v3040_v37 = vld [vmem:[#allocation8 + $0x960] sm:$0xff]  ;;  %v2790_v25 = vld [vmem:[#allocation8 + $0x190] sm:$0xff]  ;;  %v3025_v31 = vld [vmem:[#allocation8 + $0x8e8] sm:$0xff] }
 0x3ef   : > { %3226 = vmatpush.msrb.mxu0 %v2783_v6  ;;  %3246 = vmatpush.msrb.mxu1 %v2879_v30  ;;  %v2886_v6 = vld [vmem:[#allocation8 + $0x490] sm:$0xff]  ;;  %v1451_v30 = vperm.slane %v4782_v35, 3  ;;  %v2748_v22 = vld [vmem:[#allocation8 + $0x40] sm:$0xff] }
 0x3f0   : > { %3266 = vmatpush.msrb.mxu2 %v2975_v9  ;;  %3209 = vmatpush.msra.mxu3 %v3052_v32  ;;  %v2982_v9 = vld [vmem:[#allocation8 + $0x790] sm:$0xff]  ;;  %v2923_v32 = vld [vmem:[#allocation8 + $0x5b8] sm:$0xff] }
 0x3f1   : > { %3227 = vmatpush.msrb.mxu0 %v2777_v33  ;;  %3247 = vmatpush.msrb.mxu1 %v2873_v40  ;;  %v2433_v33 = vpop.f32.mrf.mxu0  ;;  %v2784_v40 = vld [vmem:[#allocation8 + $0x160] sm:$0xff]  ;;  %v2970_v35 = vld [vmem:[#allocation8 + $0x730] sm:$0xff] }
 0x3f2   : > { %3267 = vmatpush.msrb.mxu2 %v2969_v13  ;;  %3210 = vmatpush.msra.mxu3 %v3046_v62  ;;  %v2880_v13 = vld [vmem:[#allocation8 + $0x460] sm:$0xff]  ;;  %v2821_v62 = vld [vmem:[#allocation8 + $0x288] sm:$0xff] }
 0x3f3   : > { %3228 = vmatpush.msrb.mxu0 %v2771_v36  ;;  %3248 = vmatpush.msrb.mxu1 %v2867_v39  ;;  %v3028_v36 = vld [vmem:[#allocation8 + $0x900] sm:$0xff]  ;;  %v3119_v39 = vld [vmem:[#allocation8 + $0xbd8] sm:$0xff] }
 0x3f4   : > { %3268 = vmatpush.msrb.mxu2 %v2963_v14  ;;  %3211 = vmatpush.msra.mxu3 %v3040_v37  ;;  %v2778_v14 = vld [vmem:[#allocation8 + $0x130] sm:$0xff] }
 0x3f5   : > { %3229 = vmatpush.msrb.mxu0 %v2765_v28  ;;  %3249 = vmatpush.msrb.mxu1 %v2861_v12  ;;  %v2434_v28 = vadd.f32 %v2433_v33, %v1451_v30  ;;  %v3113_v12 = vld [vmem:[#allocation8 + $0xba8] sm:$0xff] }
 0x3f6   : > { %3269 = vmatpush.msrb.mxu2 %v2957_v23  ;;  %3212 = vmatpush.msra.mxu3 %v3034_v56  ;;  %v2453_v23 = vpop.f32.mrf.mxu1  ;;  %v3059_v56 = vld [vmem:[#allocation8 + $0x9f8] sm:$0xff]  ;;  %v2809_v33 = vld [vmem:[#allocation8 + $0x228] sm:$0xff] }
 0x3f7   : > { %3230 = vmatpush.msrb.mxu0 %v2759_v1  ;;  %3250 = vmatpush.msrb.mxu1 %v2855_v29  ;;  %v2868_v1 = vld [vmem:[#allocation8 + $0x400] sm:$0xff] }
 0x3f8   : > { %3270 = vmatpush.msrb.mxu2 %v2951_v50  ;;  %3213 = vmatpush.msra.mxu3 %v3028_v36  ;;  %v2964_v29 = vld [vmem:[#allocation8 + $0x700] sm:$0xff]  ;;  %v3107_v50 = vld [vmem:[#allocation8 + $0xb78] sm:$0xff] }
 0x3f9   : > { %3231 = vmatpush.msrb.mxu0 %v2753_v45  ;;  %3251 = vmatpush.msrb.mxu1 %v2849_v46  ;;  %v2862_v45 = vld [vmem:[#allocation8 + $0x3d0] sm:$0xff]  ;;  %v2454_v46 = vadd.f32 %v2453_v23, %v2434_v28  ;;  %v2995_v28 = vld [vmem:[#allocation8 + $0x7f8] sm:$0xff]  ;;  %v2893_v23 = vld [vmem:[#allocation8 + $0x4c8] sm:$0xff] }
 0x3fa   : > { %3271 = vmatpush.msrb.mxu2 %v2945_v41  ;;  %3278 = vmatpush.msrb.mxu3 %v3119_v39  ;;  %v2958_v41 = vld [vmem:[#allocation8 + $0x6d0] sm:$0xff]  ;;  %v2803_v39 = vld [vmem:[#allocation8 + $0x1f8] sm:$0xff] }
 0x3fb   : > { %3232 = vmatpush.msrb.mxu0 %v2747_v11  ;;  %3252 = vmatpush.msrb.mxu1 %v2843_v3  ;;  %v2473_v11 = vpop.f32.mrf.mxu2  ;;  %v2760_v3 = vld [vmem:[#allocation8 + $0xa0] sm:$0xff] }
 0x3fc   : > { %3272 = vmatpush.msrb.mxu2 %v2939_v4  ;;  %3279 = vmatpush.msrb.mxu3 %v3113_v12  ;;  %v2856_v4 = vld [vmem:[#allocation8 + $0x3a0] sm:$0xff]  ;;  %v2474_v53 = vadd.f32 %v2473_v11, %v2454_v46  ;;  %v2797_v12 = vld [vmem:[#allocation8 + $0x1c8] sm:$0xff]  ;;  %v2983_v46 = vld [vmem:[#allocation8 + $0x798] sm:$0xff] }
 0x3fd   : > { %3233 = vmatpush.msrb.mxu0 %v2741_v51  ;;  %3253 = vmatpush.msrb.mxu1 %v2837_v16  ;;  %v3095_v51 = vld [vmem:[#allocation8 + $0xb18] sm:$0xff]  ;;  %v2754_v16 = vld [vmem:[#allocation8 + $0x70] sm:$0xff]  ;;  %v2785_v11 = vld [vmem:[#allocation8 + $0x168] sm:$0xff] }
 0x3fe   : > { %3273 = vmatpush.msrb.mxu2 %v2933_v52  ;;  %3234 = vmatmul.f32.vlgmr.msrb.gmra.mxu0 %v4833_v7  ;;  %v2850_v52 = vld [vmem:[#allocation8 + $0x370] sm:$0xff] }
 0x3ff   : > { %3254 = vmatmul.f32.vlgmr.msrb.gmra.mxu1 %v4835_v43  ;;  %3274 = vmatmul.f32.vlgmr.msrb.gmra.mxu2 %v4837_v61 }
 0x400   : > { %3298 = vmatpush.msra.mxu0 %v2832_v59  ;;  %3318 = vmatpush.msra.mxu1 %v2928_v54  ;;  %v2946_v59 = vld [vmem:[#allocation8 + $0x670] sm:$0xff]  ;;  %v3089_v54 = vld [vmem:[#allocation8 + $0xae8] sm:$0xff] }
 0x401   : > { %3338 = vmatpush.msra.mxu2 %v3024_v49  ;;  %3280 = vmatpush.msrb.mxu3 %v3107_v50  ;;  %v2493_v49 = vpop.f32.mrf.mxu3 }
 0x402   : > { %3299 = vmatpush.msra.mxu0 %v2826_v24  ;;  %3319 = vmatpush.msra.mxu1 %v2922_v26  ;;  %v2844_v24 = vld [vmem:[#allocation8 + $0x340] sm:$0xff] }
 0x403   : > { %3339 = vmatpush.msra.mxu2 %v3018_v5  ;;  %3281 = vmatpush.msrb.mxu3 %v3101_v38  ;;  %v2940_v26 = vld [vmem:[#allocation8 + $0x640] sm:$0xff]  ;;  %v3083_v5 = vld [vmem:[#allocation8 + $0xab8] sm:$0xff]  ;;  %v2553_v30 = vpop.f32.mrf.mxu2 }
 0x404   : > { %3300 = vmatpush.msra.mxu0 %v2820_v44  ;;  %3320 = vmatpush.msra.mxu1 %v2916_v47  ;;  %v2742_v44 = vld [vmem:[#allocation8 + $0x10] sm:$0xff] }
 0x405   : > { %3340 = vmatpush.msra.mxu2 %v3012_v55  ;;  %3282 = vmatpush.msrb.mxu3 %v3095_v51  ;;  %v2838_v47 = vld [vmem:[#allocation8 + $0x310] sm:$0xff]  ;;  %v2494_v55 = vadd.f32 %v2493_v49, %v2474_v53  ;;  %v3029_v51 = vld [vmem:[#allocation8 + $0x908] sm:$0xff] }
 0x406   : > { %3301 = vmatpush.msra.mxu0 %v2814_v10  ;;  %3321 = vmatpush.msra.mxu1 %v2910_v57  ;;  %v2513_v10 = vpop.f32.mrf.mxu0  ;;  %v2833_v57 = vld [vmem:[#allocation8 + $0x2e8] sm:$0xff] }
 0x407   : > { %3341 = vmatpush.msra.mxu2 %v3006_v58  ;;  %3283 = vmatpush.msrb.mxu3 %v3089_v54  ;;  %v2929_v58 = vld [vmem:[#allocation8 + $0x5e8] sm:$0xff] }
 0x408   : > { %3302 = vmatpush.msra.mxu0 %v2808_v20  ;;  %3322 = vmatpush.msra.mxu1 %v2904_v17  ;;  %v3077_v20 = vld [vmem:[#allocation8 + $0xa88] sm:$0xff]  ;;  %v2514_v17 = vadd.f32 %v2513_v10, %v2494_v55  ;;  %v2959_v55 = vld [vmem:[#allocation8 + $0x6d8] sm:$0xff] }
 0x409   : > { %3342 = vmatpush.msra.mxu2 %v3000_v42  ;;  %3284 = vmatpush.msrb.mxu3 %v3083_v5  ;;  %v2827_v42 = vld [vmem:[#allocation8 + $0x2b8] sm:$0xff]  ;;  %v2773_v49 = vld [vmem:[#allocation8 + $0x108] sm:$0xff] }
 0x40a   : > { %3303 = vmatpush.msra.mxu0 %v2802_v60  ;;  %3323 = vmatpush.msra.mxu1 %v2898_v8  ;;  %v2533_v60 = vpop.f32.mrf.mxu1  ;;  %v3019_v8 = vld [vmem:[#allocation8 + $0x8b8] sm:$0xff]  ;;  %v2857_v10 = vld [vmem:[#allocation8 + $0x3a8] sm:$0xff] }
 0x40b   : > { %3343 = vmatpush.msra.mxu2 %v2994_v18  ;;  %v3071_v18 = vld [vmem:[#allocation8 + $0xa58] sm:$0xff]  ;;  %3285 = vmatpush.msrb.mxu3 %v3077_v20  ;;  %v2534_v37 = vadd.f32 %v2533_v60, %v2514_v17  ;;  %v2633_v53 = vpop.f32.mrf.mxu2  ;;  %v2845_v60 = vld [vmem:[#allocation8 + $0x348] sm:$0xff] }
 0x40c   : > { %3304 = vmatpush.msra.mxu0 %v2796_v27  ;;  %3324 = vmatpush.msra.mxu1 %v2892_v63  ;;  %v2917_v27 = vld [vmem:[#allocation8 + $0x588] sm:$0xff]  ;;  %v2767_v5 = vld [vmem:[#allocation8 + $0xd8] sm:$0xff] }
 0x40d   : > { %3344 = vmatpush.msra.mxu2 %v2988_v0  ;;  %v3013_v63 = vld [vmem:[#allocation8 + $0x888] sm:$0xff]  ;;  %3286 = vmatpush.msrb.mxu3 %v3071_v18  ;;  %v2554_v36 = vadd.f32 %v2553_v30, %v2534_v37  ;;  %v2851_v20 = vld [vmem:[#allocation8 + $0x378] sm:$0xff] }
 0x40e   : > { %3305 = vmatpush.msra.mxu0 %v2790_v25  ;;  %3325 = vmatpush.msra.mxu1 %v2886_v6  ;;  %v3065_v0 = vld [vmem:[#allocation8 + $0xa28] sm:$0xff]  ;;  %v2815_v25 = vld [vmem:[#allocation8 + $0x258] sm:$0xff] }
 0x40f   : > { %3345 = vmatpush.msra.mxu2 %v2982_v9  ;;  %v2911_v6 = vld [vmem:[#allocation8 + $0x558] sm:$0xff]  ;;  %3287 = vmatpush.msrb.mxu3 %v3065_v0  ;;  %v2941_v18 = vld [vmem:[#allocation8 + $0x648] sm:$0xff] }
 0x410   : > { %3306 = vmatpush.msra.mxu0 %v2784_v40  ;;  %3326 = vmatpush.msra.mxu1 %v2880_v13  ;;  %v3007_v9 = vld [vmem:[#allocation8 + $0x858] sm:$0xff]  ;;  %v2905_v40 = vld [vmem:[#allocation8 + $0x528] sm:$0xff] }
 0x411   : > { %3346 = vmatpush.msra.mxu2 %v2976_v2  ;;  %v3001_v13 = vld [vmem:[#allocation8 + $0x828] sm:$0xff]  ;;  %3288 = vmatpush.msrb.mxu3 %v3059_v56  ;;  %v2947_v17 = vld [vmem:[#allocation8 + $0x678] sm:$0xff] }
 0x412   : > { %3307 = vmatpush.msra.mxu0 %v2778_v14  ;;  %3327 = vmatpush.msra.mxu1 %v2874_v15  ;;  %v3053_v2 = vld [vmem:[#allocation8 + $0x9c8] sm:$0xff]  ;;  %v2899_v14 = vld [vmem:[#allocation8 + $0x4f8] sm:$0xff]  ;;  %v2573_v15 = vpop.f32.mrf.mxu3 }
 0x413   : > { %3347 = vmatpush.msra.mxu2 %v2970_v35  ;;  %v3047_v35 = vld [vmem:[#allocation8 + $0x998] sm:$0xff]  ;;  %3289 = vmatpush.msrb.mxu3 %v3053_v2  ;;  %v2574_v50 = vadd.f32 %v2573_v15, %v2554_v36  ;;  %v2822_v36 = vld [vmem:[#allocation8 + $0x290] sm:$0xff] }
 0x414   : > { %3308 = vmatpush.msra.mxu0 %v2772_v19  ;;  %3328 = vmatpush.msra.mxu1 %v2868_v1  ;;  %v2593_v19 = vpop.f32.mrf.mxu0  ;;  %v2989_v1 = vld [vmem:[#allocation8 + $0x7c8] sm:$0xff]  ;;  %v2935_v0 = vld [vmem:[#allocation8 + $0x618] sm:$0xff]  ;;  %v3014_v15 = vld [vmem:[#allocation8 + $0x890] sm:$0xff] }
 0x415   : > { %3348 = vmatpush.msra.mxu2 %v2964_v29  ;;  %v3041_v29 = vld [vmem:[#allocation8 + $0x968] sm:$0xff]  ;;  %3290 = vmatpush.msrb.mxu3 %v3047_v35  ;;  %v2594_v38 = vadd.f32 %v2593_v19, %v2574_v50  ;;  %v2912_v35 = vld [vmem:[#allocation8 + $0x560] sm:$0xff]  ;;  %v3002_v50 = vld [vmem:[#allocation8 + $0x830] sm:$0xff] }
 0x416   : > { %3309 = vmatpush.msra.mxu0 %v2766_v34  ;;  %3329 = vmatpush.msra.mxu1 %v2862_v45  ;;  %v2791_v34 = vld [vmem:[#allocation8 + $0x198] sm:$0xff]  ;;  %v3120_v19 = vld [vmem:[#allocation8 + $0xbe0] sm:$0xff] }
 0x417   : > { %3349 = vmatpush.msra.mxu2 %v2958_v41  ;;  %v2887_v45 = vld [vmem:[#allocation8 + $0x498] sm:$0xff]  ;;  %3291 = vmatpush.msrb.mxu3 %v3041_v29  ;;  %v2906_v29 = vld [vmem:[#allocation8 + $0x530] sm:$0xff] }
 0x418   : > { %3310 = vmatpush.msra.mxu0 %v2760_v3  ;;  %3330 = vmatpush.msra.mxu1 %v2856_v4  ;;  %v3035_v41 = vld [vmem:[#allocation8 + $0x938] sm:$0xff]  ;;  %v2881_v3 = vld [vmem:[#allocation8 + $0x468] sm:$0xff]  ;;  %v2613_v4 = vpop.f32.mrf.mxu1 }
 0x419   : > { %3350 = vmatpush.msra.mxu2 %v2952_v21  ;;  %v2977_v21 = vld [vmem:[#allocation8 + $0x768] sm:$0xff]  ;;  %3292 = vmatpush.msrb.mxu3 %v3035_v41  ;;  %v2614_v54 = vadd.f32 %v2613_v4, %v2594_v38  ;;  %v2996_v41 = vld [vmem:[#allocation8 + $0x800] sm:$0xff]  ;;  %v2990_v4 = vld [vmem:[#allocation8 + $0x7d0] sm:$0xff] }
 0x41a   : > { %3311 = vmatpush.msra.mxu0 %v2754_v16  ;;  %3331 = vmatpush.msra.mxu1 %v2850_v52  ;;  %v2779_v16 = vld [vmem:[#allocation8 + $0x138] sm:$0xff]  ;;  %v3108_v38 = vld [vmem:[#allocation8 + $0xb80] sm:$0xff] }
 0x41b   : > { %3351 = vmatpush.msra.mxu2 %v2946_v59  ;;  %v2875_v52 = vld [vmem:[#allocation8 + $0x438] sm:$0xff]  ;;  %3293 = vmatpush.msrb.mxu3 %v3029_v51  ;;  %v2792_v51 = vld [vmem:[#allocation8 + $0x1a0] sm:$0xff] }
 0x41c   : > { %3312 = vmatpush.msra.mxu0 %v2748_v22  ;;  %3332 = vmatpush.msra.mxu1 %v2844_v24  ;;  %v2971_v59 = vld [vmem:[#allocation8 + $0x738] sm:$0xff]  ;;  %v2869_v22 = vld [vmem:[#allocation8 + $0x408] sm:$0xff] }
 0x41d   : > { %3352 = vmatpush.msra.mxu2 %v2940_v26  ;;  %v2965_v24 = vld [vmem:[#allocation8 + $0x708] sm:$0xff]  ;;  %v2634_v26 = vadd.f32 %v2633_v53, %v2614_v54  ;;  %v2786_v53 = vld [vmem:[#allocation8 + $0x170] sm:$0xff] }
 0x41e   : > { %3313 = vmatpush.msra.mxu0 %v2742_v44  ;;  %3333 = vmatpush.msra.mxu1 %v2838_v47  ;;  %v2863_v44 = vld [vmem:[#allocation8 + $0x3d8] sm:$0xff]  ;;  %v2653_v47 = vpop.f32.mrf.mxu3  ;;  %v2978_v54 = vld [vmem:[#allocation8 + $0x770] sm:$0xff] }
 0x41f   : > { %3353 = vmatpush.msra.mxu2 %v2934_v48  ;;  %3314 = vmatmul.f32.vlgmr.msra.gmra.mxu0 %v4833_v7  ;;  %v2761_v48 = vld [vmem:[#allocation8 + $0xa8] sm:$0xff] }
 0x420   : > { %3334 = vmatmul.f32.vlgmr.msra.gmra.mxu1 %v4835_v43  ;;  %3354 = vmatmul.f32.vlgmr.msra.gmra.mxu2 %v4837_v61 }
 0x421   : > { %3378 = vmatpush.msrb.mxu0 %v2833_v57  ;;  %3398 = vmatpush.msrb.mxu1 %v2929_v58  ;;  %v2953_v57 = vld [vmem:[#allocation8 + $0x6a8] sm:$0xff]  ;;  %v2654_v58 = vadd.f32 %v2653_v47, %v2634_v26  ;;  %v2972_v26 = vld [vmem:[#allocation8 + $0x740] sm:$0xff]  ;;  %v2870_v47 = vld [vmem:[#allocation8 + $0x410] sm:$0xff] }
 0x422   : > { %3418 = vmatpush.msrb.mxu2 %v3025_v31  ;;  %v2755_v31 = vld [vmem:[#allocation8 + $0x78] sm:$0xff] }
 0x423   : > { %3379 = vmatpush.msrb.mxu0 %v2827_v42  ;;  %3399 = vmatpush.msrb.mxu1 %v2923_v32  ;;  %v2749_v32 = vld [vmem:[#allocation8 + $0x48] sm:$0xff] }
 0x424   : > { %3419 = vmatpush.msrb.mxu2 %v3019_v8 }
 0x425   : > { %3380 = vmatpush.msrb.mxu0 %v2821_v62  ;;  %3400 = vmatpush.msrb.mxu1 %v2917_v27  ;;  %v2743_v62 = vld [vmem:[#allocation8 + $0x18] sm:$0xff] }
 0x426   : > { %3420 = vmatpush.msrb.mxu2 %v3013_v63  ;;  %v2839_v27 = vld [vmem:[#allocation8 + $0x318] sm:$0xff] }
 0x427   : > { %3381 = vmatpush.msrb.mxu0 %v2815_v25  ;;  %3401 = vmatpush.msrb.mxu1 %v2911_v6  ;;  %v2834_v25 = vld [vmem:[#allocation8 + $0x2f0] sm:$0xff] }
 0x428   : > { %3421 = vmatpush.msrb.mxu2 %v3007_v9  ;;  %v2930_v6 = vld [vmem:[#allocation8 + $0x5f0] sm:$0xff] }
 0x429   : > { %3382 = vmatpush.msrb.mxu0 %v2809_v33  ;;  %3402 = vmatpush.msrb.mxu1 %v2905_v40  ;;  %v3026_v9 = vld [vmem:[#allocation8 + $0x8f0] sm:$0xff]  ;;  %v2828_v33 = vld [vmem:[#allocation8 + $0x2c0] sm:$0xff] }
 0x42a   : > { %3422 = vmatpush.msrb.mxu2 %v3001_v13  ;;  %v2924_v40 = vld [vmem:[#allocation8 + $0x5c0] sm:$0xff] }
 0x42b   : > { %3383 = vmatpush.msrb.mxu0 %v2803_v39  ;;  %3403 = vmatpush.msrb.mxu1 %v2899_v14  ;;  %v3020_v13 = vld [vmem:[#allocation8 + $0x8c0] sm:$0xff]  ;;  %v2918_v39 = vld [vmem:[#allocation8 + $0x590] sm:$0xff] }
 0x42c   : > { %3423 = vmatpush.msrb.mxu2 %v2995_v28  ;;  %v2816_v28 = vld [vmem:[#allocation8 + $0x260] sm:$0xff] }
 0x42d   : > { %3384 = vmatpush.msrb.mxu0 %v2797_v12  ;;  %3404 = vmatpush.msrb.mxu1 %v2893_v23  ;;  %v3008_v23 = vld [vmem:[#allocation8 + $0x860] sm:$0xff] }
 0x42e   : > { %3424 = vmatpush.msrb.mxu2 %v2989_v1  ;;  %v2810_v1 = vld [vmem:[#allocation8 + $0x230] sm:$0xff] }
 0x42f   : > { %3385 = vmatpush.msrb.mxu0 %v2791_v34  ;;  %3405 = vmatpush.msrb.mxu1 %v2887_v45  ;;  %v3114_v34 = vld [vmem:[#allocation8 + $0xbb0] sm:$0xff]  ;;  %v2804_v45 = vld [vmem:[#allocation8 + $0x200] sm:$0xff] }
 0x430   : > { %3425 = vmatpush.msrb.mxu2 %v2983_v46  ;;  %v2900_v46 = vld [vmem:[#allocation8 + $0x500] sm:$0xff] }
 0x431   : > { %3386 = vmatpush.msrb.mxu0 %v2785_v11  ;;  %3406 = vmatpush.msrb.mxu1 %v2881_v3  ;;  %v2798_v11 = vld [vmem:[#allocation8 + $0x1d0] sm:$0xff] }
 0x432   : > { %3426 = vmatpush.msrb.mxu2 %v2977_v21  ;;  %v2894_v3 = vld [vmem:[#allocation8 + $0x4d0] sm:$0xff] }
 0x433   : > { %3387 = vmatpush.msrb.mxu0 %v2779_v16  ;;  %3407 = vmatpush.msrb.mxu1 %v2875_v52  ;;  %v3102_v21 = vld [vmem:[#allocation8 + $0xb50] sm:$0xff]  ;;  %v2888_v16 = vld [vmem:[#allocation8 + $0x4a0] sm:$0xff] }
 0x434   : > { %3427 = vmatpush.msrb.mxu2 %v2971_v59  ;;  %v2984_v52 = vld [vmem:[#allocation8 + $0x7a0] sm:$0xff]  ;;  %v2882_v59 = vld [vmem:[#allocation8 + $0x470] sm:$0xff] }
 0x435   : > { %3388 = vmatpush.msrb.mxu0 %v2773_v49  ;;  %3408 = vmatpush.msrb.mxu1 %v2869_v22  ;;  %v3096_v49 = vld [vmem:[#allocation8 + $0xb20] sm:$0xff] }
 0x436   : > { %3428 = vmatpush.msrb.mxu2 %v2965_v24  ;;  %v2780_v22 = vld [vmem:[#allocation8 + $0x140] sm:$0xff] }
 0x437   : > { %3389 = vmatpush.msrb.mxu0 %v2767_v5  ;;  %3409 = vmatpush.msrb.mxu1 %v2863_v44  ;;  %v2673_v42 = vpop.f32.mrf.mxu0  ;;  %v2876_v24 = vld [vmem:[#allocation8 + $0x440] sm:$0xff]  ;;  %v3090_v5 = vld [vmem:[#allocation8 + $0xaf0] sm:$0xff] }
 0x438   : > { %3429 = vmatpush.msrb.mxu2 %v2959_v55  ;;  %v2674_v8 = vadd.f32 %v2673_v42, %v2654_v58  ;;  %v2693_v63 = vpop.f32.mrf.mxu1  ;;  %v2774_v44 = vld [vmem:[#allocation8 + $0x110] sm:$0xff]  ;;  %v2960_v58 = vld [vmem:[#allocation8 + $0x6e0] sm:$0xff] }
 0x439   : > { %3390 = vmatpush.msrb.mxu0 %v2761_v48  ;;  %3410 = vmatpush.msrb.mxu1 %v2857_v10  ;;  %v2966_v55 = vld [vmem:[#allocation8 + $0x710] sm:$0xff]  ;;  %v3084_v48 = vld [vmem:[#allocation8 + $0xac0] sm:$0xff] }
 0x43a   : > { %3430 = vmatpush.msrb.mxu2 %v2953_v57  ;;  %v2694_v37 = vadd.f32 %v2693_v63, %v2674_v8  ;;  %v2768_v10 = vld [vmem:[#allocation8 + $0xe0] sm:$0xff]  ;;  %v2954_v42 = vld [vmem:[#allocation8 + $0x6b0] sm:$0xff] }
 0x43b   : > { %3391 = vmatpush.msrb.mxu0 %v2755_v31  ;;  %3411 = vmatpush.msrb.mxu1 %v2851_v20  ;;  %v2864_v57 = vld [vmem:[#allocation8 + $0x3e0] sm:$0xff]  ;;  %v3078_v31 = vld [vmem:[#allocation8 + $0xa90] sm:$0xff] }
 0x43c   : > { %3431 = vmatpush.msrb.mxu2 %v2947_v17  ;;  %v2762_v20 = vld [vmem:[#allocation8 + $0xb0] sm:$0xff]  ;;  %v2852_v8 = vld [vmem:[#allocation8 + $0x380] sm:$0xff] }
 0x43d   : > { %3392 = vmatpush.msrb.mxu0 %v2749_v32  ;;  %3412 = vmatpush.msrb.mxu1 %v2845_v60  ;;  %v2858_v17 = vld [vmem:[#allocation8 + $0x3b0] sm:$0xff]  ;;  %v3072_v32 = vld [vmem:[#allocation8 + $0xa60] sm:$0xff] }
 0x43e   : > { %3432 = vmatpush.msrb.mxu2 %v2941_v18  ;;  %v2756_v60 = vld [vmem:[#allocation8 + $0x80] sm:$0xff]  ;;  %v2846_v63 = vld [vmem:[#allocation8 + $0x350] sm:$0xff] }
 0x43f   : > { %3393 = vmatpush.msrb.mxu0 %v2743_v62  ;;  %3413 = vmatpush.msrb.mxu1 %v2839_v27  ;;  %v2713_v30 = vpop.f32.mrf.mxu2  ;;  %v2948_v18 = vld [vmem:[#allocation8 + $0x680] sm:$0xff]  ;;  %v3066_v62 = vld [vmem:[#allocation8 + $0xa30] sm:$0xff] }
 0x440   : > { %3433 = vmatpush.msrb.mxu2 %v2935_v0  ;;  %3394 = vmatmul.f32.vlgmr.msrb.gmra.mxu0 %v4833_v7  ;;  %v2714_v56 = vadd.f32 %v2713_v30, %v2694_v37  ;;  %v2750_v27 = vld [vmem:[#allocation8 + $0x50] sm:$0xff]  ;;  %v3060_v37 = vld [vmem:[#allocation8 + $0xa00] sm:$0xff] }
 0x441   : > { %3414 = vmatmul.f32.vlgmr.msrb.gmra.mxu1 %v4835_v43  ;;  %3434 = vmatmul.f32.vlgmr.msrb.gmra.mxu2 %v4837_v61  ;;  %v2942_v0 = vld [vmem:[#allocation8 + $0x650] sm:$0xff]  ;;  %v2936_v30 = vld [vmem:[#allocation8 + $0x620] sm:$0xff] }
 0x442   : > { %3458 = vmatpush.msra.mxu0 %v2834_v25  ;;  %3478 = vmatpush.msra.mxu1 %v2930_v6  ;;  %v2744_v25 = vld [vmem:[#allocation8 + $0x20] sm:$0xff] }
 0x443   : > { %3498 = vmatpush.msra.mxu2 %v3026_v9  ;;  %v2840_v6 = vld [vmem:[#allocation8 + $0x320] sm:$0xff]  ;;  %v2835_v9 = vld [vmem:[#allocation8 + $0x2f8] sm:$0xff] }
 0x444   : > { %v2733_v2 = vpop.f32.mrf.mxu3  ;;  %3459 = vmatpush.msra.mxu0 %v2828_v33  ;;  %3479 = vmatpush.msra.mxu1 %v2924_v40  ;;  %v3027_v33 = vld [vmem:[#allocation8 + $0x8f8] sm:$0xff]  ;;  %v3054_v40 = vld [vmem:[#allocation8 + $0x9d0] sm:$0xff] }
 0x445   : > { %v2734_v14 = vadd.f32 %v2733_v2, %v2714_v56  ;;  %3499 = vmatpush.msra.mxu2 %v3020_v13  ;;  %v2931_v56 = vld [vmem:[#allocation8 + $0x5f8] sm:$0xff]  ;;  %v2829_v13 = vld [vmem:[#allocation8 + $0x2c8] sm:$0xff] }
 0x446   : > { %3460 = vmatpush.msra.mxu0 %v2822_v36  ;;  %3480 = vmatpush.msra.mxu1 %v2918_v39  ;;  %v2925_v2 = vld [vmem:[#allocation8 + $0x5c8] sm:$0xff]  ;;  %v3048_v39 = vld [vmem:[#allocation8 + $0x9a0] sm:$0xff] }
 0x447   : > { %v4852_v12 = vmax.f32 %v2734_v14, 0.0  ;;  %3500 = vmatpush.msra.mxu2 %v3014_v15  ;;  %v3021_v36 = vld [vmem:[#allocation8 + $0x8c8] sm:$0xff]  ;;  %v2823_v14 = vld [vmem:[#allocation8 + $0x298] sm:$0xff] }
 0x448   : > { %3461 = vmatpush.msra.mxu0 %v2816_v28  ;;  %3481 = vmatpush.msra.mxu1 %v2912_v35  ;;  %v2919_v15 = vld [vmem:[#allocation8 + $0x598] sm:$0xff]  ;;  %v3042_v35 = vld [vmem:[#allocation8 + $0x970] sm:$0xff] }
 0x449   : > { %3214 = vmatmul.f32.vlgmr.msra.gmra.mxu3 %v4852_v12  ;;  %3501 = vmatpush.msra.mxu2 %v3008_v23  ;;  %v3015_v28 = vld [vmem:[#allocation8 + $0x898] sm:$0xff]  ;;  %v2817_v23 = vld [vmem:[#allocation8 + $0x268] sm:$0xff] }
 0x44a   : > { %3358 = vmatpush.msra.mxu3 %v3120_v19  ;;  %3462 = vmatpush.msra.mxu0 %v2810_v1  ;;  %v2913_v19 = vld [vmem:[#allocation8 + $0x568] sm:$0xff] }
 0x44b   : > { %3482 = vmatpush.msra.mxu1 %v2906_v29  ;;  %3502 = vmatpush.msra.mxu2 %v3002_v50  ;;  %v3009_v1 = vld [vmem:[#allocation8 + $0x868] sm:$0xff]  ;;  %v3036_v29 = vld [vmem:[#allocation8 + $0x940] sm:$0xff]  ;;  %v2811_v50 = vld [vmem:[#allocation8 + $0x238] sm:$0xff] }
 0x44c   : > { %3359 = vmatpush.msra.mxu3 %v3114_v34  ;;  %3463 = vmatpush.msra.mxu0 %v2804_v45  ;;  %v2907_v34 = vld [vmem:[#allocation8 + $0x538] sm:$0xff] }
 0x44d   : > { %3483 = vmatpush.msra.mxu1 %v2900_v46  ;;  %3503 = vmatpush.msra.mxu2 %v2996_v41  ;;  %v3003_v45 = vld [vmem:[#allocation8 + $0x838] sm:$0xff]  ;;  %v3030_v46 = vld [vmem:[#allocation8 + $0x910] sm:$0xff]  ;;  %v2805_v41 = vld [vmem:[#allocation8 + $0x208] sm:$0xff] }
 0x44e   : > { %3360 = vmatpush.msra.mxu3 %v3108_v38  ;;  %3464 = vmatpush.msra.mxu0 %v2798_v11  ;;  %v2901_v38 = vld [vmem:[#allocation8 + $0x508] sm:$0xff] }
 0x44f   : > { %3484 = vmatpush.msra.mxu1 %v2894_v3  ;;  %3504 = vmatpush.msra.mxu2 %v2990_v4  ;;  %v2997_v11 = vld [vmem:[#allocation8 + $0x808] sm:$0xff]  ;;  %v2799_v3 = vld [vmem:[#allocation8 + $0x1d8] sm:$0xff] }
 0x450   : > { %3361 = vmatpush.msra.mxu3 %v3102_v21  ;;  %3465 = vmatpush.msra.mxu0 %v2792_v51  ;;  %v2895_v4 = vld [vmem:[#allocation8 + $0x4d8] sm:$0xff]  ;;  %v3121_v51 = vld [vmem:[#allocation8 + $0xbe8] sm:$0xff] }
 0x451   : > { %3485 = vmatpush.msra.mxu1 %v2888_v16  ;;  %3505 = vmatpush.msra.mxu2 %v2984_v52  ;;  %v2991_v21 = vld [vmem:[#allocation8 + $0x7d8] sm:$0xff]  ;;  %v2793_v16 = vld [vmem:[#allocation8 + $0x1a8] sm:$0xff] }
 0x452   : > { %3294 = vmatmul.f32.vlgmr.msrb.gmra.mxu3 %v4852_v12  ;;  %3466 = vmatpush.msra.mxu0 %v2786_v53  ;;  %v2889_v52 = vld [vmem:[#allocation8 + $0x4a8] sm:$0xff] }
 0x453   : > { %3486 = vmatpush.msra.mxu1 %v2882_v59  ;;  %3506 = vmatpush.msra.mxu2 %v2978_v54  ;;  %v2985_v53 = vld [vmem:[#allocation8 + $0x7a8] sm:$0xff]  ;;  %v3115_v59 = vld [vmem:[#allocation8 + $0xbb8] sm:$0xff] }
 0x454   : > { %3362 = vmatpush.msra.mxu3 %v3096_v49  ;;  %3467 = vmatpush.msra.mxu0 %v2780_v22  ;;  %v2787_v54 = vld [vmem:[#allocation8 + $0x178] sm:$0xff] }
 0x455   : > { %3487 = vmatpush.msra.mxu1 %v2876_v24  ;;  %3507 = vmatpush.msra.mxu2 %v2972_v26  ;;  %v2883_v49 = vld [vmem:[#allocation8 + $0x478] sm:$0xff]  ;;  %v3109_v24 = vld [vmem:[#allocation8 + $0xb88] sm:$0xff] }
 0x456   : > { %3363 = vmatpush.msra.mxu3 %v3090_v5  ;;  %3468 = vmatpush.msra.mxu0 %v2774_v44  ;;  %v2979_v22 = vld [vmem:[#allocation8 + $0x778] sm:$0xff]  ;;  %v2781_v26 = vld [vmem:[#allocation8 + $0x148] sm:$0xff] }
 0x457   : > { %3488 = vmatpush.msra.mxu1 %v2870_v47  ;;  %3508 = vmatpush.msra.mxu2 %v2966_v55  ;;  %v2877_v5 = vld [vmem:[#allocation8 + $0x448] sm:$0xff]  ;;  %v3103_v47 = vld [vmem:[#allocation8 + $0xb58] sm:$0xff] }
 0x458   : > { %3364 = vmatpush.msra.mxu3 %v3084_v48  ;;  %3469 = vmatpush.msra.mxu0 %v2768_v10  ;;  %v2973_v44 = vld [vmem:[#allocation8 + $0x748] sm:$0xff]  ;;  %v2775_v55 = vld [vmem:[#allocation8 + $0x118] sm:$0xff] }
 0x459   : > { %3489 = vmatpush.msra.mxu1 %v2864_v57  ;;  %3509 = vmatpush.msra.mxu2 %v2960_v58  ;;  %v2871_v48 = vld [vmem:[#allocation8 + $0x418] sm:$0xff]  ;;  %v3097_v57 = vld [vmem:[#allocation8 + $0xb28] sm:$0xff] }
 0x45a   : > { %3365 = vmatpush.msra.mxu3 %v3078_v31  ;;  %3470 = vmatpush.msra.mxu0 %v2762_v20  ;;  %v2967_v10 = vld [vmem:[#allocation8 + $0x718] sm:$0xff]  ;;  %v2769_v58 = vld [vmem:[#allocation8 + $0xe8] sm:$0xff] }
 0x45b   : > { %3490 = vmatpush.msra.mxu1 %v2858_v17  ;;  %3510 = vmatpush.msra.mxu2 %v2954_v42  ;;  %v2865_v31 = vld [vmem:[#allocation8 + $0x3e8] sm:$0xff]  ;;  %v3091_v17 = vld [vmem:[#allocation8 + $0xaf8] sm:$0xff] }
 0x45c   : > { %3366 = vmatpush.msra.mxu3 %v3072_v32  ;;  %3471 = vmatpush.msra.mxu0 %v2756_v60  ;;  %v2961_v20 = vld [vmem:[#allocation8 + $0x6e8] sm:$0xff]  ;;  %v2763_v42 = vld [vmem:[#allocation8 + $0xb8] sm:$0xff] }
 0x45d   : > { %3491 = vmatpush.msra.mxu1 %v2852_v8  ;;  %3511 = vmatpush.msra.mxu2 %v2948_v18  ;;  %v2859_v32 = vld [vmem:[#allocation8 + $0x3b8] sm:$0xff]  ;;  %v3085_v8 = vld [vmem:[#allocation8 + $0xac8] sm:$0xff] }
 0x45e   : > { %3367 = vmatpush.msra.mxu3 %v3066_v62  ;;  %3472 = vmatpush.msra.mxu0 %v2750_v27  ;;  %v2955_v60 = vld [vmem:[#allocation8 + $0x6b8] sm:$0xff]  ;;  %v2757_v18 = vld [vmem:[#allocation8 + $0x88] sm:$0xff] }
 0x45f   : > { %3492 = vmatpush.msra.mxu1 %v2846_v63  ;;  %3512 = vmatpush.msra.mxu2 %v2942_v0  ;;  %v2853_v62 = vld [vmem:[#allocation8 + $0x388] sm:$0xff]  ;;  %v3079_v63 = vld [vmem:[#allocation8 + $0xa98] sm:$0xff] }
 0x460   : > { %3368 = vmatpush.msra.mxu3 %v3060_v37  ;;  %3473 = vmatpush.msra.mxu0 %v2744_v25  ;;  %v2949_v27 = vld [vmem:[#allocation8 + $0x688] sm:$0xff]  ;;  %v2751_v0 = vld [vmem:[#allocation8 + $0x58] sm:$0xff] }
 0x461   : > { %3493 = vmatpush.msra.mxu1 %v2840_v6  ;;  %3513 = vmatpush.msra.mxu2 %v2936_v30  ;;  %v2847_v37 = vld [vmem:[#allocation8 + $0x358] sm:$0xff]  ;;  %v3073_v6 = vld [vmem:[#allocation8 + $0xa68] sm:$0xff] }
 0x462   : > { %3474 = vmatmul.f32.vlgmr.msra.gmra.mxu0 %v4833_v7  ;;  %3494 = vmatmul.f32.vlgmr.msra.gmra.mxu1 %v4835_v43  ;;  %v2943_v25 = vld [vmem:[#allocation8 + $0x658] sm:$0xff]  ;;  %v2745_v30 = vld [vmem:[#allocation8 + $0x28] sm:$0xff] }
 0x463   : > { %3514 = vmatmul.f32.vlgmr.msra.gmra.mxu2 %v4837_v61  ;;  %3538 = vmatpush.msrb.mxu0 %v2835_v9  ;;  %v2841_v9 = vld [vmem:[#allocation8 + $0x328] sm:$0xff] }
 0x464   : > { %3558 = vmatpush.msrb.mxu1 %v2931_v56  ;;  %3578 = vmatpush.msrb.mxu2 %v3027_v33  ;;  %v2937_v56 = vld [vmem:[#allocation8 + $0x628] sm:$0xff]  ;;  %v3067_v33 = vld [vmem:[#allocation8 + $0xa38] sm:$0xff] }
 0x465   : > { %3369 = vmatpush.msra.mxu3 %v3054_v40  ;;  %3539 = vmatpush.msrb.mxu0 %v2829_v13  ;;  %v3061_v40 = vld [vmem:[#allocation8 + $0xa08] sm:$0xff]  ;;  %v3055_v13 = vld [vmem:[#allocation8 + $0x9d8] sm:$0xff] }
 0x466   : > { %3559 = vmatpush.msrb.mxu1 %v2925_v2  ;;  %3579 = vmatpush.msrb.mxu2 %v3021_v36  ;;  %v3049_v2 = vld [vmem:[#allocation8 + $0x9a8] sm:$0xff]  ;;  %v3043_v36 = vld [vmem:[#allocation8 + $0x978] sm:$0xff] }
 0x467   : > { %3370 = vmatpush.msra.mxu3 %v3048_v39  ;;  %3540 = vmatpush.msrb.mxu0 %v2823_v14  ;;  %v3037_v39 = vld [vmem:[#allocation8 + $0x948] sm:$0xff]  ;;  %v3031_v14 = vld [vmem:[#allocation8 + $0x918] sm:$0xff] }
 0x468   : > { %3560 = vmatpush.msrb.mxu1 %v2919_v15  ;;  %3580 = vmatpush.msrb.mxu2 %v3015_v28  ;;  %v3122_v15 = vld [vmem:[#allocation8 + $0xbf0] sm:$0xff] }
 0x469   : > { %3371 = vmatpush.msra.mxu3 %v3042_v35  ;;  %3541 = vmatpush.msrb.mxu0 %v2817_v23  ;;  %v3098_v28 = vld [vmem:[#allocation8 + $0xb30] sm:$0xff]  ;;  %v3092_v35 = vld [vmem:[#allocation8 + $0xb00] sm:$0xff] }
 0x46a   : > { %3561 = vmatpush.msrb.mxu1 %v2913_v19  ;;  %3581 = vmatpush.msrb.mxu2 %v3009_v1  ;;  %v3086_v23 = vld [vmem:[#allocation8 + $0xad0] sm:$0xff]  ;;  %v3080_v19 = vld [vmem:[#allocation8 + $0xaa0] sm:$0xff] }
 0x46b   : > { %3372 = vmatpush.msra.mxu3 %v3036_v29  ;;  %3542 = vmatpush.msrb.mxu0 %v2811_v50  ;;  %v3639_v1 = vld [vmem:[#allocation11 + $0x78] sm:$0xff]  ;;  %v3074_v29 = vld [vmem:[#allocation8 + $0xa70] sm:$0xff] }
 0x46c   : > { %3562 = vmatpush.msrb.mxu1 %v2907_v34  ;;  %3582 = vmatpush.msrb.mxu2 %v3003_v45  ;;  %v3638_v50 = vld [vmem:[#allocation11 + $0x70] sm:$0xff]  ;;  %v3068_v34 = vld [vmem:[#allocation8 + $0xa40] sm:$0xff]  ;;  %v3637_v45 = vld [vmem:[#allocation11 + $0x68] sm:$0xff] }
 0x46d   : > { %3373 = vmatpush.msra.mxu3 %v3030_v46  ;;  %3543 = vmatpush.msrb.mxu0 %v2805_v41  ;;  %v3062_v46 = vld [vmem:[#allocation8 + $0xa10] sm:$0xff]  ;;  %v3636_v41 = vld [vmem:[#allocation11 + $0x60] sm:$0xff] }
 0x46e   : > { %3563 = vmatpush.msrb.mxu1 %v2901_v38  ;;  %3583 = vmatpush.msrb.mxu2 %v2997_v11  ;;  %v3056_v38 = vld [vmem:[#allocation8 + $0x9e0] sm:$0xff] }
 0x46f   : > { %3374 = vmatmul.f32.vlgmr.msra.gmra.mxu3 %v4852_v12  ;;  %3544 = vmatpush.msrb.mxu0 %v2799_v3  ;;  %v3635_v11 = vld [vmem:[#allocation11 + $0x58] sm:$0xff] }
 0x470   : > { %3564 = vmatpush.msrb.mxu1 %v2895_v4  ;;  %3584 = vmatpush.msrb.mxu2 %v2991_v21  ;;  %v3655_v3 = vld [vmem:[#allocation11 + $0xf8] sm:$0xff]  ;;  %v3050_v4 = vld [vmem:[#allocation8 + $0x9b0] sm:$0xff] }
 0x471   : > { %3438 = vmatpush.msrb.mxu3 %v3121_v51  ;;  %3545 = vmatpush.msrb.mxu0 %v2793_v16  ;;  %v3634_v21 = vld [vmem:[#allocation11 + $0x50] sm:$0xff]  ;;  %v3044_v16 = vld [vmem:[#allocation8 + $0x980] sm:$0xff] }
 0x472   : > { %3565 = vmatpush.msrb.mxu1 %v2889_v52  ;;  %3585 = vmatpush.msrb.mxu2 %v2985_v53  ;;  %v3654_v51 = vld [vmem:[#allocation11 + $0xf0] sm:$0xff]  ;;  %v3633_v52 = vld [vmem:[#allocation11 + $0x48] sm:$0xff] }
 0x473   : > { %3439 = vmatpush.msrb.mxu3 %v3115_v59  ;;  %3546 = vmatpush.msrb.mxu0 %v2787_v54  ;;  %v3653_v53 = vld [vmem:[#allocation11 + $0xe8] sm:$0xff]  ;;  %v3632_v54 = vld [vmem:[#allocation11 + $0x40] sm:$0xff] }
 0x474   : > { %3566 = vmatpush.msrb.mxu1 %v2883_v49  ;;  %3586 = vmatpush.msrb.mxu2 %v2979_v22  ;;  %v3038_v59 = vld [vmem:[#allocation8 + $0x950] sm:$0xff]  ;;  %v3652_v49 = vld [vmem:[#allocation11 + $0xe0] sm:$0xff] }
 0x475   : > { %3440 = vmatpush.msrb.mxu3 %v3109_v24  ;;  %3547 = vmatpush.msrb.mxu0 %v2781_v26  ;;  %v3032_v22 = vld [vmem:[#allocation8 + $0x920] sm:$0xff] }
 0x476   : > { %3567 = vmatpush.msrb.mxu1 %v2877_v5  ;;  %3587 = vmatpush.msrb.mxu2 %v2973_v44  ;;  %v3631_v24 = vld [vmem:[#allocation11 + $0x38] sm:$0xff]  ;;  %v3630_v44 = vld [vmem:[#allocation11 + $0x30] sm:$0xff] }
 0x477   : > { %3441 = vmatpush.msrb.mxu3 %v3103_v47  ;;  %3548 = vmatpush.msrb.mxu0 %v2775_v55  ;;  %v3651_v26 = vld [vmem:[#allocation11 + $0xd8] sm:$0xff]  ;;  %v3650_v47 = vld [vmem:[#allocation11 + $0xd0] sm:$0xff]  ;;  %v3117_v55 = vld [vmem:[#allocation8 + $0xbc8] sm:$0xff] }
 0x478   : > { %3568 = vmatpush.msrb.mxu1 %v2871_v48  ;;  %3588 = vmatpush.msrb.mxu2 %v2967_v10  ;;  %v3123_v5 = vld [vmem:[#allocation8 + $0xbf8] sm:$0xff]  ;;  %v3629_v48 = vld [vmem:[#allocation11 + $0x28] sm:$0xff] }
 0x479   : > { %3442 = vmatpush.msrb.mxu3 %v3097_v57  ;;  %3549 = vmatpush.msrb.mxu0 %v2769_v58  ;;  %v3649_v10 = vld [vmem:[#allocation11 + $0xc8] sm:$0xff]  ;;  %v3628_v57 = vld [vmem:[#allocation11 + $0x20] sm:$0xff] }
 0x47a   : > { %3569 = vmatpush.msrb.mxu1 %v2865_v31  ;;  %3589 = vmatpush.msrb.mxu2 %v2961_v20  ;;  %v3648_v58 = vld [vmem:[#allocation11 + $0xc0] sm:$0xff]  ;;  %v3111_v31 = vld [vmem:[#allocation8 + $0xb98] sm:$0xff] }
 0x47b   : > { %3443 = vmatpush.msrb.mxu3 %v3091_v17  ;;  %3550 = vmatpush.msrb.mxu0 %v2763_v42  ;;  %v3627_v20 = vld [vmem:[#allocation11 + $0x18] sm:$0xff]  ;;  %v3105_v42 = vld [vmem:[#allocation8 + $0xb68] sm:$0xff] }
 0x47c   : > { %3570 = vmatpush.msrb.mxu1 %v2859_v32  ;;  %3590 = vmatpush.msrb.mxu2 %v2955_v60  ;;  %v3647_v17 = vld [vmem:[#allocation11 + $0xb8] sm:$0xff]  ;;  %v3626_v32 = vld [vmem:[#allocation11 + $0x10] sm:$0xff] }
 0x47d   : > { %3444 = vmatpush.msrb.mxu3 %v3085_v8  ;;  %3551 = vmatpush.msrb.mxu0 %v2757_v18  ;;  %v3671_v60 = vld [vmem:[#allocation11 + $0x178] sm:$0xff]  ;;  %v3646_v8 = vld [vmem:[#allocation11 + $0xb0] sm:$0xff] }
 0x47e   : > { %3571 = vmatpush.msrb.mxu1 %v2853_v62  ;;  %3591 = vmatpush.msrb.mxu2 %v2949_v27  ;;  %v3670_v18 = vld [vmem:[#allocation11 + $0x170] sm:$0xff]  ;;  %v3625_v27 = vld [vmem:[#allocation11 + $0x8] sm:$0xff] }
 0x47f   : > { %3445 = vmatpush.msrb.mxu3 %v3079_v63  ;;  %3552 = vmatpush.msrb.mxu0 %v2751_v0  ;;  %v3099_v62 = vld [vmem:[#allocation8 + $0xb38] sm:$0xff]  ;;  %v3645_v63 = vld [vmem:[#allocation11 + $0xa8] sm:$0xff] }
 0x480   : > { %3572 = vmatpush.msrb.mxu1 %v2847_v37  ;;  %3592 = vmatpush.msrb.mxu2 %v2943_v25  ;;  %v3669_v0 = vld [vmem:[#allocation11 + $0x168] sm:$0xff]  ;;  %v3624_v25 = vld [vmem:[#allocation11] sm:$0xff] }
 0x481   : > { %3446 = vmatpush.msrb.mxu3 %v3073_v6  ;;  %3553 = vmatpush.msrb.mxu0 %v2745_v30  ;;  %v3093_v37 = vld [vmem:[#allocation8 + $0xb08] sm:$0xff]  ;;  %v3087_v30 = vld [vmem:[#allocation8 + $0xad8] sm:$0xff] }
 0x482   : > { %3573 = vmatpush.msrb.mxu1 %v2841_v9  ;;  %3593 = vmatpush.msrb.mxu2 %v2937_v56  ;;  %v3644_v6 = vld [vmem:[#allocation11 + $0xa0] sm:$0xff]  ;;  %v4865_v9 = vld [vmem:[#allocation10] sm:$0x3f] }
 0x483   : > { %3554 = vmatmul.f32.vlgmr.msrb.gmra.mxu0 %v4833_v7  ;;  %3574 = vmatmul.f32.vlgmr.msrb.gmra.mxu1 %v4835_v43  ;;  %v3116_v7 = vld [vmem:[#allocation8 + $0xbc0] sm:$0xff]  ;;  %v3110_v43 = vld [vmem:[#allocation8 + $0xb90] sm:$0xff] }
 0x484   : > { %3594 = vmatmul.f32.vlgmr.msrb.gmra.mxu2 %v4837_v61  ;;  %3447 = vmatpush.msrb.mxu3 %v3067_v33  ;;  %v3104_v61 = vld [vmem:[#allocation8 + $0xb60] sm:$0xff]  ;;  %v3081_v33 = vld [vmem:[#allocation8 + $0xaa8] sm:$0xff] }
 0x485   : > { %3724 = vmatpush.msra.mxu0 %v3639_v1  ;;  %3744 = vmatpush.msra.mxu1 %v3655_v3  ;;  %v3643_v56 = vld [vmem:[#allocation11 + $0x98] sm:$0xff]  ;;  %v3195_v1 = vpop.f32.mrf.mxu2 }
 0x486   : > { %3448 = vmatpush.msrb.mxu3 %v3061_v40  ;;  %3764 = vmatpush.msra.mxu2 %v3671_v60  ;;  %v3642_v40 = vld [vmem:[#allocation11 + $0x90] sm:$0xff]  ;;  %v3128_v60 = vperm.slane %v4865_v9, 2 }
 0x487   : > { %3725 = vmatpush.msra.mxu0 %v3638_v50  ;;  %3745 = vmatpush.msra.mxu1 %v3654_v51 }
 0x488   : > { %3449 = vmatpush.msrb.mxu3 %v3055_v13  ;;  %3765 = vmatpush.msra.mxu2 %v3670_v18  ;;  %v3126_v13 = vperm.slane %v4865_v9, 0  ;;  %v3681_v18 = vld [vmem:[#allocation11 + $0x1c8] sm:$0xff] }
 0x489   : > { %3726 = vmatpush.msra.mxu0 %v3637_v45  ;;  %3746 = vmatpush.msra.mxu1 %v3653_v53  ;;  %v3664_v45 = vld [vmem:[#allocation11 + $0x140] sm:$0xff] }
 0x48a   : > { %3450 = vmatpush.msrb.mxu3 %v3049_v2  ;;  %3766 = vmatpush.msra.mxu2 %v3669_v0  ;;  %v3075_v2 = vld [vmem:[#allocation8 + $0xa78] sm:$0xff]  ;;  %v3033_v53 = vld [vmem:[#allocation8 + $0x928] sm:$0xff] }
 0x48b   : > { %3727 = vmatpush.msra.mxu0 %v3636_v41  ;;  %3747 = vmatpush.msra.mxu1 %v3652_v49  ;;  %v3127_v41 = vperm.slane %v4865_v9, 1  ;;  %v3660_v49 = vld [vmem:[#allocation11 + $0x120] sm:$0xff]  ;;  %v3678_v0 = vld [vmem:[#allocation11 + $0x1b0] sm:$0xff] }
 0x48c   : > { %3451 = vmatpush.msrb.mxu3 %v3043_v36  ;;  %v3155_v36 = vpop.f32.mrf.mxu0 }
 0x48d   : > { %3728 = vmatpush.msra.mxu0 %v3635_v11  ;;  %3748 = vmatpush.msra.mxu1 %v3651_v26  ;;  %v3663_v11 = vld [vmem:[#allocation11 + $0x138] sm:$0xff] }
 0x48e   : > { %3452 = vmatpush.msrb.mxu3 %v3037_v39  ;;  %v3641_v39 = vld [vmem:[#allocation11 + $0x88] sm:$0xff] }
 0x48f   : > { %3729 = vmatpush.msra.mxu0 %v3634_v21  ;;  %3749 = vmatpush.msra.mxu1 %v3650_v47  ;;  %v3039_v21 = vld [vmem:[#allocation8 + $0x958] sm:$0xff] }
 0x490   : > { %3453 = vmatpush.msrb.mxu3 %v3031_v14  ;;  %v3069_v14 = vld [vmem:[#allocation8 + $0xa48] sm:$0xff] }
 0x491   : > { %3454 = vmatmul.f32.vlgmr.msrb.gmra.mxu3 %v4852_v12  ;;  %3730 = vmatpush.msra.mxu0 %v3633_v52 }
 0x492   : > { %3518 = vmatpush.msra.mxu3 %v3122_v15  ;;  %3750 = vmatpush.msra.mxu1 %v3649_v10  ;;  %v3668_v15 = vld [vmem:[#allocation11 + $0x160] sm:$0xff]  ;;  %v3657_v10 = vld [vmem:[#allocation11 + $0x108] sm:$0xff] }
 0x493   : > { %3731 = vmatpush.msra.mxu0 %v3632_v54  ;;  %3767 = vmatpush.msra.mxu2 %v3668_v15  ;;  %v3661_v54 = vld [vmem:[#allocation11 + $0x128] sm:$0xff]  ;;  %v3672_v15 = vld [vmem:[#allocation11 + $0x180] sm:$0xff] }
 0x494   : > { %3519 = vmatpush.msra.mxu3 %v3116_v7  ;;  %3751 = vmatpush.msra.mxu1 %v3648_v58  ;;  %v3667_v7 = vld [vmem:[#allocation11 + $0x158] sm:$0xff]  ;;  %v3235_v3 = vpop.f32.mrf.mxu0  ;;  %v3686_v58 = vld [vmem:[#allocation11 + $0x1f0] sm:$0xff] }
 0x495   : > { %3732 = vmatpush.msra.mxu0 %v3631_v24  ;;  %3768 = vmatpush.msra.mxu2 %v3667_v7  ;;  %v3236_v52 = vadd.f32 %v3235_v3, %v3127_v41  ;;  %v3275_v24 = vpop.f32.mrf.mxu2  ;;  %v3703_v7 = vld [vmem:[#allocation11 + $0x278] sm:$0xff] }
 0x496   : > { %3520 = vmatpush.msra.mxu3 %v3110_v43  ;;  %3752 = vmatpush.msra.mxu1 %v3647_v17  ;;  %v3640_v43 = vld [vmem:[#allocation11 + $0x80] sm:$0xff]  ;;  %v3685_v17 = vld [vmem:[#allocation11 + $0x1e8] sm:$0xff] }
 0x497   : > { %3733 = vmatpush.msra.mxu0 %v3630_v44 }
 0x498   : > { %3521 = vmatpush.msra.mxu3 %v3104_v61  ;;  %3753 = vmatpush.msra.mxu1 %v3646_v8  ;;  %v3156_v61 = vadd.f32 %v3155_v36, %v3126_v13  ;;  %v3675_v13 = vld [vmem:[#allocation11 + $0x198] sm:$0xff] }
 0x499   : > { %3734 = vmatpush.msra.mxu0 %v3629_v48 }
 0x49a   : > { %3522 = vmatpush.msra.mxu3 %v3098_v28  ;;  %3754 = vmatpush.msra.mxu1 %v3645_v63  ;;  %v3063_v28 = vld [vmem:[#allocation8 + $0xa18] sm:$0xff] }
 0x49b   : > { %3735 = vmatpush.msra.mxu0 %v3628_v57  ;;  %v3687_v57 = vld [vmem:[#allocation11 + $0x1f8] sm:$0xff] }
 0x49c   : > { %3523 = vmatpush.msra.mxu3 %v3092_v35  ;;  %3755 = vmatpush.msra.mxu1 %v3644_v6  ;;  %v3666_v35 = vld [vmem:[#allocation11 + $0x150] sm:$0xff]  ;;  %v3315_v8 = vpop.f32.mrf.mxu0  ;;  %v3677_v6 = vld [vmem:[#allocation11 + $0x1a8] sm:$0xff] }
 0x49d   : > { %3736 = vmatpush.msra.mxu0 %v3627_v20  ;;  %3769 = vmatpush.msra.mxu2 %v3666_v35  ;;  %v3656_v20 = vld [vmem:[#allocation11 + $0x100] sm:$0xff]  ;;  %v3316_v63 = vadd.f32 %v3315_v8, %v3128_v60  ;;  %v3699_v35 = vld [vmem:[#allocation11 + $0x258] sm:$0xff] }
 0x49e   : > { %3524 = vmatpush.msra.mxu3 %v3086_v23  ;;  %3756 = vmatpush.msra.mxu1 %v3643_v56  ;;  %v3057_v23 = vld [vmem:[#allocation8 + $0x9e8] sm:$0xff] }
 0x49f   : > { %3737 = vmatpush.msra.mxu0 %v3626_v32  ;;  %v3682_v32 = vld [vmem:[#allocation11 + $0x1d0] sm:$0xff]  ;;  %v3676_v56 = vld [vmem:[#allocation11 + $0x1a0] sm:$0xff] }
 0x4a0   : > { %3525 = vmatpush.msra.mxu3 %v3080_v19  ;;  %3757 = vmatpush.msra.mxu1 %v3642_v40  ;;  %v3175_v19 = vpop.f32.mrf.mxu1 }
 0x4a1   : > { %3738 = vmatpush.msra.mxu0 %v3625_v27  ;;  %v3176_v50 = vadd.f32 %v3175_v19, %v3156_v61  ;;  %v3679_v27 = vld [vmem:[#allocation11 + $0x1b8] sm:$0xff]  ;;  %v3701_v61 = vld [vmem:[#allocation11 + $0x268] sm:$0xff] }
 0x4a2   : > { %3526 = vmatpush.msra.mxu3 %v3074_v29  ;;  %3758 = vmatpush.msra.mxu1 %v3641_v39  ;;  %v3665_v29 = vld [vmem:[#allocation11 + $0x148] sm:$0xff]  ;;  %v3674_v39 = vld [vmem:[#allocation11 + $0x190] sm:$0xff] }
 0x4a3   : > { %3739 = vmatpush.msra.mxu0 %v3624_v25  ;;  %3770 = vmatpush.msra.mxu2 %v3665_v29  ;;  %v3355_v25 = vpop.f32.mrf.mxu2  ;;  %v3697_v19 = vld [vmem:[#allocation11 + $0x248] sm:$0xff]  ;;  %v3695_v29 = vld [vmem:[#allocation11 + $0x238] sm:$0xff] }
 0x4a4   : > { %3527 = vmatpush.msra.mxu3 %v3068_v34  ;;  %3759 = vmatpush.msra.mxu1 %v3640_v43  ;;  %v3051_v34 = vld [vmem:[#allocation8 + $0x9b8] sm:$0xff] }
 0x4a5   : > { %3771 = vmatpush.msra.mxu2 %v3664_v45  ;;  %v3702_v43 = vld [vmem:[#allocation11 + $0x270] sm:$0xff]  ;;  %3804 = vmatpush.msrb.mxu0 %v3703_v7 }
 0x4a6   : > { %3528 = vmatpush.msra.mxu3 %v3062_v46  ;;  %v3196_v46 = vadd.f32 %v3195_v1, %v3176_v50  ;;  %v3696_v1 = vld [vmem:[#allocation11 + $0x240] sm:$0xff]  ;;  %v3129_v50 = vperm.slane %v4865_v9, 3 }
 0x4a7   : > { %3772 = vmatpush.msra.mxu2 %v3663_v11  ;;  %3805 = vmatpush.msrb.mxu0 %v3702_v43  ;;  %v3691_v11 = vld [vmem:[#allocation11 + $0x218] sm:$0xff] }
 0x4a8   : > { %3529 = vmatpush.msra.mxu3 %v3056_v38  ;;  %v3045_v38 = vld [vmem:[#allocation8 + $0x988] sm:$0xff] }
 0x4a9   : > { %3806 = vmatpush.msrb.mxu0 %v3701_v61 }
 0x4aa   : > { %3530 = vmatpush.msra.mxu3 %v3050_v4 }
 0x4ac   : > { %3531 = vmatpush.msra.mxu3 %v3044_v16  ;;  %v3662_v16 = vld [vmem:[#allocation11 + $0x130] sm:$0xff] }
 0x4ad   : > { %3773 = vmatpush.msra.mxu2 %v3662_v16 }
 0x4ae   : > { %3532 = vmatpush.msra.mxu3 %v3038_v59 }
 0x4af   : > { %3774 = vmatpush.msra.mxu2 %v3661_v54 }
 0x4b0   : > { %3533 = vmatpush.msra.mxu3 %v3032_v22  ;;  %v3255_v22 = vpop.f32.mrf.mxu1 }
 0x4b1   : > { %3534 = vmatmul.f32.vlgmr.msra.gmra.mxu3 %v4852_v12  ;;  %v3256_v26 = vadd.f32 %v3255_v22, %v3236_v52  ;;  %3775 = vmatpush.msra.mxu2 %v3660_v49  ;;  %v3690_v52 = vld [vmem:[#allocation11 + $0x210] sm:$0xff]  ;;  %v3688_v49 = vld [vmem:[#allocation11 + $0x200] sm:$0xff]  ;;  %v3719_v22 = vld [vmem:[#allocation11 + $0x2f8] sm:$0xff] }
 0x4b2   : > { %3598 = vmatpush.msrb.mxu3 %v3123_v5  ;;  %v3659_v5 = vld [vmem:[#allocation11 + $0x118] sm:$0xff]  ;;  %3824 = vmatpush.msrb.mxu1 %v3719_v22 }
 0x4b3   : > { %v3276_v44 = vadd.f32 %v3275_v24, %v3256_v26  ;;  %3776 = vmatpush.msra.mxu2 %v3659_v5  ;;  %v3718_v24 = vld [vmem:[#allocation11 + $0x2f0] sm:$0xff]  ;;  %v3717_v26 = vld [vmem:[#allocation11 + $0x2e8] sm:$0xff]  ;;  %v3716_v5 = vld [vmem:[#allocation11 + $0x2e0] sm:$0xff] }
 0x4b4   : > { %3599 = vmatpush.msrb.mxu3 %v3117_v55  ;;  %v3658_v55 = vld [vmem:[#allocation11 + $0x110] sm:$0xff]  ;;  %3825 = vmatpush.msrb.mxu1 %v3718_v24 }
 0x4b5   : > { %3777 = vmatpush.msra.mxu2 %v3658_v55  ;;  %v3713_v55 = vld [vmem:[#allocation11 + $0x2c8] sm:$0xff] }
 0x4b6   : > { %3600 = vmatpush.msrb.mxu3 %v3111_v31  ;;  %3826 = vmatpush.msrb.mxu1 %v3717_v26 }
 0x4b7   : > { %3778 = vmatpush.msra.mxu2 %v3657_v10  ;;  %v3711_v10 = vld [vmem:[#allocation11 + $0x2b8] sm:$0xff] }
 0x4b8   : > { %3601 = vmatpush.msrb.mxu3 %v3105_v42  ;;  %v3683_v42 = vld [vmem:[#allocation11 + $0x1d8] sm:$0xff]  ;;  %3827 = vmatpush.msrb.mxu1 %v3716_v5 }
 0x4b9   : > { %3779 = vmatpush.msra.mxu2 %v3656_v20  ;;  %v3709_v20 = vld [vmem:[#allocation11 + $0x2a8] sm:$0xff] }
 0x4ba   : > { %3602 = vmatpush.msrb.mxu3 %v3099_v62  ;;  %v3680_v62 = vld [vmem:[#allocation11 + $0x1c0] sm:$0xff] }
 0x4bc   : > { %3603 = vmatpush.msrb.mxu3 %v3093_v37  ;;  %v3335_v37 = vpop.f32.mrf.mxu1 }
 0x4bd   : > { %v3395_v45 = vpop.f32.mrf.mxu0 }
 0x4be   : > { %3604 = vmatpush.msrb.mxu3 %v3087_v30  ;;  %v3336_v30 = vadd.f32 %v3335_v37, %v3316_v63  ;;  %v3396_v41 = vadd.f32 %v3395_v45, %v3129_v50 }
 0x4c0   : > { %3605 = vmatpush.msrb.mxu3 %v3081_v33  ;;  %v3356_v33 = vadd.f32 %v3355_v25, %v3336_v30  ;;  %v3704_v25 = vld [vmem:[#allocation11 + $0x280] sm:$0xff] }
 0x4c2   : > { %3606 = vmatpush.msrb.mxu3 %v3075_v2 }
 0x4c4   : > { %3607 = vmatpush.msrb.mxu3 %v3069_v14  ;;  %v3673_v14 = vld [vmem:[#allocation11 + $0x188] sm:$0xff]  ;;  %v3415_v3 = vpop.f32.mrf.mxu1 }
 0x4c6   : > { %3608 = vmatpush.msrb.mxu3 %v3063_v28  ;;  %v3700_v28 = vld [vmem:[#allocation11 + $0x260] sm:$0xff] }
 0x4c7   : > { %3807 = vmatpush.msrb.mxu0 %v3700_v28 }
 0x4c8   : > { %3609 = vmatpush.msrb.mxu3 %v3057_v23  ;;  %v3698_v23 = vld [vmem:[#allocation11 + $0x250] sm:$0xff] }
 0x4c9   : > { %3808 = vmatpush.msrb.mxu0 %v3699_v35 }
 0x4ca   : > { %3610 = vmatpush.msrb.mxu3 %v3051_v34  ;;  %v3694_v34 = vld [vmem:[#allocation11 + $0x230] sm:$0xff] }
 0x4cb   : > { %3809 = vmatpush.msrb.mxu0 %v3698_v23 }
 0x4cc   : > { %v3215_v4 = vpop.f32.mrf.mxu3  ;;  %3611 = vmatpush.msrb.mxu3 %v3045_v38  ;;  %v3692_v38 = vld [vmem:[#allocation11 + $0x220] sm:$0xff] }
 0x4cd   : > { %v3216_v51 = vadd.f32 %v3215_v4, %v3196_v46  ;;  %3810 = vmatpush.msrb.mxu0 %v3697_v19  ;;  %v3693_v46 = vld [vmem:[#allocation11 + $0x228] sm:$0xff]  ;;  %v3435_v4 = vpop.f32.mrf.mxu2 }
 0x4ce   : > { %3612 = vmatpush.msrb.mxu3 %v3039_v21  ;;  %v3416_v21 = vadd.f32 %v3415_v3, %v3396_v41 }
 0x4cf   : > { %v3618_v59 = vmax.f32 %v3216_v51, 0.0  ;;  %3811 = vmatpush.msrb.mxu0 %v3696_v1 }
 0x4d0   : > { %3613 = vmatpush.msrb.mxu3 %v3033_v53  ;;  %v3436_v51 = vadd.f32 %v3435_v4, %v3416_v21 }
 0x4d1   : > { %3740 = vmatmul.f32.vlgmr.msra.gmra.mxu0 %v3618_v59  ;;  %3614 = vmatmul.f32.vlgmr.msrb.gmra.mxu3 %v4852_v12  ;;  %v3684_v12 = vld [vmem:[#allocation11 + $0x1e0] sm:$0xff]  ;;  %v3689_v59 = vld [vmem:[#allocation11 + $0x208] sm:$0xff] }
 0x4d2   : > { %3784 = vmatpush.msra.mxu3 %v3687_v57  ;;  %3812 = vmatpush.msrb.mxu0 %v3695_v29  ;;  %v3130_v57 = vperm.slane %v4865_v9, 4 }
 0x4d4   : > { %3785 = vmatpush.msra.mxu3 %v3686_v58  ;;  %3813 = vmatpush.msrb.mxu0 %v3694_v34  ;;  %v3710_v58 = vld [vmem:[#allocation11 + $0x2b0] sm:$0xff] }
 0x4d5   : > { %v3295_v47 = vpop.f32.mrf.mxu3 }
 0x4d6   : > { %v3296_v48 = vadd.f32 %v3295_v47, %v3276_v44  ;;  %3786 = vmatpush.msra.mxu3 %v3685_v17  ;;  %3814 = vmatpush.msrb.mxu0 %v3693_v46  ;;  %v3715_v44 = vld [vmem:[#allocation11 + $0x2d8] sm:$0xff]  ;;  %v3714_v47 = vld [vmem:[#allocation11 + $0x2d0] sm:$0xff] }
 0x4d7   : > { %3828 = vmatpush.msrb.mxu1 %v3715_v44 }
 0x4d8   : > { %v3619_v31 = vmax.f32 %v3296_v48, 0.0  ;;  %3787 = vmatpush.msra.mxu3 %v3684_v12  ;;  %3815 = vmatpush.msrb.mxu0 %v3692_v38  ;;  %v3712_v48 = vld [vmem:[#allocation11 + $0x2c0] sm:$0xff] }
 0x4d9   : > { %3829 = vmatpush.msrb.mxu1 %v3714_v47  ;;  %v3708_v12 = vld [vmem:[#allocation11 + $0x2a0] sm:$0xff] }
 0x4da   : > { %3760 = vmatmul.f32.vlgmr.msra.gmra.mxu1 %v3619_v31  ;;  %3788 = vmatpush.msra.mxu3 %v3683_v42  ;;  %v3707_v42 = vld [vmem:[#allocation11 + $0x298] sm:$0xff] }
 0x4db   : > { %3816 = vmatpush.msrb.mxu0 %v3691_v11  ;;  %3830 = vmatpush.msrb.mxu1 %v3713_v55 }
 0x4dc   : > { %3789 = vmatpush.msra.mxu3 %v3682_v32 }
 0x4dd   : > { %3817 = vmatpush.msrb.mxu0 %v3690_v52  ;;  %3831 = vmatpush.msrb.mxu1 %v3712_v48 }
 0x4de   : > { %3790 = vmatpush.msra.mxu3 %v3681_v18 }
 0x4df   : > { %3818 = vmatpush.msrb.mxu0 %v3689_v59  ;;  %v3475_v31 = vpop.f32.mrf.mxu0  ;;  %3832 = vmatpush.msrb.mxu1 %v3711_v10  ;;  %v3495_v32 = vpop.f32.mrf.mxu1 }
 0x4e0   : > { %3791 = vmatpush.msra.mxu3 %v3680_v62  ;;  %v3476_v17 = vadd.f32 %v3475_v31, %v3130_v57  ;;  %v3706_v62 = vld [vmem:[#allocation11 + $0x290] sm:$0xff] }
 0x4e1   : > { %3819 = vmatpush.msrb.mxu0 %v3688_v49  ;;  %3833 = vmatpush.msrb.mxu1 %v3710_v58 }
 0x4e2   : > { %3792 = vmatpush.msra.mxu3 %v3679_v27  ;;  %v3496_v8 = vadd.f32 %v3495_v32, %v3476_v17 }
 0x4e3   : > { %3834 = vmatpush.msrb.mxu1 %v3709_v20 }
 0x4e4   : > { %3793 = vmatpush.msra.mxu3 %v3678_v0  ;;  %v3705_v0 = vld [vmem:[#allocation11 + $0x288] sm:$0xff] }
 0x4e5   : > { %3835 = vmatpush.msrb.mxu1 %v3708_v12 }
 0x4e6   : > { %3794 = vmatpush.msra.mxu3 %v3677_v6  ;;  %v3515_v60 = vpop.f32.mrf.mxu2  ;;  %v3131_v6 = vperm.slane %v4865_v9, 5 }
 0x4e7   : > { %3836 = vmatpush.msrb.mxu1 %v3707_v42  ;;  %v3516_v18 = vadd.f32 %v3515_v60, %v3496_v8 }
 0x4e8   : > { %3795 = vmatpush.msra.mxu3 %v3676_v56 }
 0x4e9   : > { %3837 = vmatpush.msrb.mxu1 %v3706_v62 }
 0x4ea   : > { %3796 = vmatpush.msra.mxu3 %v3675_v13 }
 0x4eb   : > { %3838 = vmatpush.msrb.mxu1 %v3705_v0 }
 0x4ec   : > { %3797 = vmatpush.msra.mxu3 %v3674_v39 }
 0x4ed   : > { %3839 = vmatpush.msrb.mxu1 %v3704_v25 }
 0x4ee   : > { %3798 = vmatpush.msra.mxu3 %v3673_v14 }
 0x4f0   : > { %3799 = vmatpush.msra.mxu3 %v3672_v15  ;;  %v4127_v15 = vld [vmem:[#allocation13] ss:$0 sm:$0xff] }
 0x4f2   : > { %v3375_v40 = vpop.f32.mrf.mxu3 }
 0x4f3   : > { %v3376_v2 = vadd.f32 %v3375_v40, %v3356_v33 }
 0x4f5   : > { %v3620_v36 = vmax.f32 %v3376_v2, 0.0 }
 0x4f7   : > { %3780 = vmatmul.f32.vlgmr.msra.gmra.mxu2 %v3620_v36 }
 0x500   : > { %v3555_v30 = vpop.f32.mrf.mxu0  ;;  %v3575_v33 = vpop.f32.mrf.mxu1 }
 0x501   : > { %v3556_v56 = vadd.f32 %v3555_v30, %v3131_v6 }
 0x503   : > { %v3576_v13 = vadd.f32 %v3575_v33, %v3556_v56 }
 0x507   : > { %v3595_v40 = vpop.f32.mrf.mxu2 }
 0x508   : > { %v3596_v2 = vadd.f32 %v3595_v40, %v3576_v13 }
 0x514   : > { %v3455_v16 = vpop.f32.mrf.mxu3 }
 0x515   : > { %v3456_v53 = vadd.f32 %v3455_v16, %v3436_v51 }
 0x517   : > { %v3621_v54 = vmax.f32 %v3456_v53, 0.0 }
 0x519   : > { %3800 = vmatmul.f32.vlgmr.msra.gmra.mxu3 %v3621_v54 }
 0x534   : > { %v3535_v27 = vpop.f32.mrf.mxu3 }
 0x535   : > { %v3536_v63 = vadd.f32 %v3535_v27, %v3516_v18 }
 0x537   : > { %v3622_v37 = vmax.f32 %v3536_v63, 0.0 }
 0x539   : > { %3820 = vmatmul.f32.vlgmr.msrb.gmra.mxu0 %v3622_v37 }
 0x54e   : > { %v3741_v7 = vpop.f32.mrf.mxu0 }
 0x54f   : > { %v3742_v61 = vadd.f32 %v4127_v15, %v3741_v7 }
 0x554   : > { %v3615_v36 = vpop.f32.mrf.mxu3 }
 0x555   : > { %v3616_v39 = vadd.f32 %v3615_v36, %v3596_v2 }
 0x557   : > { %v3623_v14 = vmax.f32 %v3616_v39, 0.0  ;;  %v3761_v43 = vpop.f32.mrf.mxu1 }
 0x558   : > { %v3762_v9 = vadd.f32 %v3761_v43, %v3742_v61 }
 0x559   : > { %3840 = vmatmul.f32.vlgmr.msrb.gmra.mxu1 %v3623_v14 }
 0x57a   : > { %v3781_v28 = vpop.f32.mrf.mxu2 }
 0x57b   : > { %v3782_v23 = vadd.f32 %v3781_v28, %v3762_v9 }
 0x59c   : > { %v3801_v35 = vpop.f32.mrf.mxu3 }
 0x59d   : > { %v3802_v1 = vadd.f32 %v3801_v35, %v3782_v23 }
 0x5b6   : > { %v3821_v19 = vpop.f32.mrf.mxu0 }
 0x5b7   : > { %v3822_v29 = vadd.f32 %v3821_v19, %v3802_v1 }
 0x5d6   : > { %v3841_v50 = vpop.f32.mrf.mxu1 }
 0x5d7   : > { %v3842_v34 = vadd.f32 %v3841_v50, %v3822_v29 }
 0x5d9   : > { %3844 = vst [vmem:[%s389_s30] sm:$0xff] %v3842_v34 }
 0x5da   : > { %4365 = shalt.err (!%p4362_p9)
}
 0x5db   : > { %4040 = dma.vmem_to_hbm [thread:$0]  (%p4567_p4), %s3859_s13, 128, %s3861_s11, %s3846_s8  }
 0x5dc PF: > { %s3872_s18 = sand.u32 1, %s4404_s24   ;;  %p4927_p10 = scmp.ge.s32.totalorder %s4416_s27, 2 }
 0x5dd   : > { %s3873_s1 = scalar_lea.sflag [#allocation4], %s3872_s18 }
 0x5de   : > { %p4066_p13 = pnand %p4927_p10, %p4571_p6 }
 0x5e0   : > { %p4067_p11 = pneg %p4066_p13 }
 0x5e2   : > { %4399 = dma.done.wait (%p4067_p11), %s3873_s1, 128  }
 0x5e3   : > { %4401 = vsyncadd (%p4067_p11), %s3873_s1, 4294967168  ;;  %p23_p0 = scmp.ge.s32.totalorder %s4541_s16, 4   ;;  %s4928_s24 = smov %s4408_s25 }
 0x5e4   : > { %s4929_s25 = smov %s4412_s26  ;;  %s4930_s26 = smov %s4552_s14 }
 0x5e5   : > { %s4931_s27 = smov %s4541_s16  ;;  %25 = sbr.rel (!%p23_p0) target bundleno = 11 (0xb), region = 117 }
 0x5ea   :  { %3879 = vsyncpa [#allocation3], 1 }
 0x5eb   :  { %3881 = vsyncpa [#allocation3 + $0x1], 1 }
 0x5ec   :  { %3882 = vsyncpa [#allocation6], 1 }
 0x5ed   :  { %3883 = vsyncpa [#allocation9], 1 }
 0x5ee   :  { %3884 = vsyncpa [#allocation12], 1 }
 0x5ef   :  { %3885 = vsyncpa [#allocation4], 1 }
 0x5f0   :  { %3887 = vsyncpa [#allocation4 + $0x1], 1 }

</bundles_post_ra>
